<compile_context>
chip_gen: v6e
topology: v6e:2x2x1
jax: 0.10.0
libtpu: 0.0.40
codegen_flags: <defaults>
</compile_context>

<pallas_src>
import jax
import jax.numpy as jnp
from jax.experimental import pallas as pl
from jax.experimental.pallas import tpu as pltpu

K = 3            # Conv1d kernel size
C1_OUT = 32      # conv1 out channels
C2_OUT = 64      # conv2 out channels
HIDDEN = 128     # LSTM hidden size
FC1_OUT = 64
NC_PAD = 128     # fc2 output padded to a full 128-lane register
PW = 4 * HIDDEN  # packed-parameter column width (512)


def _align16(n):
    return ((n + 15) // 16) * 16


def weight_layout(num_features):
    """Row offsets of each weight matrix inside the packed bf16 (RW, PW) slab."""
    names_rows = [
        ("w1", K * num_features),    # (K*Cin, 32)   im2col conv1 weight
        ("w2", K * C1_OUT),          # (96, 64)      im2col conv2 weight
        ("wih0", C2_OUT),            # (64, 512)
        ("whh0", HIDDEN),            # (128, 512)
        ("wcat1", 2 * HIDDEN),       # (256, 512)    [W_ih1; W_hh1] stacked
        ("wfc1", HIDDEN),            # (128, 64)
        ("wfc2", FC1_OUT),           # (64, NC_PAD)  zero-padded columns
    ]
    lay, off = {}, 0
    for name, rows in names_rows:
        lay[name] = off
        off += _align16(rows)        # keep every block bf16-sublane aligned
    return lay, off


def init_params(key, num_features, num_classes):
    """Deterministic synthetic parameters with the module's shapes."""
    ks = jax.random.split(key, 8)
    u = lambda k, shape, s: jax.random.uniform(k, shape, jnp.float32, -s, s)
    return {
        # conv weights stored as (K, Cin, Cout) = PyTorch (Cout, Cin, K) transposed
        "w1": u(ks[0], (K, num_features, C1_OUT), 0.3),
        "b1": jnp.zeros((C1_OUT,), jnp.float32),
        "w2": u(ks[1], (K, C1_OUT, C2_OUT), 0.1),
        "b2": jnp.zeros((C2_OUT,), jnp.float32),
        # LSTM weights stored transposed: (in, 4*HIDDEN), gate order i,f,g,o
        "wih0": u(ks[2], (C2_OUT, 4 * HIDDEN), 0.1),
        "whh0": u(ks[3], (HIDDEN, 4 * HIDDEN), 0.1),
        "bl0": jnp.zeros((4 * HIDDEN,), jnp.float32),   # b_ih + b_hh
        "wih1": u(ks[4], (HIDDEN, 4 * HIDDEN), 0.1),
        "whh1": u(ks[5], (HIDDEN, 4 * HIDDEN), 0.1),
        "bl1": jnp.zeros((4 * HIDDEN,), jnp.float32),
        # FC weights stored transposed: (in, out)
        "wfc1": u(ks[6], (HIDDEN, FC1_OUT), 0.15),
        "bfc1": jnp.zeros((FC1_OUT,), jnp.float32),
        "wfc2": u(ks[7], (FC1_OUT, num_classes), 0.2),
        "bfc2": jnp.zeros((num_classes,), jnp.float32),
    }


def pack_params(params, num_features, num_classes):
    """Pack all parameters into (bf16 weight slab, f32 bias slab)."""
    assert num_classes <= NC_PAD
    lay, rw = weight_layout(num_features)
    W = jnp.zeros((rw, PW), jnp.float32)

    def put(W, name, mat):
        r0 = lay[name]
        return W.at[r0:r0 + mat.shape[0], 0:mat.shape[1]].set(mat)

    W = put(W, "w1", params["w1"].reshape(K * num_features, C1_OUT))
    W = put(W, "w2", params["w2"].reshape(K * C1_OUT, C2_OUT))
    W = put(W, "wih0", params["wih0"])
    W = put(W, "whh0", params["whh0"])
    W = put(W, "wcat1", jnp.concatenate([params["wih1"], params["whh1"]], axis=0))
    W = put(W, "wfc1", params["wfc1"])
    W = put(W, "wfc2", params["wfc2"])       # columns >= num_classes stay zero
    W = W.astype(jnp.bfloat16)               # bf16 MXU operands, half the DMA bytes

    Bm = jnp.zeros((8, PW), jnp.float32)     # biases stay f32
    Bm = Bm.at[0, 0:C1_OUT].set(params["b1"])
    Bm = Bm.at[1, 0:C2_OUT].set(params["b2"])
    Bm = Bm.at[2, 0:4 * HIDDEN].set(params["bl0"])
    Bm = Bm.at[3, 0:4 * HIDDEN].set(params["bl1"])
    Bm = Bm.at[4, 0:FC1_OUT].set(params["bfc1"])
    Bm = Bm.at[5, 0:num_classes].set(params["bfc2"])
    return W, Bm


def make_kernel(num_features, L):
    lay, _ = weight_layout(num_features)
    L1 = L - (K - 1)       # after conv1 (valid)
    L2 = L1 - (K - 1)      # after conv2 (valid)
    T = L2 // 2            # after MaxPool1d(kernel_size=2), floor
    KC1 = K * num_features
    KC2 = K * C1_OUT
    H = HIDDEN

    w1_o = lay["w1"]; w2_o = lay["w2"]
    wih0_o = lay["wih0"]; whh0_o = lay["whh0"]
    wcat_o = lay["wcat1"]; wfc1_o = lay["wfc1"]; wfc2_o = lay["wfc2"]

    def kernel(x_ref, w_ref, b_ref, out_ref):
        # ---------------- packed parameter slices (one VMEM block each) ------
        w1 = w_ref[w1_o:w1_o + KC1, 0:C1_OUT]          # (K*Cin, 32)  bf16
        w2 = w_ref[w2_o:w2_o + KC2, 0:C2_OUT]          # (96, 64)
        wih0 = w_ref[wih0_o:wih0_o + C2_OUT, :]        # (64, 512)
        whh0 = w_ref[whh0_o:whh0_o + H, :]             # (128, 512)
        wcat1 = w_ref[wcat_o:wcat_o + 2 * H, :]        # (256, 512)
        wfc1 = w_ref[wfc1_o:wfc1_o + H, 0:FC1_OUT]     # (128, 64)
        wfc2 = w_ref[wfc2_o:wfc2_o + FC1_OUT, 0:NC_PAD]  # (64, 128)

        b1 = b_ref[0:1, 0:C1_OUT]                      # (1, 32)  f32
        b2 = b_ref[1:2, 0:C2_OUT]                      # (1, 64)
        bl0 = b_ref[2:3, :]                            # (1, 512)
        bl1 = b_ref[3:4, :]                            # (1, 512)
        bfc1 = b_ref[4:5, 0:FC1_OUT]                   # (1, 64)
        bfc2 = b_ref[5:6, 0:NC_PAD]                    # (1, 128)

        x = x_ref[0].astype(jnp.float32)               # (L, Cin), one batch elem

        # ---------------- conv1 (valid, k=3) + ReLU : single im2col matmul ----
        p1 = jnp.concatenate([x[k:k + L1, :] for k in range(K)], axis=1)   # (L1, K*Cin)
        h1 = jnp.maximum(
            jnp.dot(p1.astype(jnp.bfloat16), w1,
                    preferred_element_type=jnp.float32) + b1, 0.0)         # (L1, 32)

        # ---------------- conv2 (valid, k=3) + ReLU : single im2col matmul ----
        p2 = jnp.concatenate([h1[k:k + L2, :] for k in range(K)], axis=1)  # (L2, 96)
        h2 = jnp.maximum(
            jnp.dot(p2.astype(jnp.bfloat16), w2,
                    preferred_element_type=jnp.float32) + b2, 0.0)         # (L2, 64)

        # ---------------- MaxPool1d(k=2) over time (floor) --------------------
        pooled = jnp.concatenate(
            [jnp.maximum(h2[2 * t:2 * t + 1, :], h2[2 * t + 1:2 * t + 2, :])
             for t in range(T)], axis=0)                                   # (T, 64)
        # dropout_cnn / dropout_lstm: identity in eval mode.

        # ---------------- LSTM layer-0 input projections, hoisted -------------
        # One (T, 64) @ (64, 512) matmul outside the serial recurrence.
        gx0 = jnp.dot(pooled.astype(jnp.bfloat16), wih0,
                      preferred_element_type=jnp.float32) + bl0            # (T, 512)

        def gates(g):
            i = jax.nn.sigmoid(g[:, 0:H])
            f = jax.nn.sigmoid(g[:, H:2 * H])
            gg = jnp.tanh(g[:, 2 * H:3 * H])
            o = jax.nn.sigmoid(g[:, 3 * H:4 * H])
            return i, f, gg, o

        h0 = jnp.zeros((1, H), jnp.float32)
        c0 = jnp.zeros((1, H), jnp.float32)
        h1s = jnp.zeros((1, H), jnp.float32)
        c1s = jnp.zeros((1, H), jnp.float32)

        # T is small and static -> unrolled.  (Switch to lax.fori_loop with a
        # carried (h,c) tuple if T grows beyond ~16.)
        for t in range(T):
            # layer 0: only the recurrent matmul is on the critical path
            g0 = gx0[t:t + 1, :] + jnp.dot(h0.astype(jnp.bfloat16), whh0,
                                           preferred_element_type=jnp.float32)
            i0, f0, gg0, o0 = gates(g0)
            c0 = f0 * c0 + i0 * gg0
            h0 = o0 * jnp.tanh(c0)

            # layer 1: single fused matmul over [x_t ; h_{t-1}] (K = 256)
            cat = jnp.concatenate([h0, h1s], axis=1).astype(jnp.bfloat16)  # (1, 256)
            g1 = jnp.dot(cat, wcat1, preferred_element_type=jnp.float32) + bl1
            i1, f1, gg1, o1 = gates(g1)
            c1s = f1 * c1s + i1 * gg1
            h1s = o1 * jnp.tanh(c1s)

        # ---------------- last timestep -> fc1 + ReLU -> fc2 (lane-dense) -----
        fh = jnp.maximum(
            jnp.dot(h1s.astype(jnp.bfloat16), wfc1,
                    preferred_element_type=jnp.float32) + bfc1, 0.0)       # (1, 64)
        out = jnp.dot(fh.astype(jnp.bfloat16), wfc2,
                      preferred_element_type=jnp.float32) + bfc2           # (1, 128)
        out_ref[...] = out[None].astype(out_ref.dtype)                     # (1,1,128)

    return kernel


def cnn_lstm_forward(x_ncl, w_packed, b_packed, num_classes):
    """x_ncl: (B, num_features, L) in PyTorch NCL layout."""
    B, Cin, L = x_ncl.shape
    x_nlc = jnp.transpose(x_ncl, (0, 2, 1)).astype(jnp.float32)   # NCL -> NLC
    kernel = make_kernel(Cin, L)
    RW = w_packed.shape[0]

    out_pad = pl.pallas_call(
        kernel,
        grid=(B,),   # batch elements are independent -> shard across TCs on v7x
        out_shape=jax.ShapeDtypeStruct((B, 1, NC_PAD), jnp.float32),
        in_specs=[
            pl.BlockSpec((1, L, Cin), lambda b: (b, 0, 0)),
            pl.BlockSpec((RW, PW), lambda b: (0, 0)),   # weights: one DMA, reused
            pl.BlockSpec((8, PW), lambda b: (0, 0)),    # biases:  one DMA, reused
        ],
        out_specs=pl.BlockSpec((1, 1, NC_PAD), lambda b: (b, 0, 0)),
        compiler_params=pltpu.CompilerParams(dimension_semantics=("parallel",)),
    )(x_nlc, w_packed, b_packed)

    return out_pad[:, 0, :num_classes]


if __name__ == "__main__":
    config = {
        "num_features": 4,
        "num_classes": 8,
        "cnn_dropout_rate": 0.0,
        "lstm_dropout_rate": 0.0,
    }
    B, C_IN, L = 2, config["num_features"], 16   # L=16 -> conv 14 -> 12 -> pool T=6

    key = jax.random.PRNGKey(0)
    k_x, k_p = jax.random.split(key)
    x = jax.random.normal(k_x, (B, C_IN, L), jnp.float32)     # PyTorch NCL input
    params = init_params(k_p, C_IN, config["num_classes"])
    w_packed, b_packed = pack_params(params, C_IN, config["num_classes"])

    out = cnn_lstm_forward(x, w_packed, b_packed, config["num_classes"])
    out = jax.block_until_ready(out)
    assert out.shape == (B, config["num_classes"])
    assert bool(jnp.all(jnp.isfinite(out)))
    print("KERNEL_OK")
</pallas_src>

<mosaic_0001>
module attributes {stable_mosaic.version = 11 : i64} {
  func.func @kernel(%arg0: i32, %arg1: memref<1x16x4xf32, #tpu.memory_space<vmem>>, %arg2: memref<752x512xbf16, #tpu.memory_space<vmem>>, %arg3: memref<8x512xf32, #tpu.memory_space<vmem>>, %arg4: memref<1x1x128xf32, #tpu.memory_space<vmem>>) attributes {dimension_semantics = [#tpu.dimension_semantics<parallel>], iteration_bounds = array<i64: 2>, scalar_prefetch = 0 : i64, scratch_operands = 0 : i64, tpu.core_type = #tpu.core_type<tc>, window_params = [{transform_indices = @transform_0, window_bounds = array<i64: 1, 16, 4>}, {pipeline_mode = #tpu.pipeline_mode<synchronous>, transform_indices = @transform_1, window_bounds = array<i64: 752, 512>}, {pipeline_mode = #tpu.pipeline_mode<synchronous>, transform_indices = @transform_2, window_bounds = array<i64: 8, 512>}, {transform_indices = @transform_3, window_bounds = array<i64: 1, 1, 128>}]} {
    %c0 = arith.constant 0 : index
    %c0_0 = arith.constant 0 : index
    %0 = vector.load %arg2[%c0, %c0_0] : memref<752x512xbf16, #tpu.memory_space<vmem>>, vector<12x32xbf16>
    %c16 = arith.constant 16 : index
    %c0_1 = arith.constant 0 : index
    %1 = vector.load %arg2[%c16, %c0_1] : memref<752x512xbf16, #tpu.memory_space<vmem>>, vector<96x64xbf16>
    %c112 = arith.constant 112 : index
    %c0_2 = arith.constant 0 : index
    %2 = vector.load %arg2[%c112, %c0_2] : memref<752x512xbf16, #tpu.memory_space<vmem>>, vector<64x512xbf16>
    %c176 = arith.constant 176 : index
    %c0_3 = arith.constant 0 : index
    %3 = vector.load %arg2[%c176, %c0_3] : memref<752x512xbf16, #tpu.memory_space<vmem>>, vector<128x512xbf16>
    %c304 = arith.constant 304 : index
    %c0_4 = arith.constant 0 : index
    %4 = vector.load %arg2[%c304, %c0_4] : memref<752x512xbf16, #tpu.memory_space<vmem>>, vector<256x512xbf16>
    %c560 = arith.constant 560 : index
    %c0_5 = arith.constant 0 : index
    %5 = vector.load %arg2[%c560, %c0_5] : memref<752x512xbf16, #tpu.memory_space<vmem>>, vector<128x64xbf16>
    %c688 = arith.constant 688 : index
    %c0_6 = arith.constant 0 : index
    %6 = vector.load %arg2[%c688, %c0_6] : memref<752x512xbf16, #tpu.memory_space<vmem>>, vector<64x128xbf16>
    %c0_7 = arith.constant 0 : index
    %c0_8 = arith.constant 0 : index
    %7 = vector.load %arg3[%c0_7, %c0_8] : memref<8x512xf32, #tpu.memory_space<vmem>>, vector<1x32xf32>
    %c1 = arith.constant 1 : index
    %c0_9 = arith.constant 0 : index
    %8 = vector.load %arg3[%c1, %c0_9] : memref<8x512xf32, #tpu.memory_space<vmem>>, vector<1x64xf32>
    %c2 = arith.constant 2 : index
    %c0_10 = arith.constant 0 : index
    %9 = vector.load %arg3[%c2, %c0_10] : memref<8x512xf32, #tpu.memory_space<vmem>>, vector<1x512xf32>
    %c3 = arith.constant 3 : index
    %c0_11 = arith.constant 0 : index
    %10 = vector.load %arg3[%c3, %c0_11] : memref<8x512xf32, #tpu.memory_space<vmem>>, vector<1x512xf32>
    %c4 = arith.constant 4 : index
    %c0_12 = arith.constant 0 : index
    %11 = vector.load %arg3[%c4, %c0_12] : memref<8x512xf32, #tpu.memory_space<vmem>>, vector<1x64xf32>
    %c5 = arith.constant 5 : index
    %c0_13 = arith.constant 0 : index
    %12 = vector.load %arg3[%c5, %c0_13] : memref<8x512xf32, #tpu.memory_space<vmem>>, vector<1x128xf32>
    %c0_14 = arith.constant 0 : index
    %c0_15 = arith.constant 0 : index
    %c0_16 = arith.constant 0 : index
    %13 = vector.load %arg1[%c0_14, %c0_15, %c0_16] : memref<1x16x4xf32, #tpu.memory_space<vmem>>, vector<1x16x4xf32>
    %14 = vector.shape_cast %13 : vector<1x16x4xf32> to vector<16x4xf32>
    %15 = vector.extract_strided_slice %14 {offsets = [0, 0], sizes = [14, 4], strides = [1, 1]} : vector<16x4xf32> to vector<14x4xf32>
    %16 = vector.extract_strided_slice %14 {offsets = [1, 0], sizes = [14, 4], strides = [1, 1]} : vector<16x4xf32> to vector<14x4xf32>
    %17 = vector.extract_strided_slice %14 {offsets = [2, 0], sizes = [14, 4], strides = [1, 1]} : vector<16x4xf32> to vector<14x4xf32>
    %18 = tpu.concatenate %15, %16, %17 in 1 : vector<14x4xf32>, vector<14x4xf32>, vector<14x4xf32> -> vector<14x12xf32>
    %19 = arith.truncf %18 : vector<14x12xf32> to vector<14x12xbf16>
    %cst = arith.constant dense<0.000000e+00> : vector<14x32xf32>
    %20 = tpu.matmul %19, %0, %cst {dimension_numbers = #tpu.dot_dimension_numbers<[1], [0], [0], [1], [0, 0, 1, 1], [], []>} : vector<14x12xbf16>, vector<12x32xbf16>, vector<14x32xf32> -> vector<14x32xf32>
    %21 = vector.broadcast %7 : vector<1x32xf32> to vector<14x32xf32>
    %22 = arith.addf %20, %21 : vector<14x32xf32>
    %cst_17 = arith.constant 0.000000e+00 : f32
    %23 = vector.broadcast %cst_17 : f32 to vector<14x32xf32>
    %24 = arith.maximumf %22, %23 : vector<14x32xf32>
    %25 = vector.extract_strided_slice %24 {offsets = [0, 0], sizes = [12, 32], strides = [1, 1]} : vector<14x32xf32> to vector<12x32xf32>
    %26 = vector.extract_strided_slice %24 {offsets = [1, 0], sizes = [12, 32], strides = [1, 1]} : vector<14x32xf32> to vector<12x32xf32>
    %27 = vector.extract_strided_slice %24 {offsets = [2, 0], sizes = [12, 32], strides = [1, 1]} : vector<14x32xf32> to vector<12x32xf32>
    %28 = tpu.concatenate %25, %26, %27 in 1 : vector<12x32xf32>, vector<12x32xf32>, vector<12x32xf32> -> vector<12x96xf32>
    %29 = arith.truncf %28 : vector<12x96xf32> to vector<12x96xbf16>
    %cst_18 = arith.constant dense<0.000000e+00> : vector<12x64xf32>
    %30 = tpu.matmul %29, %1, %cst_18 {dimension_numbers = #tpu.dot_dimension_numbers<[1], [0], [0], [1], [0, 0, 1, 1], [], []>} : vector<12x96xbf16>, vector<96x64xbf16>, vector<12x64xf32> -> vector<12x64xf32>
    %31 = vector.broadcast %8 : vector<1x64xf32> to vector<12x64xf32>
    %32 = arith.addf %30, %31 : vector<12x64xf32>
    %cst_19 = arith.constant 0.000000e+00 : f32
    %33 = vector.broadcast %cst_19 : f32 to vector<12x64xf32>
    %34 = arith.maximumf %32, %33 : vector<12x64xf32>
    %35 = vector.extract_strided_slice %34 {offsets = [0, 0], sizes = [1, 64], strides = [1, 1]} : vector<12x64xf32> to vector<1x64xf32>
    %36 = vector.extract_strided_slice %34 {offsets = [1, 0], sizes = [1, 64], strides = [1, 1]} : vector<12x64xf32> to vector<1x64xf32>
    %37 = arith.maximumf %35, %36 : vector<1x64xf32>
    %38 = vector.extract_strided_slice %34 {offsets = [2, 0], sizes = [1, 64], strides = [1, 1]} : vector<12x64xf32> to vector<1x64xf32>
    %39 = vector.extract_strided_slice %34 {offsets = [3, 0], sizes = [1, 64], strides = [1, 1]} : vector<12x64xf32> to vector<1x64xf32>
    %40 = arith.maximumf %38, %39 : vector<1x64xf32>
    %41 = vector.extract_strided_slice %34 {offsets = [4, 0], sizes = [1, 64], strides = [1, 1]} : vector<12x64xf32> to vector<1x64xf32>
    %42 = vector.extract_strided_slice %34 {offsets = [5, 0], sizes = [1, 64], strides = [1, 1]} : vector<12x64xf32> to vector<1x64xf32>
    %43 = arith.maximumf %41, %42 : vector<1x64xf32>
    %44 = vector.extract_strided_slice %34 {offsets = [6, 0], sizes = [1, 64], strides = [1, 1]} : vector<12x64xf32> to vector<1x64xf32>
    %45 = vector.extract_strided_slice %34 {offsets = [7, 0], sizes = [1, 64], strides = [1, 1]} : vector<12x64xf32> to vector<1x64xf32>
    %46 = arith.maximumf %44, %45 : vector<1x64xf32>
    %47 = vector.extract_strided_slice %34 {offsets = [8, 0], sizes = [1, 64], strides = [1, 1]} : vector<12x64xf32> to vector<1x64xf32>
    %48 = vector.extract_strided_slice %34 {offsets = [9, 0], sizes = [1, 64], strides = [1, 1]} : vector<12x64xf32> to vector<1x64xf32>
    %49 = arith.maximumf %47, %48 : vector<1x64xf32>
    %50 = vector.extract_strided_slice %34 {offsets = [10, 0], sizes = [1, 64], strides = [1, 1]} : vector<12x64xf32> to vector<1x64xf32>
    %51 = vector.extract_strided_slice %34 {offsets = [11, 0], sizes = [1, 64], strides = [1, 1]} : vector<12x64xf32> to vector<1x64xf32>
    %52 = arith.maximumf %50, %51 : vector<1x64xf32>
    %53 = tpu.concatenate %37, %40, %43, %46, %49, %52 in 0 : vector<1x64xf32>, vector<1x64xf32>, vector<1x64xf32>, vector<1x64xf32>, vector<1x64xf32>, vector<1x64xf32> -> vector<6x64xf32>
    %54 = arith.truncf %53 : vector<6x64xf32> to vector<6x64xbf16>
    %cst_20 = arith.constant dense<0.000000e+00> : vector<6x512xf32>
    %55 = tpu.matmul %54, %2, %cst_20 {dimension_numbers = #tpu.dot_dimension_numbers<[1], [0], [0], [1], [0, 0, 1, 1], [], []>} : vector<6x64xbf16>, vector<64x512xbf16>, vector<6x512xf32> -> vector<6x512xf32>
    %56 = vector.broadcast %9 : vector<1x512xf32> to vector<6x512xf32>
    %57 = arith.addf %55, %56 : vector<6x512xf32>
    %cst_21 = arith.constant 0.000000e+00 : f32
    %58 = vector.broadcast %cst_21 : f32 to vector<1x128xf32>
    %cst_22 = arith.constant 0.000000e+00 : f32
    %59 = vector.broadcast %cst_22 : f32 to vector<1x128xf32>
    %cst_23 = arith.constant 0.000000e+00 : f32
    %60 = vector.broadcast %cst_23 : f32 to vector<1x128xf32>
    %cst_24 = arith.constant 0.000000e+00 : f32
    %61 = vector.broadcast %cst_24 : f32 to vector<1x128xf32>
    %62 = vector.extract_strided_slice %57 {offsets = [0, 0], sizes = [1, 512], strides = [1, 1]} : vector<6x512xf32> to vector<1x512xf32>
    %63 = arith.truncf %58 : vector<1x128xf32> to vector<1x128xbf16>
    %cst_25 = arith.constant dense<0.000000e+00> : vector<1x512xf32>
    %64 = tpu.matmul %63, %3, %cst_25 {dimension_numbers = #tpu.dot_dimension_numbers<[1], [0], [0], [1], [0, 0, 1, 1], [], []>} : vector<1x128xbf16>, vector<128x512xbf16>, vector<1x512xf32> -> vector<1x512xf32>
    %65 = arith.addf %62, %64 : vector<1x512xf32>
    %66 = vector.extract_strided_slice %65 {offsets = [0, 0], sizes = [1, 128], strides = [1, 1]} : vector<1x512xf32> to vector<1x128xf32>
    %67 = arith.negf %66 : vector<1x128xf32>
    %68 = math.exp %67 : vector<1x128xf32>
    %cst_26 = arith.constant 1.000000e+00 : f32
    %69 = vector.broadcast %cst_26 : f32 to vector<1x128xf32>
    %70 = arith.addf %69, %68 : vector<1x128xf32>
    %71 = arith.divf %69, %70 : vector<1x128xf32>
    %72 = vector.extract_strided_slice %65 {offsets = [0, 128], sizes = [1, 128], strides = [1, 1]} : vector<1x512xf32> to vector<1x128xf32>
    %73 = arith.negf %72 : vector<1x128xf32>
    %74 = math.exp %73 : vector<1x128xf32>
    %cst_27 = arith.constant 1.000000e+00 : f32
    %75 = vector.broadcast %cst_27 : f32 to vector<1x128xf32>
    %76 = arith.addf %75, %74 : vector<1x128xf32>
    %77 = arith.divf %75, %76 : vector<1x128xf32>
    %78 = vector.extract_strided_slice %65 {offsets = [0, 256], sizes = [1, 128], strides = [1, 1]} : vector<1x512xf32> to vector<1x128xf32>
    %79 = math.tanh %78 : vector<1x128xf32>
    %80 = vector.extract_strided_slice %65 {offsets = [0, 384], sizes = [1, 128], strides = [1, 1]} : vector<1x512xf32> to vector<1x128xf32>
    %81 = arith.negf %80 : vector<1x128xf32>
    %82 = math.exp %81 : vector<1x128xf32>
    %cst_28 = arith.constant 1.000000e+00 : f32
    %83 = vector.broadcast %cst_28 : f32 to vector<1x128xf32>
    %84 = arith.addf %83, %82 : vector<1x128xf32>
    %85 = arith.divf %83, %84 : vector<1x128xf32>
    %86 = arith.mulf %77, %59 : vector<1x128xf32>
    %87 = arith.mulf %71, %79 : vector<1x128xf32>
    %88 = arith.addf %86, %87 : vector<1x128xf32>
    %89 = math.tanh %88 : vector<1x128xf32>
    %90 = arith.mulf %85, %89 : vector<1x128xf32>
    %91 = tpu.concatenate %90, %60 in 1 : vector<1x128xf32>, vector<1x128xf32> -> vector<1x256xf32>
    %92 = arith.truncf %91 : vector<1x256xf32> to vector<1x256xbf16>
    %cst_29 = arith.constant dense<0.000000e+00> : vector<1x512xf32>
    %93 = tpu.matmul %92, %4, %cst_29 {dimension_numbers = #tpu.dot_dimension_numbers<[1], [0], [0], [1], [0, 0, 1, 1], [], []>} : vector<1x256xbf16>, vector<256x512xbf16>, vector<1x512xf32> -> vector<1x512xf32>
    %94 = arith.addf %93, %10 : vector<1x512xf32>
    %95 = vector.extract_strided_slice %94 {offsets = [0, 0], sizes = [1, 128], strides = [1, 1]} : vector<1x512xf32> to vector<1x128xf32>
    %96 = arith.negf %95 : vector<1x128xf32>
    %97 = math.exp %96 : vector<1x128xf32>
    %cst_30 = arith.constant 1.000000e+00 : f32
    %98 = vector.broadcast %cst_30 : f32 to vector<1x128xf32>
    %99 = arith.addf %98, %97 : vector<1x128xf32>
    %100 = arith.divf %98, %99 : vector<1x128xf32>
    %101 = vector.extract_strided_slice %94 {offsets = [0, 128], sizes = [1, 128], strides = [1, 1]} : vector<1x512xf32> to vector<1x128xf32>
    %102 = arith.negf %101 : vector<1x128xf32>
    %103 = math.exp %102 : vector<1x128xf32>
    %cst_31 = arith.constant 1.000000e+00 : f32
    %104 = vector.broadcast %cst_31 : f32 to vector<1x128xf32>
    %105 = arith.addf %104, %103 : vector<1x128xf32>
    %106 = arith.divf %104, %105 : vector<1x128xf32>
    %107 = vector.extract_strided_slice %94 {offsets = [0, 256], sizes = [1, 128], strides = [1, 1]} : vector<1x512xf32> to vector<1x128xf32>
    %108 = math.tanh %107 : vector<1x128xf32>
    %109 = vector.extract_strided_slice %94 {offsets = [0, 384], sizes = [1, 128], strides = [1, 1]} : vector<1x512xf32> to vector<1x128xf32>
    %110 = arith.negf %109 : vector<1x128xf32>
    %111 = math.exp %110 : vector<1x128xf32>
    %cst_32 = arith.constant 1.000000e+00 : f32
    %112 = vector.broadcast %cst_32 : f32 to vector<1x128xf32>
    %113 = arith.addf %112, %111 : vector<1x128xf32>
    %114 = arith.divf %112, %113 : vector<1x128xf32>
    %115 = arith.mulf %106, %61 : vector<1x128xf32>
    %116 = arith.mulf %100, %108 : vector<1x128xf32>
    %117 = arith.addf %115, %116 : vector<1x128xf32>
    %118 = math.tanh %117 : vector<1x128xf32>
    %119 = arith.mulf %114, %118 : vector<1x128xf32>
    %120 = vector.extract_strided_slice %57 {offsets = [1, 0], sizes = [1, 512], strides = [1, 1]} : vector<6x512xf32> to vector<1x512xf32>
    %121 = arith.truncf %90 : vector<1x128xf32> to vector<1x128xbf16>
    %cst_33 = arith.constant dense<0.000000e+00> : vector<1x512xf32>
    %122 = tpu.matmul %121, %3, %cst_33 {dimension_numbers = #tpu.dot_dimension_numbers<[1], [0], [0], [1], [0, 0, 1, 1], [], []>} : vector<1x128xbf16>, vector<128x512xbf16>, vector<1x512xf32> -> vector<1x512xf32>
    %123 = arith.addf %120, %122 : vector<1x512xf32>
    %124 = vector.extract_strided_slice %123 {offsets = [0, 0], sizes = [1, 128], strides = [1, 1]} : vector<1x512xf32> to vector<1x128xf32>
    %125 = arith.negf %124 : vector<1x128xf32>
    %126 = math.exp %125 : vector<1x128xf32>
    %cst_34 = arith.constant 1.000000e+00 : f32
    %127 = vector.broadcast %cst_34 : f32 to vector<1x128xf32>
    %128 = arith.addf %127, %126 : vector<1x128xf32>
    %129 = arith.divf %127, %128 : vector<1x128xf32>
    %130 = vector.extract_strided_slice %123 {offsets = [0, 128], sizes = [1, 128], strides = [1, 1]} : vector<1x512xf32> to vector<1x128xf32>
    %131 = arith.negf %130 : vector<1x128xf32>
    %132 = math.exp %131 : vector<1x128xf32>
    %cst_35 = arith.constant 1.000000e+00 : f32
    %133 = vector.broadcast %cst_35 : f32 to vector<1x128xf32>
    %134 = arith.addf %133, %132 : vector<1x128xf32>
    %135 = arith.divf %133, %134 : vector<1x128xf32>
    %136 = vector.extract_strided_slice %123 {offsets = [0, 256], sizes = [1, 128], strides = [1, 1]} : vector<1x512xf32> to vector<1x128xf32>
    %137 = math.tanh %136 : vector<1x128xf32>
    %138 = vector.extract_strided_slice %123 {offsets = [0, 384], sizes = [1, 128], strides = [1, 1]} : vector<1x512xf32> to vector<1x128xf32>
    %139 = arith.negf %138 : vector<1x128xf32>
    %140 = math.exp %139 : vector<1x128xf32>
    %cst_36 = arith.constant 1.000000e+00 : f32
    %141 = vector.broadcast %cst_36 : f32 to vector<1x128xf32>
    %142 = arith.addf %141, %140 : vector<1x128xf32>
    %143 = arith.divf %141, %142 : vector<1x128xf32>
    %144 = arith.mulf %135, %88 : vector<1x128xf32>
    %145 = arith.mulf %129, %137 : vector<1x128xf32>
    %146 = arith.addf %144, %145 : vector<1x128xf32>
    %147 = math.tanh %146 : vector<1x128xf32>
    %148 = arith.mulf %143, %147 : vector<1x128xf32>
    %149 = tpu.concatenate %148, %119 in 1 : vector<1x128xf32>, vector<1x128xf32> -> vector<1x256xf32>
    %150 = arith.truncf %149 : vector<1x256xf32> to vector<1x256xbf16>
    %cst_37 = arith.constant dense<0.000000e+00> : vector<1x512xf32>
    %151 = tpu.matmul %150, %4, %cst_37 {dimension_numbers = #tpu.dot_dimension_numbers<[1], [0], [0], [1], [0, 0, 1, 1], [], []>} : vector<1x256xbf16>, vector<256x512xbf16>, vector<1x512xf32> -> vector<1x512xf32>
    %152 = arith.addf %151, %10 : vector<1x512xf32>
    %153 = vector.extract_strided_slice %152 {offsets = [0, 0], sizes = [1, 128], strides = [1, 1]} : vector<1x512xf32> to vector<1x128xf32>
    %154 = arith.negf %153 : vector<1x128xf32>
    %155 = math.exp %154 : vector<1x128xf32>
    %cst_38 = arith.constant 1.000000e+00 : f32
    %156 = vector.broadcast %cst_38 : f32 to vector<1x128xf32>
    %157 = arith.addf %156, %155 : vector<1x128xf32>
    %158 = arith.divf %156, %157 : vector<1x128xf32>
    %159 = vector.extract_strided_slice %152 {offsets = [0, 128], sizes = [1, 128], strides = [1, 1]} : vector<1x512xf32> to vector<1x128xf32>
    %160 = arith.negf %159 : vector<1x128xf32>
    %161 = math.exp %160 : vector<1x128xf32>
    %cst_39 = arith.constant 1.000000e+00 : f32
    %162 = vector.broadcast %cst_39 : f32 to vector<1x128xf32>
    %163 = arith.addf %162, %161 : vector<1x128xf32>
    %164 = arith.divf %162, %163 : vector<1x128xf32>
    %165 = vector.extract_strided_slice %152 {offsets = [0, 256], sizes = [1, 128], strides = [1, 1]} : vector<1x512xf32> to vector<1x128xf32>
    %166 = math.tanh %165 : vector<1x128xf32>
    %167 = vector.extract_strided_slice %152 {offsets = [0, 384], sizes = [1, 128], strides = [1, 1]} : vector<1x512xf32> to vector<1x128xf32>
    %168 = arith.negf %167 : vector<1x128xf32>
    %169 = math.exp %168 : vector<1x128xf32>
    %cst_40 = arith.constant 1.000000e+00 : f32
    %170 = vector.broadcast %cst_40 : f32 to vector<1x128xf32>
    %171 = arith.addf %170, %169 : vector<1x128xf32>
    %172 = arith.divf %170, %171 : vector<1x128xf32>
    %173 = arith.mulf %164, %117 : vector<1x128xf32>
    %174 = arith.mulf %158, %166 : vector<1x128xf32>
    %175 = arith.addf %173, %174 : vector<1x128xf32>
    %176 = math.tanh %175 : vector<1x128xf32>
    %177 = arith.mulf %172, %176 : vector<1x128xf32>
    %178 = vector.extract_strided_slice %57 {offsets = [2, 0], sizes = [1, 512], strides = [1, 1]} : vector<6x512xf32> to vector<1x512xf32>
    %179 = arith.truncf %148 : vector<1x128xf32> to vector<1x128xbf16>
    %cst_41 = arith.constant dense<0.000000e+00> : vector<1x512xf32>
    %180 = tpu.matmul %179, %3, %cst_41 {dimension_numbers = #tpu.dot_dimension_numbers<[1], [0], [0], [1], [0, 0, 1, 1], [], []>} : vector<1x128xbf16>, vector<128x512xbf16>, vector<1x512xf32> -> vector<1x512xf32>
    %181 = arith.addf %178, %180 : vector<1x512xf32>
    %182 = vector.extract_strided_slice %181 {offsets = [0, 0], sizes = [1, 128], strides = [1, 1]} : vector<1x512xf32> to vector<1x128xf32>
    %183 = arith.negf %182 : vector<1x128xf32>
    %184 = math.exp %183 : vector<1x128xf32>
    %cst_42 = arith.constant 1.000000e+00 : f32
    %185 = vector.broadcast %cst_42 : f32 to vector<1x128xf32>
    %186 = arith.addf %185, %184 : vector<1x128xf32>
    %187 = arith.divf %185, %186 : vector<1x128xf32>
    %188 = vector.extract_strided_slice %181 {offsets = [0, 128], sizes = [1, 128], strides = [1, 1]} : vector<1x512xf32> to vector<1x128xf32>
    %189 = arith.negf %188 : vector<1x128xf32>
    %190 = math.exp %189 : vector<1x128xf32>
    %cst_43 = arith.constant 1.000000e+00 : f32
    %191 = vector.broadcast %cst_43 : f32 to vector<1x128xf32>
    %192 = arith.addf %191, %190 : vector<1x128xf32>
    %193 = arith.divf %191, %192 : vector<1x128xf32>
    %194 = vector.extract_strided_slice %181 {offsets = [0, 256], sizes = [1, 128], strides = [1, 1]} : vector<1x512xf32> to vector<1x128xf32>
    %195 = math.tanh %194 : vector<1x128xf32>
    %196 = vector.extract_strided_slice %181 {offsets = [0, 384], sizes = [1, 128], strides = [1, 1]} : vector<1x512xf32> to vector<1x128xf32>
    %197 = arith.negf %196 : vector<1x128xf32>
    %198 = math.exp %197 : vector<1x128xf32>
    %cst_44 = arith.constant 1.000000e+00 : f32
    %199 = vector.broadcast %cst_44 : f32 to vector<1x128xf32>
    %200 = arith.addf %199, %198 : vector<1x128xf32>
    %201 = arith.divf %199, %200 : vector<1x128xf32>
    %202 = arith.mulf %193, %146 : vector<1x128xf32>
    %203 = arith.mulf %187, %195 : vector<1x128xf32>
    %204 = arith.addf %202, %203 : vector<1x128xf32>
    %205 = math.tanh %204 : vector<1x128xf32>
    %206 = arith.mulf %201, %205 : vector<1x128xf32>
    %207 = tpu.concatenate %206, %177 in 1 : vector<1x128xf32>, vector<1x128xf32> -> vector<1x256xf32>
    %208 = arith.truncf %207 : vector<1x256xf32> to vector<1x256xbf16>
    %cst_45 = arith.constant dense<0.000000e+00> : vector<1x512xf32>
    %209 = tpu.matmul %208, %4, %cst_45 {dimension_numbers = #tpu.dot_dimension_numbers<[1], [0], [0], [1], [0, 0, 1, 1], [], []>} : vector<1x256xbf16>, vector<256x512xbf16>, vector<1x512xf32> -> vector<1x512xf32>
    %210 = arith.addf %209, %10 : vector<1x512xf32>
    %211 = vector.extract_strided_slice %210 {offsets = [0, 0], sizes = [1, 128], strides = [1, 1]} : vector<1x512xf32> to vector<1x128xf32>
    %212 = arith.negf %211 : vector<1x128xf32>
    %213 = math.exp %212 : vector<1x128xf32>
    %cst_46 = arith.constant 1.000000e+00 : f32
    %214 = vector.broadcast %cst_46 : f32 to vector<1x128xf32>
    %215 = arith.addf %214, %213 : vector<1x128xf32>
    %216 = arith.divf %214, %215 : vector<1x128xf32>
    %217 = vector.extract_strided_slice %210 {offsets = [0, 128], sizes = [1, 128], strides = [1, 1]} : vector<1x512xf32> to vector<1x128xf32>
    %218 = arith.negf %217 : vector<1x128xf32>
    %219 = math.exp %218 : vector<1x128xf32>
    %cst_47 = arith.constant 1.000000e+00 : f32
    %220 = vector.broadcast %cst_47 : f32 to vector<1x128xf32>
    %221 = arith.addf %220, %219 : vector<1x128xf32>
    %222 = arith.divf %220, %221 : vector<1x128xf32>
    %223 = vector.extract_strided_slice %210 {offsets = [0, 256], sizes = [1, 128], strides = [1, 1]} : vector<1x512xf32> to vector<1x128xf32>
    %224 = math.tanh %223 : vector<1x128xf32>
    %225 = vector.extract_strided_slice %210 {offsets = [0, 384], sizes = [1, 128], strides = [1, 1]} : vector<1x512xf32> to vector<1x128xf32>
    %226 = arith.negf %225 : vector<1x128xf32>
    %227 = math.exp %226 : vector<1x128xf32>
    %cst_48 = arith.constant 1.000000e+00 : f32
    %228 = vector.broadcast %cst_48 : f32 to vector<1x128xf32>
    %229 = arith.addf %228, %227 : vector<1x128xf32>
    %230 = arith.divf %228, %229 : vector<1x128xf32>
    %231 = arith.mulf %222, %175 : vector<1x128xf32>
    %232 = arith.mulf %216, %224 : vector<1x128xf32>
    %233 = arith.addf %231, %232 : vector<1x128xf32>
    %234 = math.tanh %233 : vector<1x128xf32>
    %235 = arith.mulf %230, %234 : vector<1x128xf32>
    %236 = vector.extract_strided_slice %57 {offsets = [3, 0], sizes = [1, 512], strides = [1, 1]} : vector<6x512xf32> to vector<1x512xf32>
    %237 = arith.truncf %206 : vector<1x128xf32> to vector<1x128xbf16>
    %cst_49 = arith.constant dense<0.000000e+00> : vector<1x512xf32>
    %238 = tpu.matmul %237, %3, %cst_49 {dimension_numbers = #tpu.dot_dimension_numbers<[1], [0], [0], [1], [0, 0, 1, 1], [], []>} : vector<1x128xbf16>, vector<128x512xbf16>, vector<1x512xf32> -> vector<1x512xf32>
    %239 = arith.addf %236, %238 : vector<1x512xf32>
    %240 = vector.extract_strided_slice %239 {offsets = [0, 0], sizes = [1, 128], strides = [1, 1]} : vector<1x512xf32> to vector<1x128xf32>
    %241 = arith.negf %240 : vector<1x128xf32>
    %242 = math.exp %241 : vector<1x128xf32>
    %cst_50 = arith.constant 1.000000e+00 : f32
    %243 = vector.broadcast %cst_50 : f32 to vector<1x128xf32>
    %244 = arith.addf %243, %242 : vector<1x128xf32>
    %245 = arith.divf %243, %244 : vector<1x128xf32>
    %246 = vector.extract_strided_slice %239 {offsets = [0, 128], sizes = [1, 128], strides = [1, 1]} : vector<1x512xf32> to vector<1x128xf32>
    %247 = arith.negf %246 : vector<1x128xf32>
    %248 = math.exp %247 : vector<1x128xf32>
    %cst_51 = arith.constant 1.000000e+00 : f32
    %249 = vector.broadcast %cst_51 : f32 to vector<1x128xf32>
    %250 = arith.addf %249, %248 : vector<1x128xf32>
    %251 = arith.divf %249, %250 : vector<1x128xf32>
    %252 = vector.extract_strided_slice %239 {offsets = [0, 256], sizes = [1, 128], strides = [1, 1]} : vector<1x512xf32> to vector<1x128xf32>
    %253 = math.tanh %252 : vector<1x128xf32>
    %254 = vector.extract_strided_slice %239 {offsets = [0, 384], sizes = [1, 128], strides = [1, 1]} : vector<1x512xf32> to vector<1x128xf32>
    %255 = arith.negf %254 : vector<1x128xf32>
    %256 = math.exp %255 : vector<1x128xf32>
    %cst_52 = arith.constant 1.000000e+00 : f32
    %257 = vector.broadcast %cst_52 : f32 to vector<1x128xf32>
    %258 = arith.addf %257, %256 : vector<1x128xf32>
    %259 = arith.divf %257, %258 : vector<1x128xf32>
    %260 = arith.mulf %251, %204 : vector<1x128xf32>
    %261 = arith.mulf %245, %253 : vector<1x128xf32>
    %262 = arith.addf %260, %261 : vector<1x128xf32>
    %263 = math.tanh %262 : vector<1x128xf32>
    %264 = arith.mulf %259, %263 : vector<1x128xf32>
    %265 = tpu.concatenate %264, %235 in 1 : vector<1x128xf32>, vector<1x128xf32> -> vector<1x256xf32>
    %266 = arith.truncf %265 : vector<1x256xf32> to vector<1x256xbf16>
    %cst_53 = arith.constant dense<0.000000e+00> : vector<1x512xf32>
    %267 = tpu.matmul %266, %4, %cst_53 {dimension_numbers = #tpu.dot_dimension_numbers<[1], [0], [0], [1], [0, 0, 1, 1], [], []>} : vector<1x256xbf16>, vector<256x512xbf16>, vector<1x512xf32> -> vector<1x512xf32>
    %268 = arith.addf %267, %10 : vector<1x512xf32>
    %269 = vector.extract_strided_slice %268 {offsets = [0, 0], sizes = [1, 128], strides = [1, 1]} : vector<1x512xf32> to vector<1x128xf32>
    %270 = arith.negf %269 : vector<1x128xf32>
    %271 = math.exp %270 : vector<1x128xf32>
    %cst_54 = arith.constant 1.000000e+00 : f32
    %272 = vector.broadcast %cst_54 : f32 to vector<1x128xf32>
    %273 = arith.addf %272, %271 : vector<1x128xf32>
    %274 = arith.divf %272, %273 : vector<1x128xf32>
    %275 = vector.extract_strided_slice %268 {offsets = [0, 128], sizes = [1, 128], strides = [1, 1]} : vector<1x512xf32> to vector<1x128xf32>
    %276 = arith.negf %275 : vector<1x128xf32>
    %277 = math.exp %276 : vector<1x128xf32>
    %cst_55 = arith.constant 1.000000e+00 : f32
    %278 = vector.broadcast %cst_55 : f32 to vector<1x128xf32>
    %279 = arith.addf %278, %277 : vector<1x128xf32>
    %280 = arith.divf %278, %279 : vector<1x128xf32>
    %281 = vector.extract_strided_slice %268 {offsets = [0, 256], sizes = [1, 128], strides = [1, 1]} : vector<1x512xf32> to vector<1x128xf32>
    %282 = math.tanh %281 : vector<1x128xf32>
    %283 = vector.extract_strided_slice %268 {offsets = [0, 384], sizes = [1, 128], strides = [1, 1]} : vector<1x512xf32> to vector<1x128xf32>
    %284 = arith.negf %283 : vector<1x128xf32>
    %285 = math.exp %284 : vector<1x128xf32>
    %cst_56 = arith.constant 1.000000e+00 : f32
    %286 = vector.broadcast %cst_56 : f32 to vector<1x128xf32>
    %287 = arith.addf %286, %285 : vector<1x128xf32>
    %288 = arith.divf %286, %287 : vector<1x128xf32>
    %289 = arith.mulf %280, %233 : vector<1x128xf32>
    %290 = arith.mulf %274, %282 : vector<1x128xf32>
    %291 = arith.addf %289, %290 : vector<1x128xf32>
    %292 = math.tanh %291 : vector<1x128xf32>
    %293 = arith.mulf %288, %292 : vector<1x128xf32>
    %294 = vector.extract_strided_slice %57 {offsets = [4, 0], sizes = [1, 512], strides = [1, 1]} : vector<6x512xf32> to vector<1x512xf32>
    %295 = arith.truncf %264 : vector<1x128xf32> to vector<1x128xbf16>
    %cst_57 = arith.constant dense<0.000000e+00> : vector<1x512xf32>
    %296 = tpu.matmul %295, %3, %cst_57 {dimension_numbers = #tpu.dot_dimension_numbers<[1], [0], [0], [1], [0, 0, 1, 1], [], []>} : vector<1x128xbf16>, vector<128x512xbf16>, vector<1x512xf32> -> vector<1x512xf32>
    %297 = arith.addf %294, %296 : vector<1x512xf32>
    %298 = vector.extract_strided_slice %297 {offsets = [0, 0], sizes = [1, 128], strides = [1, 1]} : vector<1x512xf32> to vector<1x128xf32>
    %299 = arith.negf %298 : vector<1x128xf32>
    %300 = math.exp %299 : vector<1x128xf32>
    %cst_58 = arith.constant 1.000000e+00 : f32
    %301 = vector.broadcast %cst_58 : f32 to vector<1x128xf32>
    %302 = arith.addf %301, %300 : vector<1x128xf32>
    %303 = arith.divf %301, %302 : vector<1x128xf32>
    %304 = vector.extract_strided_slice %297 {offsets = [0, 128], sizes = [1, 128], strides = [1, 1]} : vector<1x512xf32> to vector<1x128xf32>
    %305 = arith.negf %304 : vector<1x128xf32>
    %306 = math.exp %305 : vector<1x128xf32>
    %cst_59 = arith.constant 1.000000e+00 : f32
    %307 = vector.broadcast %cst_59 : f32 to vector<1x128xf32>
    %308 = arith.addf %307, %306 : vector<1x128xf32>
    %309 = arith.divf %307, %308 : vector<1x128xf32>
    %310 = vector.extract_strided_slice %297 {offsets = [0, 256], sizes = [1, 128], strides = [1, 1]} : vector<1x512xf32> to vector<1x128xf32>
    %311 = math.tanh %310 : vector<1x128xf32>
    %312 = vector.extract_strided_slice %297 {offsets = [0, 384], sizes = [1, 128], strides = [1, 1]} : vector<1x512xf32> to vector<1x128xf32>
    %313 = arith.negf %312 : vector<1x128xf32>
    %314 = math.exp %313 : vector<1x128xf32>
    %cst_60 = arith.constant 1.000000e+00 : f32
    %315 = vector.broadcast %cst_60 : f32 to vector<1x128xf32>
    %316 = arith.addf %315, %314 : vector<1x128xf32>
    %317 = arith.divf %315, %316 : vector<1x128xf32>
    %318 = arith.mulf %309, %262 : vector<1x128xf32>
    %319 = arith.mulf %303, %311 : vector<1x128xf32>
    %320 = arith.addf %318, %319 : vector<1x128xf32>
    %321 = math.tanh %320 : vector<1x128xf32>
    %322 = arith.mulf %317, %321 : vector<1x128xf32>
    %323 = tpu.concatenate %322, %293 in 1 : vector<1x128xf32>, vector<1x128xf32> -> vector<1x256xf32>
    %324 = arith.truncf %323 : vector<1x256xf32> to vector<1x256xbf16>
    %cst_61 = arith.constant dense<0.000000e+00> : vector<1x512xf32>
    %325 = tpu.matmul %324, %4, %cst_61 {dimension_numbers = #tpu.dot_dimension_numbers<[1], [0], [0], [1], [0, 0, 1, 1], [], []>} : vector<1x256xbf16>, vector<256x512xbf16>, vector<1x512xf32> -> vector<1x512xf32>
    %326 = arith.addf %325, %10 : vector<1x512xf32>
    %327 = vector.extract_strided_slice %326 {offsets = [0, 0], sizes = [1, 128], strides = [1, 1]} : vector<1x512xf32> to vector<1x128xf32>
    %328 = arith.negf %327 : vector<1x128xf32>
    %329 = math.exp %328 : vector<1x128xf32>
    %cst_62 = arith.constant 1.000000e+00 : f32
    %330 = vector.broadcast %cst_62 : f32 to vector<1x128xf32>
    %331 = arith.addf %330, %329 : vector<1x128xf32>
    %332 = arith.divf %330, %331 : vector<1x128xf32>
    %333 = vector.extract_strided_slice %326 {offsets = [0, 128], sizes = [1, 128], strides = [1, 1]} : vector<1x512xf32> to vector<1x128xf32>
    %334 = arith.negf %333 : vector<1x128xf32>
    %335 = math.exp %334 : vector<1x128xf32>
    %cst_63 = arith.constant 1.000000e+00 : f32
    %336 = vector.broadcast %cst_63 : f32 to vector<1x128xf32>
    %337 = arith.addf %336, %335 : vector<1x128xf32>
    %338 = arith.divf %336, %337 : vector<1x128xf32>
    %339 = vector.extract_strided_slice %326 {offsets = [0, 256], sizes = [1, 128], strides = [1, 1]} : vector<1x512xf32> to vector<1x128xf32>
    %340 = math.tanh %339 : vector<1x128xf32>
    %341 = vector.extract_strided_slice %326 {offsets = [0, 384], sizes = [1, 128], strides = [1, 1]} : vector<1x512xf32> to vector<1x128xf32>
    %342 = arith.negf %341 : vector<1x128xf32>
    %343 = math.exp %342 : vector<1x128xf32>
    %cst_64 = arith.constant 1.000000e+00 : f32
    %344 = vector.broadcast %cst_64 : f32 to vector<1x128xf32>
    %345 = arith.addf %344, %343 : vector<1x128xf32>
    %346 = arith.divf %344, %345 : vector<1x128xf32>
    %347 = arith.mulf %338, %291 : vector<1x128xf32>
    %348 = arith.mulf %332, %340 : vector<1x128xf32>
    %349 = arith.addf %347, %348 : vector<1x128xf32>
    %350 = math.tanh %349 : vector<1x128xf32>
    %351 = arith.mulf %346, %350 : vector<1x128xf32>
    %352 = vector.extract_strided_slice %57 {offsets = [5, 0], sizes = [1, 512], strides = [1, 1]} : vector<6x512xf32> to vector<1x512xf32>
    %353 = arith.truncf %322 : vector<1x128xf32> to vector<1x128xbf16>
    %cst_65 = arith.constant dense<0.000000e+00> : vector<1x512xf32>
    %354 = tpu.matmul %353, %3, %cst_65 {dimension_numbers = #tpu.dot_dimension_numbers<[1], [0], [0], [1], [0, 0, 1, 1], [], []>} : vector<1x128xbf16>, vector<128x512xbf16>, vector<1x512xf32> -> vector<1x512xf32>
    %355 = arith.addf %352, %354 : vector<1x512xf32>
    %356 = vector.extract_strided_slice %355 {offsets = [0, 0], sizes = [1, 128], strides = [1, 1]} : vector<1x512xf32> to vector<1x128xf32>
    %357 = arith.negf %356 : vector<1x128xf32>
    %358 = math.exp %357 : vector<1x128xf32>
    %cst_66 = arith.constant 1.000000e+00 : f32
    %359 = vector.broadcast %cst_66 : f32 to vector<1x128xf32>
    %360 = arith.addf %359, %358 : vector<1x128xf32>
    %361 = arith.divf %359, %360 : vector<1x128xf32>
    %362 = vector.extract_strided_slice %355 {offsets = [0, 128], sizes = [1, 128], strides = [1, 1]} : vector<1x512xf32> to vector<1x128xf32>
    %363 = arith.negf %362 : vector<1x128xf32>
    %364 = math.exp %363 : vector<1x128xf32>
    %cst_67 = arith.constant 1.000000e+00 : f32
    %365 = vector.broadcast %cst_67 : f32 to vector<1x128xf32>
    %366 = arith.addf %365, %364 : vector<1x128xf32>
    %367 = arith.divf %365, %366 : vector<1x128xf32>
    %368 = vector.extract_strided_slice %355 {offsets = [0, 256], sizes = [1, 128], strides = [1, 1]} : vector<1x512xf32> to vector<1x128xf32>
    %369 = math.tanh %368 : vector<1x128xf32>
    %370 = vector.extract_strided_slice %355 {offsets = [0, 384], sizes = [1, 128], strides = [1, 1]} : vector<1x512xf32> to vector<1x128xf32>
    %371 = arith.negf %370 : vector<1x128xf32>
    %372 = math.exp %371 : vector<1x128xf32>
    %cst_68 = arith.constant 1.000000e+00 : f32
    %373 = vector.broadcast %cst_68 : f32 to vector<1x128xf32>
    %374 = arith.addf %373, %372 : vector<1x128xf32>
    %375 = arith.divf %373, %374 : vector<1x128xf32>
    %376 = arith.mulf %367, %320 : vector<1x128xf32>
    %377 = arith.mulf %361, %369 : vector<1x128xf32>
    %378 = arith.addf %376, %377 : vector<1x128xf32>
    %379 = math.tanh %378 : vector<1x128xf32>
    %380 = arith.mulf %375, %379 : vector<1x128xf32>
    %381 = tpu.concatenate %380, %351 in 1 : vector<1x128xf32>, vector<1x128xf32> -> vector<1x256xf32>
    %382 = arith.truncf %381 : vector<1x256xf32> to vector<1x256xbf16>
    %cst_69 = arith.constant dense<0.000000e+00> : vector<1x512xf32>
    %383 = tpu.matmul %382, %4, %cst_69 {dimension_numbers = #tpu.dot_dimension_numbers<[1], [0], [0], [1], [0, 0, 1, 1], [], []>} : vector<1x256xbf16>, vector<256x512xbf16>, vector<1x512xf32> -> vector<1x512xf32>
    %384 = arith.addf %383, %10 : vector<1x512xf32>
    %385 = vector.extract_strided_slice %384 {offsets = [0, 0], sizes = [1, 128], strides = [1, 1]} : vector<1x512xf32> to vector<1x128xf32>
    %386 = arith.negf %385 : vector<1x128xf32>
    %387 = math.exp %386 : vector<1x128xf32>
    %cst_70 = arith.constant 1.000000e+00 : f32
    %388 = vector.broadcast %cst_70 : f32 to vector<1x128xf32>
    %389 = arith.addf %388, %387 : vector<1x128xf32>
    %390 = arith.divf %388, %389 : vector<1x128xf32>
    %391 = vector.extract_strided_slice %384 {offsets = [0, 128], sizes = [1, 128], strides = [1, 1]} : vector<1x512xf32> to vector<1x128xf32>
    %392 = arith.negf %391 : vector<1x128xf32>
    %393 = math.exp %392 : vector<1x128xf32>
    %cst_71 = arith.constant 1.000000e+00 : f32
    %394 = vector.broadcast %cst_71 : f32 to vector<1x128xf32>
    %395 = arith.addf %394, %393 : vector<1x128xf32>
    %396 = arith.divf %394, %395 : vector<1x128xf32>
    %397 = vector.extract_strided_slice %384 {offsets = [0, 256], sizes = [1, 128], strides = [1, 1]} : vector<1x512xf32> to vector<1x128xf32>
    %398 = math.tanh %397 : vector<1x128xf32>
    %399 = vector.extract_strided_slice %384 {offsets = [0, 384], sizes = [1, 128], strides = [1, 1]} : vector<1x512xf32> to vector<1x128xf32>
    %400 = arith.negf %399 : vector<1x128xf32>
    %401 = math.exp %400 : vector<1x128xf32>
    %cst_72 = arith.constant 1.000000e+00 : f32
    %402 = vector.broadcast %cst_72 : f32 to vector<1x128xf32>
    %403 = arith.addf %402, %401 : vector<1x128xf32>
    %404 = arith.divf %402, %403 : vector<1x128xf32>
    %405 = arith.mulf %396, %349 : vector<1x128xf32>
    %406 = arith.mulf %390, %398 : vector<1x128xf32>
    %407 = arith.addf %405, %406 : vector<1x128xf32>
    %408 = math.tanh %407 : vector<1x128xf32>
    %409 = arith.mulf %404, %408 : vector<1x128xf32>
    %410 = arith.truncf %409 : vector<1x128xf32> to vector<1x128xbf16>
    %cst_73 = arith.constant dense<0.000000e+00> : vector<1x64xf32>
    %411 = tpu.matmul %410, %5, %cst_73 {dimension_numbers = #tpu.dot_dimension_numbers<[1], [0], [0], [1], [0, 0, 1, 1], [], []>} : vector<1x128xbf16>, vector<128x64xbf16>, vector<1x64xf32> -> vector<1x64xf32>
    %412 = arith.addf %411, %11 : vector<1x64xf32>
    %cst_74 = arith.constant 0.000000e+00 : f32
    %413 = vector.broadcast %cst_74 : f32 to vector<1x64xf32>
    %414 = arith.maximumf %412, %413 : vector<1x64xf32>
    %415 = arith.truncf %414 : vector<1x64xf32> to vector<1x64xbf16>
    %cst_75 = arith.constant dense<0.000000e+00> : vector<1x128xf32>
    %416 = tpu.matmul %415, %6, %cst_75 {dimension_numbers = #tpu.dot_dimension_numbers<[1], [0], [0], [1], [0, 0, 1, 1], [], []>} : vector<1x64xbf16>, vector<64x128xbf16>, vector<1x128xf32> -> vector<1x128xf32>
    %417 = arith.addf %416, %12 : vector<1x128xf32>
    %418 = vector.shape_cast %417 : vector<1x128xf32> to vector<1x1x128xf32>
    %c0_76 = arith.constant 0 : index
    %c0_77 = arith.constant 0 : index
    %c0_78 = arith.constant 0 : index
    %419 = vector.load %arg4[%c0_76, %c0_77, %c0_78] : memref<1x1x128xf32, #tpu.memory_space<vmem>>, vector<1x1x128xf32>
    tpu.vector_store %arg4[%c0_76, %c0_77, %c0_78], %418 {strides = array<i32>} : memref<1x1x128xf32, #tpu.memory_space<vmem>>, vector<1x1x128xf32>,
    return
  }
  func.func @transform_0(%arg0: i32) -> (i32, i32, i32) {
    %c0_i32 = arith.constant 0 : i32
    %c0_i32_0 = arith.constant 0 : i32
    %c0_i32_1 = arith.constant 0 : i32
    return %arg0, %c0_i32, %c0_i32_0 : i32, i32, i32
  }
  func.func @transform_1(%arg0: i32) -> (i32, i32) {
    %c0_i32 = arith.constant 0 : i32
    %c0_i32_0 = arith.constant 0 : i32
    %c0_i32_1 = arith.constant 0 : i32
    return %c0_i32, %c0_i32_0 : i32, i32
  }
  func.func @transform_2(%arg0: i32) -> (i32, i32) {
    %c0_i32 = arith.constant 0 : i32
    %c0_i32_0 = arith.constant 0 : i32
    %c0_i32_1 = arith.constant 0 : i32
    return %c0_i32, %c0_i32_0 : i32, i32
  }
  func.func @transform_3(%arg0: i32) -> (i32, i32, i32) {
    %c0_i32 = arith.constant 0 : i32
    %c0_i32_0 = arith.constant 0 : i32
    %c0_i32_1 = arith.constant 0 : i32
    return %arg0, %c0_i32, %c0_i32_0 : i32, i32, i32
  }
}

</mosaic_0001>

<bundles_post_ra>
// kernel: tpu_custom_call.1
= control target key start
LH: loop header
LB: loop body
LE: loop exit
PB: predicated region body
PF: predicated region fallthrough
CT: control target
= control target key end

     0   :  { %8 = vsyncpa [#allocation3], 0  ;;  %s5155_s0 = inlined_call_operand.vmem [shape: f32[2,16,4], index: 0, kind: input, shape index: {}]   ;;  %s5156_s1 = inlined_call_operand.hbm [shape: bf16[752,512], index: 1, kind: input, shape index: {}]   ;;  %s5157_s2 = inlined_call_operand.vmem [shape: f32[8,512], index: 2, kind: input, shape index: {}]   ;;  %s5158_s3 = inlined_call_operand.hbm [shape: f32[2,1,128], index: 3, kind: output, shape index: {}]  }
   0x1   :  { %9 = vsyncpa [#allocation4], 0 }
   0x2   :  { %11 = vsyncpa [#allocation4 + $0x1], 0  ;;  %s3888_s12 = smov 0   ;;  %s3890_s13 = smov 0  }
   0x3   :  { %s3892_s14 = smov 0   ;;  %s3894_s15 = smov 0  }
   0x4 LB: > { %s3909_s16 = sadd.s32 4294967295, %s3854_s15   ;;  %s2933_s17 = sadd.s32 4294967294, %s3854_s15   ;;  %s3854_s15 = sphi %s3894_s15, %s5749_s15   ;;  %s3850_s14 = sphi %s3892_s14, %s5748_s14   ;;  %s3846_s13 = sphi %s3890_s13, %s5747_s13   ;;  %s3842_s12 = sphi %s3888_s12, %s5746_s12  }
   0x5   : > { %s3913_s18 = sadd.s32 1, %s3854_s15   ;;  %s92_s19 = sadd.s32 1, %s3850_s14 }
   0x6   : > { %s89_s20 = ssub.s32 %s3854_s15, %s3913_s18  ;;  %p102_p0 = scmp.ne.s32.totalorder %s3850_s14, %s3846_s13 }
   0x7   : > { %p90_p1 = scmp.eq.s32.totalorder %s89_s20, 0  ;;  %p103_p2 = scmp.eq.s32.totalorder %s3909_s16, 1 }
   0x8   : > { %p108_p3 = scmp.ne.s32.totalorder %s3846_s13, %s3842_s12  ;;  %p109_p4 = scmp.eq.s32.totalorder %s2933_s17, 1 }
   0x9   : > { %s3924_s21 = scalar_select %p90_p1, %s3850_s14, %s92_s19  }
   0xa   : > { %p3926_p5 = por %p103_p2, %p102_p0  ;;  %p3930_p6 = por %p109_p4, %p108_p3 }
   0xb   : > { %p2934_p7 = scmp.ge.s32.totalorder %s3854_s15, 1  ;;  %p116_p8 = scmp.lt.s32.totalorder %s3854_s15, 3 }
   0xc   : > { %s5404_s23 = scalar_select %p3930_p6, 1, 0 }
   0xd   : > { %p3210_p9 = scmp.eq.s32.totalorder %s3909_s16, 0  ;;  %p3937_p10 = pnand %p2934_p7, %p116_p8 }
   0xe   : > { %s3856_s25 = smov [#allocation2]  }
   0xf   : > { %s128_s26 = sshll.u32 %s3856_s25, 4  ;;  %p3202_p11 = pneg %p3937_p10  ;;  %s129_s26 = int_to_ptr.vmem [resolvable:$true] %s128_s26 }
  0x10   : > { %s3775_s27 = scalar_lea.vmem %s129_s26, 24064  ;;  %p3783_p3 = scmp.lt.s32.totalorder %s129_s26, %s129_s26 }
  0x11   : > { %p3203_p12 = pnand %p3210_p9, %p3202_p11  ;;  %p3776_p0 = scmp.ne.s32.totalorder %s129_s26, %s3775_s27 }
  0x12   : > { %p3784_p4 = scmp.lt.s32.totalorder %s3775_s27, %s3775_s27 }
  0x13   : > { %p3766_p13 = pneg %p3203_p12 }
  0x14   : > { %p3785_p6 = por %p3784_p4, %p3783_p3 }
  0x15   : > { %p3778_p1 = pnand %p3776_p0, %p3766_p13 }
  0x17   : > { %p3779_p2 = pneg %p3778_p1 }
  0x19   : > { %p3786_p7 = pnand %p3785_p6, %p3779_p2 }
  0x1b   : > { %3789 = shalt.err (!%p3786_p7)
}
  0x1c   : > { %s3857_s28 = smov 256   ;;  %s3858_s29 = smov 16  }
  0x1d   : > { %3205 = dma.hbm_to_vmem [thread:$0]  (!%p3203_p12), %s5156_s1, 24064, %s129_s26, [#allocation3], %s3857_s28, %s3857_s28, %s3858_s29  }
  0x1e   : > { %155 = sbr.rel (%p3937_p10) target bundleno = 3093 (0xc15), region = 32 }
  0x23   : > { %3833 = dma.done.wait (%p3210_p9), [#allocation3], 24064  }
  0x24   : > { %3835 = vsyncadd (%p3210_p9), [#allocation3], 4294943232  ;;  %p178_p8 = scmp.lt.s32.totalorder %s3909_s16, 1  ;;  %v5159_v0 = vmov 0.0   ;;  %vm346_vm0 = vcmask 1046528   ;;  %vm356_vm1 = vcmask 1045504  }
  0x25   : > { %3142 = vmatprep.subr.bf16.mxu0 %v5159_v0  ;;  %3148 = vmatprep.subr.bf16.mxu1 %v5159_v0  ;;  %vm3860_vm2 = vmmov 0   ;;  %v3276_v7 = vld [vmem:[#allocation2] ss:$16 sps:$4 sm:$0x3f]   ;;  %s3861_s10 = smov 4   ;;  %s3862_s11 = smov 8  }
  0x26   : > { %s179_s5 = scalar_select %p178_p8, %s3909_s16, 1  ;;  %3144 = vmatprep.mubr.msk.bf16.mxu0 %vm3860_vm2, %v5159_v0  ;;  %3160 = vmatprep.mubr.msk.bf16.mxu1 %vm3860_vm2, %v5159_v0  ;;  %v383_v11 = vsel %vm356_vm1, %v3276_v7, 0  ;;  %vm366_vm3 = vcmask 31744   ;;  %vm369_vm4 = vcmask 64512   ;;  %vm378_vm5 = vcmask 97280  }
  0x27   : > { %3143 = vmatpush3.bf16.msra.mxu0 %v383_v11  ;;  %v3277_v24 = vld [vmem:[#allocation2 + $0xc0] ss:$16 sps:$4 sm:$0xff]   ;;  %v3976_v42 = vld [vmem:[#allocation2 + $0x244] ss:$16 sps:$4 sm:$0xff]   ;;  %s3863_s20 = smov 32   ;;  %s3864_s24 = smov 64  }
  0x28   : > { %s3118_s6 = sshll.u32 %s179_s5, 4  ;;  %3149 = vmatpush3.bf16.msra.mxu1 %v3277_v24  ;;  %v3278_v25 = vld [vmem:[#allocation2 + $0xa0] ss:$16 sps:$4 sm:$0xff]   ;;  %5406 = vst [vmem:[#allocation8_spill] sm:$0xff] %v3976_v42  ;;  %vm448_vm6 = vcmask 261120   ;;  %vm451_vm7 = vcmask 523264  }
  0x29   : > { %s182_s9 = scalar_lea.vmem %s5155_s0, %s3118_s6  ;;  %3150 = vmatprep.subr.bf16.mxu1 %v5159_v0  ;;  %v3279_v26 = vld [vmem:[#allocation2 + $0x80] ss:$16 sps:$4 sm:$0xff]   ;;  %vm491_vm8 = vcmask 785408   ;;  %v3985_v60 = vld [vmem:[#allocation2 + $0x224] ss:$16 sps:$4 sm:$0xff]   ;;  %vm558_vm9 = vcmask 1040384  }
  0x2a   : > { %v342_v1 = vld [vmem:[%s182_s9] sm:$0xff]  ;;  %v343_v2 = vld [vmem:[%s182_s9 + $0x8] sm:$0xff]  ;;  %vm560_vm10 = vcmask 1041408   ;;  %vm562_vm11 = vcmask 1042432   ;;  %vm564_vm12 = vcmask 1043456   ;;  %vm566_vm13 = vcmask 1044480  }
  0x2b   : > { %v347_v3 = vrot.slane %v342_v1, 1  ;;  %v348_v4 = vrot.slane %v343_v2, 1  ;;  %v357_v5 = vrot.slane %v342_v1, 2  ;;  %v358_v6 = vrot.slane %v343_v2, 2  ;;  %v3280_v27 = vld [vmem:[#allocation2 + $0x60] ss:$16 sps:$4 sm:$0xff]  }
  0x2c   : > { %3151 = vmatpush3.bf16.msra.mxu1 %v3278_v25  ;;  %v334_v28 = vld [vmem:[%s5157_s2] ss:$0 sm:$0xff]  ;;  %v3991_v62 = vld [vmem:[#allocation2 + $0x204] ss:$16 sps:$4 sm:$0xff]   ;;  %s176_s6 = sand.u32 1, %s3846_s13   ;;  %s3115_s9 = sshll.u32 %s3909_s16, 4 }
  0x2d   : > { %v349_v8 = vsel %vm346_vm0, %v347_v3, %v348_v4  ;;  %v359_v9 = vsel %vm356_vm1, %v357_v5, %v358_v6  ;;  %3152 = vmatprep.subr.bf16.mxu1 %v5159_v0  ;;  %v3281_v31 = vld [vmem:[#allocation2 + $0x40] ss:$16 sps:$4 sm:$0xff]   ;;  %v4004_v5 = vld [vmem:[#allocation2 + $0x1c4] ss:$16 sps:$4 sm:$0xff]   ;;  %s3867_s16 = smov [#allocation5]  }
  0x2e   : > { %v3256_v10 = vpack.i.bf16 %v348_v4, %v349_v8  ;;  %v3261_v12 = vpack.i.bf16 %v358_v6, %v359_v9  ;;  %v3282_v36 = vld [vmem:[#allocation2 + $0x20] ss:$16 sps:$4 sm:$0xff]   ;;  %v3302_v6 = vld [vmem:[#allocation2 + $0x124] ss:$16 sps:$4 sm:$0xff]   ;;  %s3794_s26 = sshll.u32 %s3867_s16, 4  ;;  %s3795_s26 = int_to_ptr.vmem [resolvable:$false] %s3794_s26 }
  0x2f   : > { %v3983_v58 = vld [vmem:[#allocation2 + $0x240] ss:$16 sps:$4 sm:$0xff]   ;;  %v4010_v9 = vld [vmem:[#allocation2 + $0x1a4] ss:$16 sps:$4 sm:$0xff]   ;;  %s3796_s27 = scalar_lea.vmem %s3795_s26, 32 }
  0x30   : > { %3257 = vrot.lane.b32.xlu0 %v3256_v10, %s3861_s10  ;;  %3153 = vmatpush3.bf16.msra.mxu1 %v3279_v26  ;;  %v3988_v61 = vld [vmem:[#allocation2 + $0x220] ss:$16 sps:$4 sm:$0xff]   ;;  %v3308_v10 = vld [vmem:[#allocation2 + $0x104] ss:$16 sps:$4 sm:$0xff]   ;;  %s177_s10 = scalar_lea.vmem [#allocation5], %s176_s6 }
  0x31   : > { %3154 = vmatprep.subr.bf16.mxu1 %v5159_v0  ;;  %v3994_v63 = vld [vmem:[#allocation2 + $0x200] ss:$16 sps:$4 sm:$0xff]  }
  0x32   : > { %v4000_v3 = vld [vmem:[#allocation2 + $0x1e0] ss:$16 sps:$4 sm:$0xff]  }
  0x33   : > { %v3294_v4 = vld [vmem:[#allocation2 + $0x140] ss:$16 sps:$4 sm:$0xff]  }
  0x34   : > { %3262 = vrot.lane.b32.xlu0 %v3261_v12, %s3862_s11  ;;  %3155 = vmatpush3.bf16.msra.mxu1 %v3280_v27  ;;  %v4006_v7 = vld [vmem:[#allocation2 + $0x1c0] ss:$16 sps:$4 sm:$0xff]   ;;  %s2866_s11 = sshll.u32 %s177_s10, 4  ;;  %s5116_s11 = int_to_ptr.vmem [resolvable:$true] %s2866_s11 }
  0x35   : > { %3156 = vmatprep.subr.bf16.mxu1 %v5159_v0  ;;  %v3300_v8 = vld [vmem:[#allocation2 + $0x120] ss:$16 sps:$4 sm:$0xff]   ;;  %s3790_s25 = scalar_lea.vmem %s5116_s11, 16  ;;  %p3797_p11 = scmp.lt.s32.totalorder %s5116_s11, %s3795_s26 }
  0x36   : > { %v4012_v11 = vld [vmem:[#allocation2 + $0x1a0] ss:$16 sps:$4 sm:$0xff]   ;;  %p3791_p6 = scmp.ne.s32.totalorder %s5116_s11, %s3790_s25  ;;  %p3798_p12 = scmp.lt.s32.totalorder %s3796_s27, %s3790_s25 }
  0x37   : > { %v3306_v12 = vld [vmem:[#allocation2 + $0x100] ss:$16 sps:$4 sm:$0xff]  }
  0x38   : > { %3157 = vmatpush3.bf16.msra.mxu1 %v3281_v31  ;;  %p3792_p9 = pnand %p3791_p6, %p3926_p5  ;;  %p3799_p13 = por %p3798_p12, %p3797_p11 }
  0x39   : > { %3158 = vmatprep.subr.bf16.mxu1 %v5159_v0  ;;  %v4175_v0 = vld [vmem:[#allocation2 + $0x264] ss:$16 sps:$4 sm:$0xff]  }
  0x3a   : > { %5422 = vst [vmem:[#allocation24_spill] sm:$0xff] %v4175_v0  ;;  %p3793_p10 = pneg %p3792_p9 }
  0x3c   : > { %3159 = vmatpush3.bf16.msra.mxu1 %v3282_v36  ;;  %p3800_p0 = pnand %p3799_p13, %p3793_p10 }
  0x3d   : > { %915 = vmatprep.subr.bf16.mxu1 %v3976_v42 }
  0xa2   : > { %v3258_v13 = vpop.permute.xlu0 %3257 }
  0xa3   : > { %v3260_v14 = vunpack.i.h.bf16 %v3258_v13  ;;  %v3259_v15 = vunpack.i.l.bf16 %v3258_v13  ;;  %v4016_v13 = vld [vmem:[#allocation2 + $0x184] ss:$16 sps:$4 sm:$0xff]  }
  0xa5   : > { %v368_v19 = vsel %vm366_vm3, %v343_v2, %v3260_v14  ;;  %v367_v20 = vsel %vm366_vm3, %v342_v1, %v3259_v15  ;;  %v3998_v1 = vld [vmem:[#allocation2 + $0x1e4] ss:$16 sps:$4 sm:$0xff]   ;;  %v4018_v15 = vld [vmem:[#allocation2 + $0x180] ss:$16 sps:$4 sm:$0xff]  }
  0xa6   : > { %v3263_v16 = vpop.permute.xlu0 %3262  ;;  %v3296_v2 = vld [vmem:[#allocation2 + $0x144] ss:$16 sps:$4 sm:$0xff]  }
  0xa7   : > { %v3265_v17 = vunpack.i.h.bf16 %v3263_v16  ;;  %v3264_v18 = vunpack.i.l.bf16 %v3263_v16  ;;  %681 = vmatprep.subr.bf16.mxu0 %v3296_v2  ;;  %v3314_v14 = vld [vmem:[#allocation2 + $0xe4] ss:$16 sps:$4 sm:$0xff]   ;;  %v3312_v16 = vld [vmem:[#allocation2 + $0xe0] ss:$16 sps:$4 sm:$0xff]   ;;  %v4055_v2 = vld [vmem:[#allocation2 + $0x1ec] ss:$16 sps:$4 sm:$0xff]  }
  0xa9   : > { %v370_v21 = vsel %vm369_vm4, %v367_v20, %v3264_v18  ;;  %v371_v22 = vsel %vm369_vm4, %v368_v19, %v3265_v17  ;;  %v4022_v17 = vld [vmem:[#allocation2 + $0x164] ss:$16 sps:$4 sm:$0xff]   ;;  %v3320_v18 = vld [vmem:[#allocation2 + $0x14c] ss:$16 sps:$4 sm:$0xff]   ;;  %v4024_v19 = vld [vmem:[#allocation2 + $0x160] ss:$16 sps:$4 sm:$0xff]  }
  0xaa   : > { %v372_v23 = vpack.c.bf16 %v371_v22, %v370_v21  ;;  %v5161_v20 = vmov 0   ;;  %v335_v21 = vld [vmem:[%s5157_s2 + $0x1] ss:$0 sm:$0xff] }
  0xac   : > { %3145 = vmatmul.mubr.msk.bf16.vlgmr.msra.gmra.mxu0 %vm378_vm5, %v372_v23 }
  0xad   : > { %682 = vmatpush1.bf16.msra.mxu0 %v3294_v4  ;;  %705 = vmatprep.mubr.bf16.mxu0 %v5161_v20  ;;  %v4058_v4 = vld [vmem:[#allocation2 + $0x1e8] ss:$16 sps:$4 sm:$0xff]  }
  0xae   : > { %683 = vmatprep.subr.bf16.mxu0 %v3302_v6  ;;  %v4061_v6 = vld [vmem:[#allocation2 + $0x1cc] ss:$16 sps:$4 sm:$0xff]  }
  0xb1   : > { %684 = vmatpush1.bf16.msra.mxu0 %v3300_v8  ;;  %v4064_v8 = vld [vmem:[#allocation2 + $0x1c8] ss:$16 sps:$4 sm:$0xff]  }
  0xb2   : > { %685 = vmatprep.subr.bf16.mxu0 %v3308_v10  ;;  %v4067_v10 = vld [vmem:[#allocation2 + $0x1ac] ss:$16 sps:$4 sm:$0xff]  }
  0xb5   : > { %686 = vmatpush1.bf16.msra.mxu0 %v3306_v12  ;;  %v4070_v12 = vld [vmem:[#allocation2 + $0x1a8] ss:$16 sps:$4 sm:$0xff]  }
  0xb6   : > { %687 = vmatprep.subr.bf16.mxu0 %v3314_v14  ;;  %v4073_v14 = vld [vmem:[#allocation2 + $0x18c] ss:$16 sps:$4 sm:$0xff]  }
  0xb9   : > { %688 = vmatpush1.bf16.msra.mxu0 %v3312_v16  ;;  %v4076_v16 = vld [vmem:[#allocation2 + $0x188] ss:$16 sps:$4 sm:$0xff]  }
  0xba   : > { %722 = vmatprep.subr.bf16.mxu0 %v3320_v18  ;;  %v4079_v18 = vld [vmem:[#allocation2 + $0x16c] ss:$16 sps:$4 sm:$0xff]  }
 0x16c   : > { %v419_v29 = vpop.f32.mrf.mxu0 }
 0x16d   : > { %v420_v30 = vadd.f32 %v419_v29, %v334_v28 }
 0x16e   : > { %v3146_v32 = vpop.f32.mrf.mxu0 }
 0x16f   : > { %v426_v34 = vmax.f32 %v420_v30, 0.0 }
 0x170   : > { %v422_v33 = vpop.f32.mrf.mxu0 }
 0x171   : > { %v423_v35 = vadd.f32 %v422_v33, %v334_v28  ;;  %v430_v39 = vrot.slane %v426_v34, 1  ;;  %v439_v43 = vrot.slane %v426_v34, 2 }
 0x172   : > { %v3147_v37 = vpop.f32.mrf.mxu0 }
 0x173   : > { %v427_v38 = vmax.f32 %v423_v35, 0.0 }
 0x175   : > { %v440_v40 = vrot.slane %v427_v38, 2  ;;  %v431_v41 = vrot.slane %v427_v38, 1 }
 0x177   : > { %v432_v44 = vsel %vm346_vm0, %v430_v39, %v431_v41  ;;  %v441_v46 = vsel %vm356_vm1, %v439_v43, %v440_v40 }
 0x178   : > { %v3266_v45 = vpack.i.bf16 %v431_v41, %v432_v44  ;;  %v3271_v47 = vpack.i.bf16 %v440_v40, %v441_v46 }
 0x17a   : > { %3267 = vrot.lane.b32.xlu1 %v3266_v45, %s3863_s20  ;;  %v3318_v45 = vld [vmem:[#allocation2 + $0x148] ss:$16 sps:$4 sm:$0xff]   ;;  %s5114_s20 = scalar_lea.hbm %s5158_s3, %s3115_s9 }
 0x17e   : > { %3272 = vrot.lane.b32.xlu1 %v3271_v47, %s3864_s24  ;;  %v3324_v47 = vld [vmem:[#allocation2 + $0x12c] ss:$16 sps:$4 sm:$0xff]   ;;  %s2854_s24 = scalar_lea.sflag [#allocation4], %s176_s6 }
 0x1ec   : > { %v3268_v48 = vpop.permute.xlu1 %3267 }
 0x1ed   : > { %v3270_v49 = vunpack.i.h.bf16 %v3268_v48  ;;  %v3269_v50 = vunpack.i.l.bf16 %v3268_v48  ;;  %v3322_v48 = vld [vmem:[#allocation2 + $0x128] ss:$16 sps:$4 sm:$0xff]  }
 0x1ef   : > { %v450_v54 = vsel %vm448_vm6, %v427_v38, %v3270_v49  ;;  %v449_v55 = vsel %vm448_vm6, %v426_v34, %v3269_v50  ;;  %v3327_v49 = vld [vmem:[#allocation2 + $0x10c] ss:$16 sps:$4 sm:$0xff]   ;;  %v3325_v50 = vld [vmem:[#allocation2 + $0x108] ss:$16 sps:$4 sm:$0xff]  }
 0x1f0   : > { %v3273_v51 = vpop.permute.xlu1 %3272 }
 0x1f1   : > { %v3275_v52 = vunpack.i.h.bf16 %v3273_v51  ;;  %v3274_v53 = vunpack.i.l.bf16 %v3273_v51  ;;  %v3330_v51 = vld [vmem:[#allocation2 + $0xec] ss:$16 sps:$4 sm:$0xff]  }
 0x1f3   : > { %v452_v56 = vsel %vm451_vm7, %v449_v55, %v3274_v53  ;;  %v453_v57 = vsel %vm451_vm7, %v450_v54, %v3275_v52  ;;  %v3328_v52 = vld [vmem:[#allocation2 + $0xe8] ss:$16 sps:$4 sm:$0xff]   ;;  %v4036_v53 = vld [vmem:[#allocation2 + $0x24c] ss:$16 sps:$4 sm:$0xff]  }
 0x1f4   : > { %v454_v59 = vpack.c.bf16 %v453_v57, %v452_v56  ;;  %5407 = vst [vmem:[#allocation9_spill] sm:$0xff] %v4036_v53  ;;  %v4038_v54 = vld [vmem:[#allocation2 + $0x248] ss:$16 sps:$4 sm:$0xff]   ;;  %v4041_v55 = vld [vmem:[#allocation2 + $0x22c] ss:$16 sps:$4 sm:$0xff]  }
 0x1f5   : > { %v4045_v56 = vld [vmem:[#allocation2 + $0x228] ss:$16 sps:$4 sm:$0xff]   ;;  %v4049_v57 = vld [vmem:[#allocation2 + $0x20c] ss:$16 sps:$4 sm:$0xff]  }
 0x1f6   : > { %3161 = vmatmul.mubr.msk.bf16.vlgmr.msra.gmra.mxu1 %vm491_vm8, %v454_v59  ;;  %v4052_v59 = vld [vmem:[#allocation2 + $0x208] ss:$16 sps:$4 sm:$0xff]  }
 0x1f7   : > { %916 = vmatpush1.bf16.msra.mxu1 %v3983_v58  ;;  %947 = vmatprep.mubr.bf16.mxu1 %v5161_v20 }
 0x1f8   : > { %917 = vmatprep.subr.bf16.mxu1 %v3985_v60 }
 0x1fb   : > { %918 = vmatpush1.bf16.msra.mxu1 %v3988_v61 }
 0x1fc   : > { %919 = vmatprep.subr.bf16.mxu1 %v3991_v62 }
 0x1ff   : > { %920 = vmatpush1.bf16.msra.mxu1 %v3994_v63 }
 0x200   : > { %921 = vmatprep.subr.bf16.mxu1 %v3998_v1 }
 0x203   : > { %922 = vmatpush1.bf16.msra.mxu1 %v4000_v3 }
 0x204   : > { %923 = vmatprep.subr.bf16.mxu1 %v4004_v5 }
 0x207   : > { %924 = vmatpush1.bf16.msra.mxu1 %v4006_v7 }
 0x208   : > { %925 = vmatprep.subr.bf16.mxu1 %v4010_v9 }
 0x20b   : > { %926 = vmatpush1.bf16.msra.mxu1 %v4012_v11 }
 0x20c   : > { %927 = vmatprep.subr.bf16.mxu1 %v4016_v13 }
 0x20f   : > { %928 = vmatpush1.bf16.msra.mxu1 %v4018_v15 }
 0x210   : > { %929 = vmatprep.subr.bf16.mxu1 %v4022_v17 }
 0x213   : > { %930 = vmatpush1.bf16.msra.mxu1 %v4024_v19 }
 0x216   : > { %948 = vmatmul.mubr.bf16.vlgmr.msra.gmra.mxu1 %v5161_v20 }
 0x2b6   : > { %v529_v22 = vpop.f32.mrf.mxu1 }
 0x2b7   : > { %v530_v23 = vadd.f32 %v529_v22, %v335_v21 }
 0x2b8   : > { %v3162_v24 = vpop.f32.mrf.mxu1 }
 0x2b9   : > { %v536_v25 = vmax.f32 %v530_v23, 0.0 }
 0x2ba   : > { %v532_v26 = vpop.f32.mrf.mxu1 }
 0x2bb   : > { %v539_v27 = vrot.slane %v536_v25, 1  ;;  %v533_v28 = vadd.f32 %v532_v26, %v335_v21  ;;  %v4082_v21 = vld [vmem:[#allocation2 + $0x168] ss:$16 sps:$4 sm:$0xff]   ;;  %v4091_v26 = vld [vmem:[#allocation2 + $0x344] ss:$16 sps:$4 sm:$0xff]  }
 0x2bc   : > { %v3163_v29 = vpop.f32.mrf.mxu1  ;;  %1368 = vmatprep.subr.bf16.mxu1 %v4091_v26 }
 0x2bd   : > { %v541_v30 = vmax.f32 %v536_v25, %v539_v27  ;;  %v537_v31 = vmax.f32 %v533_v28, 0.0  ;;  %v4093_v27 = vld [vmem:[#allocation2 + $0x34c] ss:$16 sps:$4 sm:$0xff]   ;;  %v4095_v28 = vld [vmem:[#allocation2 + $0x340] ss:$16 sps:$4 sm:$0xff]  }
 0x2be   : > { %v4097_v29 = vld [vmem:[#allocation2 + $0x348] ss:$16 sps:$4 sm:$0xff]   ;;  %1369 = vmatpush1.bf16.msra.mxu1 %v4095_v28 }
 0x2bf   : > { %v547_v32 = vrot.slane %v541_v30, 1  ;;  %v549_v33 = vrot.slane %v541_v30, 2  ;;  %v543_v34 = vrot.slane %v537_v31, 1  ;;  %v551_v35 = vrot.slane %v541_v30, 3 }
 0x2c1   : > { %v559_v36 = vsel %vm558_vm9, %v541_v30, %v547_v32  ;;  %v545_v37 = vmax.f32 %v537_v31, %v543_v34  ;;  %v4103_v30 = vld [vmem:[#allocation2 + $0x324] ss:$16 sps:$4 sm:$0xff]   ;;  %v4105_v31 = vld [vmem:[#allocation2 + $0x32c] ss:$16 sps:$4 sm:$0xff]   ;;  %v4107_v32 = vld [vmem:[#allocation2 + $0x320] ss:$16 sps:$4 sm:$0xff]  }
 0x2c2   : > { %v561_v38 = vsel %vm560_vm10, %v559_v36, %v549_v33  ;;  %v4109_v33 = vld [vmem:[#allocation2 + $0x328] ss:$16 sps:$4 sm:$0xff]   ;;  %1370 = vmatprep.subr.bf16.mxu1 %v4103_v30  ;;  %v4115_v34 = vld [vmem:[#allocation2 + $0x304] ss:$16 sps:$4 sm:$0xff]   ;;  %v4119_v36 = vld [vmem:[#allocation2 + $0x300] ss:$16 sps:$4 sm:$0xff]  }
 0x2c3   : > { %v554_v39 = vrot.slane %v545_v37, 4  ;;  %v556_v40 = vrot.slane %v545_v37, 5  ;;  %v563_v41 = vsel %vm562_vm11, %v561_v38, %v551_v35  ;;  %1371 = vmatpush1.bf16.msra.mxu1 %v4107_v32  ;;  %v4117_v35 = vld [vmem:[#allocation2 + $0x30c] ss:$16 sps:$4 sm:$0xff]   ;;  %v4121_v37 = vld [vmem:[#allocation2 + $0x308] ss:$16 sps:$4 sm:$0xff]  }
 0x2c4   : > { %1372 = vmatprep.subr.bf16.mxu1 %v4115_v34  ;;  %v4127_v38 = vld [vmem:[#allocation2 + $0x2e4] ss:$16 sps:$4 sm:$0xff]  }
 0x2c5   : > { %v565_v43 = vsel %vm564_vm12, %v563_v41, %v554_v39  ;;  %v4129_v39 = vld [vmem:[#allocation2 + $0x2ec] ss:$16 sps:$4 sm:$0xff]   ;;  %v4133_v41 = vld [vmem:[#allocation2 + $0x2e8] ss:$16 sps:$4 sm:$0xff]  }
 0x2c6   : > { %v567_v44 = vsel %vm566_vm13, %v565_v43, %v556_v40  ;;  %v4131_v40 = vld [vmem:[#allocation2 + $0x2e0] ss:$16 sps:$4 sm:$0xff]   ;;  %5409 = vst [vmem:[#allocation11_spill] sm:$0xff] %v4133_v41  ;;  %v4139_v43 = vld [vmem:[#allocation2 + $0x2c4] ss:$16 sps:$4 sm:$0xff]  }
 0x2c7   : > { %v568_v46 = vpack.c.bf16 %v567_v44, %v567_v44  ;;  %1373 = vmatpush1.bf16.msra.mxu1 %v4119_v36  ;;  %5408 = vst [vmem:[#allocation10_spill] sm:$0xff] %v4131_v40  ;;  %5410 = vst [vmem:[#allocation12_spill] sm:$0xff] %v4139_v43  ;;  %v4141_v44 = vld [vmem:[#allocation2 + $0x2cc] ss:$16 sps:$4 sm:$0xff]  }
 0x2c8   : > { %1374 = vmatprep.subr.bf16.mxu1 %v4127_v38  ;;  %5411 = vst [vmem:[#allocation13_spill] sm:$0xff] %v4141_v44 }
 0x2c9   : > { %2968 = vmatmul.mubr.msk.bf16.vlgmr.msra.gmra.mxu0 %vm451_vm7, %v568_v46 }
 0x2ca   : > { %723 = vmatpush1.bf16.msra.mxu0 %v3318_v45  ;;  %746 = vmatprep.mubr.bf16.mxu0 %v5161_v20  ;;  %v4143_v45 = vld [vmem:[#allocation2 + $0x2c0] ss:$16 sps:$4 sm:$0xff]  }
 0x2cb   : > { %724 = vmatprep.subr.bf16.mxu0 %v3324_v47  ;;  %1375 = vmatpush1.bf16.msra.mxu1 %v4131_v40  ;;  %5412 = vst [vmem:[#allocation14_spill] sm:$0xff] %v4143_v45  ;;  %v4147_v47 = vld [vmem:[#allocation2 + $0x2a4] ss:$16 sps:$4 sm:$0xff]  }
 0x2cc   : > { %5414 = vst [vmem:[#allocation16_spill] sm:$0xff] %v4147_v47  ;;  %1376 = vmatprep.subr.bf16.mxu1 %v4139_v43 }
 0x2ce   : > { %725 = vmatpush1.bf16.msra.mxu0 %v3322_v48  ;;  %v4151_v48 = vld [vmem:[#allocation2 + $0x2ac] ss:$16 sps:$4 sm:$0xff]  }
 0x2cf   : > { %726 = vmatprep.subr.bf16.mxu0 %v3327_v49  ;;  %5415 = vst [vmem:[#allocation17_spill] sm:$0xff] %v4151_v48  ;;  %1377 = vmatpush1.bf16.msra.mxu1 %v4143_v45  ;;  %v4155_v49 = vld [vmem:[#allocation2 + $0x2a0] ss:$16 sps:$4 sm:$0xff]  }
 0x2d0   : > { %5416 = vst [vmem:[#allocation18_spill] sm:$0xff] %v4155_v49  ;;  %1378 = vmatprep.subr.bf16.mxu1 %v4147_v47  ;;  %v4259_v47 = vld [vmem:[#allocation2 + $0x38c] ss:$16 sps:$4 sm:$0xff]  }
 0x2d1   : > { %5451 = vst [vmem:[#allocation53_spill] sm:$0xff] %v4259_v47 }
 0x2d2   : > { %727 = vmatpush1.bf16.msra.mxu0 %v3325_v50  ;;  %v4157_v50 = vld [vmem:[#allocation2 + $0x2a8] ss:$16 sps:$4 sm:$0xff]  }
 0x2d3   : > { %728 = vmatprep.subr.bf16.mxu0 %v3330_v51  ;;  %5417 = vst [vmem:[#allocation19_spill] sm:$0xff] %v4157_v50  ;;  %1379 = vmatpush1.bf16.msra.mxu1 %v4155_v49  ;;  %v4163_v51 = vld [vmem:[#allocation2 + $0x284] ss:$16 sps:$4 sm:$0xff]   ;;  %v4181_v49 = vld [vmem:[#allocation2 + $0x268] ss:$16 sps:$4 sm:$0xff]  }
 0x2d4   : > { %5418 = vst [vmem:[#allocation20_spill] sm:$0xff] %v4163_v51  ;;  %1380 = vmatprep.subr.bf16.mxu1 %v4163_v51  ;;  %5425 = vst [vmem:[#allocation27_spill] sm:$0xff] %v4181_v49  ;;  %v4193_v51 = vld [vmem:[#allocation2 + $0x448] ss:$16 sps:$4 sm:$0xff]  }
 0x2d5   : > { %5429 = vst [vmem:[#allocation31_spill] sm:$0xff] %v4193_v51 }
 0x2d6   : > { %729 = vmatpush1.bf16.msra.mxu0 %v3328_v52  ;;  %v4087_v22 = vpop.f32.mrf.mxu1  ;;  %v4165_v52 = vld [vmem:[#allocation2 + $0x28c] ss:$16 sps:$4 sm:$0xff]  }
 0x2d7   : > { %956 = vmatprep.subr.bf16.mxu0 %v4036_v53  ;;  %5419 = vst [vmem:[#allocation21_spill] sm:$0xff] %v4165_v52 }
 0x2d8   : > { %v4089_v23 = vpop.f32.mrf.mxu1 }
 0x2d9   : > { %2969 = vmatmul.mubr.msk.bf16.vlgmr.msra.gmra.mxu0 %vm451_vm7, %v568_v46  ;;  %v4145_v46 = vld [vmem:[#allocation2 + $0x2c8] ss:$16 sps:$4 sm:$0xff]  }
 0x2da   : > { %957 = vmatpush1.bf16.msra.mxu0 %v4038_v54  ;;  %988 = vmatprep.mubr.bf16.mxu0 %v5161_v20  ;;  %v953_v24 = vpop.f32.mrf.mxu1  ;;  %5413 = vst [vmem:[#allocation15_spill] sm:$0xff] %v4145_v46 }
 0x2db   : > { %958 = vmatprep.subr.bf16.mxu0 %v4041_v55  ;;  %v4167_v24 = vld [vmem:[#allocation2 + $0x280] ss:$16 sps:$4 sm:$0xff]  }
 0x2dc   : > { %v954_v25 = vpop.f32.mrf.mxu1  ;;  %5420 = vst [vmem:[#allocation22_spill] sm:$0xff] %v4167_v24  ;;  %1381 = vmatpush1.bf16.msra.mxu1 %v4167_v24  ;;  %v4189_v24 = vld [vmem:[#allocation2 + $0x44c] ss:$16 sps:$4 sm:$0xff]  }
 0x2dd   : > { %v4169_v25 = vld [vmem:[#allocation2 + $0x288] ss:$16 sps:$4 sm:$0xff]   ;;  %1382 = vmatprep.subr.bf16.mxu1 %v4175_v0  ;;  %5427 = vst [vmem:[#allocation29_spill] sm:$0xff] %v4189_v24 }
 0x2de   : > { %959 = vmatpush1.bf16.msra.mxu0 %v4045_v56  ;;  %5421 = vst [vmem:[#allocation23_spill] sm:$0xff] %v4169_v25  ;;  %v4205_v0 = vld [vmem:[#allocation2 + $0x428] ss:$16 sps:$4 sm:$0xff]  }
 0x2df   : > { %960 = vmatprep.subr.bf16.mxu0 %v4049_v57  ;;  %5433 = vst [vmem:[#allocation35_spill] sm:$0xff] %v4205_v0 }
 0x2e2   : > { %961 = vmatpush1.bf16.msra.mxu0 %v4052_v59 }
 0x2e3   : > { %962 = vmatprep.subr.bf16.mxu0 %v4055_v2 }
 0x2e6   : > { %963 = vmatpush1.bf16.msra.mxu0 %v4058_v4 }
 0x2e7   : > { %964 = vmatprep.subr.bf16.mxu0 %v4061_v6 }
 0x2ea   : > { %965 = vmatpush1.bf16.msra.mxu0 %v4064_v8 }
 0x2eb   : > { %966 = vmatprep.subr.bf16.mxu0 %v4067_v10 }
 0x2ee   : > { %967 = vmatpush1.bf16.msra.mxu0 %v4070_v12 }
 0x2ef   : > { %968 = vmatprep.subr.bf16.mxu0 %v4073_v14 }
 0x2f2   : > { %969 = vmatpush1.bf16.msra.mxu0 %v4076_v16 }
 0x2f3   : > { %970 = vmatprep.subr.bf16.mxu0 %v4079_v18 }
 0x2f6   : > { %971 = vmatpush1.bf16.msra.mxu0 %v4082_v21 }
 0x2f7   : > { %1409 = vmatprep.subr.bf16.mxu0 %v4093_v27 }
 0x2f9   : > { %989 = vmatmul.mubr.bf16.vlgmr.msra.gmra.mxu0 %v5161_v20  ;;  %v4177_v20 = vld [vmem:[#allocation2 + $0x26c] ss:$16 sps:$4 sm:$0xff]  }
 0x2fa   : > { %1410 = vmatpush1.bf16.msra.mxu0 %v4097_v29  ;;  %5423 = vst [vmem:[#allocation25_spill] sm:$0xff] %v4177_v20 }
 0x2fb   : > { %1411 = vmatprep.subr.bf16.mxu0 %v4105_v31 }
 0x2fe   : > { %1412 = vmatpush1.bf16.msra.mxu0 %v4109_v33 }
 0x2ff   : > { %1413 = vmatprep.subr.bf16.mxu0 %v4117_v35 }
 0x302   : > { %1414 = vmatpush1.bf16.msra.mxu0 %v4121_v37 }
 0x303   : > { %1415 = vmatprep.subr.bf16.mxu0 %v4129_v39 }
 0x306   : > { %1416 = vmatpush1.bf16.msra.mxu0 %v4133_v41 }
 0x307   : > { %1417 = vmatprep.subr.bf16.mxu0 %v4141_v44 }
 0x30a   : > { %1418 = vmatpush1.bf16.msra.mxu0 %v4145_v46 }
 0x30b   : > { %1419 = vmatprep.subr.bf16.mxu0 %v4151_v48  ;;  %v4243_v48 = vld [vmem:[#allocation2 + $0x3a4] ss:$16 sps:$4 sm:$0xff]  }
 0x30c   : > { %5446 = vst [vmem:[#allocation48_spill] sm:$0xff] %v4243_v48 }
 0x30e   : > { %1420 = vmatpush1.bf16.msra.mxu0 %v4157_v50  ;;  %v4179_v50 = vld [vmem:[#allocation2 + $0x260] ss:$16 sps:$4 sm:$0xff]  }
 0x30f   : > { %1421 = vmatprep.subr.bf16.mxu0 %v4165_v52  ;;  %5424 = vst [vmem:[#allocation26_spill] sm:$0xff] %v4179_v50  ;;  %1383 = vmatpush1.bf16.msra.mxu1 %v4179_v50  ;;  %v4187_v52 = vld [vmem:[#allocation2 + $0x444] ss:$16 sps:$4 sm:$0xff]   ;;  %v4201_v50 = vld [vmem:[#allocation2 + $0x42c] ss:$16 sps:$4 sm:$0xff]  }
 0x310   : > { %5426 = vst [vmem:[#allocation28_spill] sm:$0xff] %v4187_v52  ;;  %1384 = vmatprep.subr.bf16.mxu1 %v4187_v52  ;;  %5431 = vst [vmem:[#allocation33_spill] sm:$0xff] %v4201_v50  ;;  %v4217_v52 = vld [vmem:[#allocation2 + $0x408] ss:$16 sps:$4 sm:$0xff]  }
 0x311   : > { %5437 = vst [vmem:[#allocation39_spill] sm:$0xff] %v4217_v52 }
 0x312   : > { %1422 = vmatpush1.bf16.msra.mxu0 %v4169_v25  ;;  %v4191_v25 = vld [vmem:[#allocation2 + $0x440] ss:$16 sps:$4 sm:$0xff]  }
 0x313   : > { %1423 = vmatprep.subr.bf16.mxu0 %v4177_v20  ;;  %5428 = vst [vmem:[#allocation30_spill] sm:$0xff] %v4191_v25  ;;  %1385 = vmatpush2.bf16.msra.mxu1 %v4191_v25  ;;  %v4199_v20 = vld [vmem:[#allocation2 + $0x424] ss:$16 sps:$4 sm:$0xff]   ;;  %v4213_v25 = vld [vmem:[#allocation2 + $0x40c] ss:$16 sps:$4 sm:$0xff]  }
 0x314   : > { %5430 = vst [vmem:[#allocation32_spill] sm:$0xff] %v4199_v20  ;;  %1386 = vmatprep.subr.bf16.mxu1 %v4199_v20  ;;  %5435 = vst [vmem:[#allocation37_spill] sm:$0xff] %v4213_v25  ;;  %v4229_v20 = vld [vmem:[#allocation2 + $0x3e8] ss:$16 sps:$4 sm:$0xff]  }
 0x315   : > { %5441 = vst [vmem:[#allocation43_spill] sm:$0xff] %v4229_v20 }
 0x316   : > { %1424 = vmatpush1.bf16.msra.mxu0 %v4181_v49  ;;  %v4203_v49 = vld [vmem:[#allocation2 + $0x420] ss:$16 sps:$4 sm:$0xff]  }
 0x317   : > { %1425 = vmatprep.subr.bf16.mxu0 %v4189_v24  ;;  %5432 = vst [vmem:[#allocation34_spill] sm:$0xff] %v4203_v49  ;;  %1387 = vmatpush2.bf16.msra.mxu1 %v4203_v49  ;;  %v4211_v24 = vld [vmem:[#allocation2 + $0x404] ss:$16 sps:$4 sm:$0xff]   ;;  %v4225_v49 = vld [vmem:[#allocation2 + $0x3ec] ss:$16 sps:$4 sm:$0xff]  }
 0x318   : > { %5434 = vst [vmem:[#allocation36_spill] sm:$0xff] %v4211_v24  ;;  %1388 = vmatprep.subr.bf16.mxu1 %v4211_v24  ;;  %5439 = vst [vmem:[#allocation41_spill] sm:$0xff] %v4225_v49  ;;  %v4241_v24 = vld [vmem:[#allocation2 + $0x3c8] ss:$16 sps:$4 sm:$0xff]  }
 0x319   : > { %5445 = vst [vmem:[#allocation47_spill] sm:$0xff] %v4241_v24 }
 0x31a   : > { %1426 = vmatpush2.bf16.msra.mxu0 %v4193_v51  ;;  %v4215_v51 = vld [vmem:[#allocation2 + $0x400] ss:$16 sps:$4 sm:$0xff]  }
 0x31b   : > { %1427 = vmatprep.subr.bf16.mxu0 %v4201_v50  ;;  %5436 = vst [vmem:[#allocation38_spill] sm:$0xff] %v4215_v51  ;;  %1389 = vmatpush2.bf16.msra.mxu1 %v4215_v51  ;;  %v4223_v50 = vld [vmem:[#allocation2 + $0x3e4] ss:$16 sps:$4 sm:$0xff]   ;;  %v4237_v51 = vld [vmem:[#allocation2 + $0x3cc] ss:$16 sps:$4 sm:$0xff]  }
 0x31c   : > { %5438 = vst [vmem:[#allocation40_spill] sm:$0xff] %v4223_v50  ;;  %1390 = vmatprep.subr.bf16.mxu1 %v4223_v50  ;;  %5443 = vst [vmem:[#allocation45_spill] sm:$0xff] %v4237_v51  ;;  %v4247_v50 = vld [vmem:[#allocation2 + $0x3ac] ss:$16 sps:$4 sm:$0xff]  }
 0x31d   : > { %5447 = vst [vmem:[#allocation49_spill] sm:$0xff] %v4247_v50 }
 0x31e   : > { %1428 = vmatpush2.bf16.msra.mxu0 %v4205_v0  ;;  %v4227_v0 = vld [vmem:[#allocation2 + $0x3e0] ss:$16 sps:$4 sm:$0xff]  }
 0x31f   : > { %1429 = vmatprep.subr.bf16.mxu0 %v4213_v25  ;;  %5440 = vst [vmem:[#allocation42_spill] sm:$0xff] %v4227_v0  ;;  %1391 = vmatpush2.bf16.msra.mxu1 %v4227_v0  ;;  %v4235_v25 = vld [vmem:[#allocation2 + $0x3c4] ss:$16 sps:$4 sm:$0xff]   ;;  %v4253_v0 = vld [vmem:[#allocation2 + $0x3a8] ss:$16 sps:$4 sm:$0xff]  }
 0x320   : > { %5442 = vst [vmem:[#allocation44_spill] sm:$0xff] %v4235_v25  ;;  %1392 = vmatprep.subr.bf16.mxu1 %v4235_v25  ;;  %5449 = vst [vmem:[#allocation51_spill] sm:$0xff] %v4253_v0  ;;  %v3866_v25 = vmov 0.0|0.0  }
 0x321   : > { %1400 = vmatprep.mubr.bf16.mxu1 %v3866_v25  ;;  %1441 = vmatprep.mubr.bf16.mxu0 %v3866_v25  ;;  %v4275_v25 = vld [vmem:[#allocation2 + $0x360] ss:$16 sps:$4 sm:$0xff]  }
 0x322   : > { %1430 = vmatpush2.bf16.msra.mxu0 %v4217_v52  ;;  %v4239_v52 = vld [vmem:[#allocation2 + $0x3c0] ss:$16 sps:$4 sm:$0xff]   ;;  %5456 = vst [vmem:[#allocation58_spill] sm:$0xff] %v4275_v25 }
 0x323   : > { %1431 = vmatprep.subr.bf16.mxu0 %v4225_v49  ;;  %5444 = vst [vmem:[#allocation46_spill] sm:$0xff] %v4239_v52  ;;  %1393 = vmatpush2.bf16.msra.mxu1 %v4239_v52  ;;  %v4257_v49 = vld [vmem:[#allocation2 + $0x384] ss:$16 sps:$4 sm:$0xff]   ;;  %v4265_v52 = vld [vmem:[#allocation2 + $0x388] ss:$16 sps:$4 sm:$0xff]  }
 0x324   : > { %1394 = vmatprep.subr.bf16.mxu1 %v4243_v48  ;;  %5450 = vst [vmem:[#allocation52_spill] sm:$0xff] %v4257_v49  ;;  %5453 = vst [vmem:[#allocation55_spill] sm:$0xff] %v4265_v52  ;;  %v4271_v48 = vld [vmem:[#allocation2 + $0x36c] ss:$16 sps:$4 sm:$0xff]  }
 0x325   : > { %5455 = vst [vmem:[#allocation57_spill] sm:$0xff] %v4271_v48 }
 0x326   : > { %1432 = vmatpush2.bf16.msra.mxu0 %v4229_v20  ;;  %v4251_v20 = vld [vmem:[#allocation2 + $0x3a0] ss:$16 sps:$4 sm:$0xff]  }
 0x327   : > { %1433 = vmatprep.subr.bf16.mxu0 %v4237_v51  ;;  %5448 = vst [vmem:[#allocation50_spill] sm:$0xff] %v4251_v20  ;;  %1395 = vmatpush2.bf16.msra.mxu1 %v4251_v20  ;;  %v4277_v20 = vld [vmem:[#allocation2 + $0x368] ss:$16 sps:$4 sm:$0xff]  }
 0x328   : > { %1396 = vmatprep.subr.bf16.mxu1 %v4257_v49  ;;  %5457 = vst [vmem:[#allocation59_spill] sm:$0xff] %v4277_v20 }
 0x32a   : > { %1434 = vmatpush2.bf16.msra.mxu0 %v4241_v24  ;;  %v4263_v24 = vld [vmem:[#allocation2 + $0x380] ss:$16 sps:$4 sm:$0xff]  }
 0x32b   : > { %1435 = vmatprep.subr.bf16.mxu0 %v4247_v50  ;;  %5452 = vst [vmem:[#allocation54_spill] sm:$0xff] %v4263_v24  ;;  %v4269_v50 = vld [vmem:[#allocation2 + $0x364] ss:$16 sps:$4 sm:$0xff]   ;;  %1397 = vmatpush2.bf16.msra.mxu1 %v4263_v24  ;;  %v570_v24 = vlaneseq }
 0x32c   : > { %5454 = vst [vmem:[#allocation56_spill] sm:$0xff] %v4269_v50  ;;  %1398 = vmatprep.subr.bf16.mxu1 %v4269_v50 }
 0x32e   : > { %1436 = vmatpush2.bf16.msra.mxu0 %v4253_v0  ;;  %v4285_v0 = vshrl.u32 %v570_v24, 7 }
 0x32f   : > { %1437 = vmatprep.subr.bf16.mxu0 %v4259_v47  ;;  %1399 = vmatpush2.bf16.msra.mxu1 %v4275_v25  ;;  %v2941_v25 = vld [vmem:[%s5157_s2 + $0x2] ss:$8 sm:$0xf] }
 0x330   : > { %1474 = vmatprep.subr.bf16.mxu1 %v3976_v42  ;;  %v5265_v46 = vsub.s32 1, %v4285_v0  ;;  %v5266_v50 = vsub.s32 0, %v4285_v0 }
 0x332   : > { %1438 = vmatpush2.bf16.msra.mxu0 %v4265_v52  ;;  %v577_v42 = vrot.slane %v2941_v25, %v5265_v46  ;;  %v5269_v46 = vsub.s32 2, %v4285_v0 }
 0x333   : > { %1439 = vmatprep.subr.bf16.mxu0 %v4271_v48 }
 0x336   : > { %1440 = vmatpush2.bf16.msra.mxu0 %v4277_v20 }
 0x337   : > { %1515 = vmatprep.subr.bf16.mxu0 %v4036_v53  ;;  %v573_v53 = vrot.slane %v2941_v25, %v5266_v50 }
 0x389   : > { %v707_v47 = vpop.f32.mrf.mxu0 }
 0x38b   : > { %v709_v49 = vpop.f32.mrf.mxu0 }
 0x38c   : > { %v4296_v48 = vadd.f32 %v709_v49, %v577_v42  ;;  %v5272_v42 = vsub.s32 3, %v4285_v0 }
 0x38d   : > { %v711_v52 = vpop.f32.mrf.mxu0 }
 0x38e   : > { %5458 = vst [vmem:[#allocation60_spill] sm:$0xff] %v4296_v48  ;;  %v4298_v52 = vadd.f32 %v707_v47, %v573_v53  ;;  %v998_v45 = vadd.f32 %v4089_v23, %v4296_v48  ;;  %v581_v47 = vrot.slane %v2941_v25, %v5269_v46  ;;  %v585_v23 = vrot.slane %v2941_v25, %v5272_v42 }
 0x38f   : > { %v712_v51 = vpop.f32.mrf.mxu0 }
 0x390   : > { %5459 = vst [vmem:[#allocation61_spill] sm:$0xff] %v4298_v52  ;;  %v997_v44 = vadd.f32 %v4087_v22, %v4298_v52  ;;  %v3003_v41 = vmul.f32 -1.442695, %v998_v45 }
 0x392   : > { %v3002_v40 = vmul.f32 -1.442695, %v997_v44  ;;  %3463 = vpow2.f32 %v3003_v41 }
 0x394   : > { %3465 = vpow2.f32 %v3002_v40 }
 0x399   : > { %v748_v20 = vpop.f32.mrf.mxu0 }
 0x39a   : > { %v4310_v22 = vadd.f32 %v748_v20, %v581_v47 }
 0x39b   : > { %v750_v51 = vpop.f32.mrf.mxu0 }
 0x39c   : > { %v4312_v41 = vadd.f32 %v750_v51, %v585_v23 }
 0x39d   : > { %v752_v24 = vpop.f32.mrf.mxu0 }
 0x39f   : > { %v753_v43 = vpop.f32.mrf.mxu0  ;;  %v3464_v49 = vpop.eup %3463 }
 0x3a0   : > { %v1010_v24 = vadd.f32 1.0, %v3464_v49 }
 0x3a1   : > { %v3466_v53 = vpop.eup %3465 }
 0x3a2   : > { %v1004_v50 = vadd.f32 1.0, %v3466_v53  ;;  %3467 = vrcp.f32 %v1010_v24 }
 0x3a4   : > { %3469 = vrcp.f32 %v1004_v50 }
 0x3af   : > { %v3468_v52 = vpop.eup %3467 }
 0x3b0   : > { %v1020_v20 = vmul.f32 0.0, %v3468_v52  ;;  %v5475_v52 = vld [vmem:[#allocation24_spill] sm:$0xff] }
 0x3b1   : > { %v3470_v25 = vpop.eup %3469 }
 0x3b9   : > { %v990_v43 = vpop.f32.mrf.mxu0 }
 0x3ba   : > { %v999_v40 = vadd.f32 %v990_v43, %v4310_v22 }
 0x3bb   : > { %v992_v44 = vpop.f32.mrf.mxu0 }
 0x3bc   : > { %3471 = vtanh.f32 %v999_v40  ;;  %v1000_v45 = vadd.f32 %v992_v44, %v4312_v41  ;;  %v5476_v44 = vld [vmem:[#allocation25_spill] sm:$0xff] }
 0x3bd   : > { %v994_v48 = vpop.f32.mrf.mxu0 }
 0x3be   : > { %v3004_v46 = vmul.f32 -1.442695, %v1000_v45  ;;  %v5474_v48 = vld [vmem:[#allocation23_spill] sm:$0xff]  ;;  %v5477_v45 = vld [vmem:[#allocation26_spill] sm:$0xff] }
 0x3bf   : > { %v995_v49 = vpop.f32.mrf.mxu0 }
 0x3c0   : > { %3473 = vpow2.f32 %v3004_v46  ;;  %v5460_v46 = vmov 0   ;;  %v5478_v49 = vld [vmem:[#allocation27_spill] sm:$0xff] }
 0x3c9   : > { %v3472_v53 = vpop.eup %3471 }
 0x3ca   : > { %v1021_v47 = vmul.f32 %v3472_v53, %v3470_v25  ;;  %v5479_v25 = vld [vmem:[#allocation28_spill] sm:$0xff]  ;;  %v5480_v53 = vld [vmem:[#allocation29_spill] sm:$0xff] }
 0x3cc   : > { %v4316_v42 = vadd.f32 %v1021_v47, %v1020_v20  ;;  %v5481_v20 = vld [vmem:[#allocation30_spill] sm:$0xff]  ;;  %v5482_v47 = vld [vmem:[#allocation31_spill] sm:$0xff] }
 0x3cd   : > { %v3474_v51 = vpop.eup %3473 }
 0x3ce   : > { %v1017_v24 = vadd.f32 1.0, %v3474_v51  ;;  %3475 = vtanh.f32 %v4316_v42  ;;  %v5483_v51 = vld [vmem:[#allocation32_spill] sm:$0xff] }
 0x3d0   : > { %3477 = vrcp.f32 %v1017_v24  ;;  %v5484_v24 = vld [vmem:[#allocation33_spill] sm:$0xff] }
 0x3db   : > { %v3476_v50 = vpop.eup %3475 }
 0x3dd   : > { %v3478_v23 = vpop.eup %3477 }
 0x3de   : > { %v1024_v43 = vmul.f32 %v3478_v23, %v3476_v50  ;;  %v5485_v50 = vld [vmem:[#allocation34_spill] sm:$0xff]  ;;  %v5486_v23 = vld [vmem:[#allocation35_spill] sm:$0xff] }
 0x3e0   : > { %v1025_v40 = vpack.c.bf16 %v1024_v43, %v1024_v43  ;;  %v5487_v43 = vld [vmem:[#allocation36_spill] sm:$0xff] }
 0x3e2   : > { %1401 = vmatmul.mubr.bf16.vlgmr.msra.gmra.mxu1 %v1025_v40  ;;  %1442 = vmatmul.mubr.bf16.vlgmr.msra.gmra.mxu0 %v1025_v40 }
 0x3e3   : > { %1475 = vmatpush1.bf16.msra.mxu1 %v3983_v58  ;;  %1516 = vmatpush1.bf16.msra.mxu0 %v4038_v54  ;;  %v5461_v58 = vld [vmem:[#allocation10_spill] sm:$0xff] }
 0x3e4   : > { %1476 = vmatprep.subr.bf16.mxu1 %v3985_v60  ;;  %1517 = vmatprep.subr.bf16.mxu0 %v4041_v55  ;;  %v5462_v60 = vld [vmem:[#allocation11_spill] sm:$0xff] }
 0x3e5   : > { %1506 = vmatprep.mubr.bf16.mxu1 %v5460_v46  ;;  %1547 = vmatprep.mubr.bf16.mxu0 %v5460_v46 }
 0x3e7   : > { %1477 = vmatpush1.bf16.msra.mxu1 %v3988_v61  ;;  %1518 = vmatpush1.bf16.msra.mxu0 %v4045_v56  ;;  %v5463_v61 = vld [vmem:[#allocation12_spill] sm:$0xff] }
 0x3e8   : > { %1478 = vmatprep.subr.bf16.mxu1 %v3991_v62  ;;  %1519 = vmatprep.subr.bf16.mxu0 %v4049_v57  ;;  %v5464_v62 = vld [vmem:[#allocation13_spill] sm:$0xff] }
 0x3eb   : > { %1479 = vmatpush1.bf16.msra.mxu1 %v3994_v63  ;;  %1520 = vmatpush1.bf16.msra.mxu0 %v4052_v59  ;;  %v5465_v63 = vld [vmem:[#allocation14_spill] sm:$0xff] }
 0x3ec   : > { %1480 = vmatprep.subr.bf16.mxu1 %v3998_v1  ;;  %1521 = vmatprep.subr.bf16.mxu0 %v4055_v2  ;;  %v5466_v1 = vld [vmem:[#allocation15_spill] sm:$0xff] }
 0x3ef   : > { %1481 = vmatpush1.bf16.msra.mxu1 %v4000_v3  ;;  %1522 = vmatpush1.bf16.msra.mxu0 %v4058_v4  ;;  %v5467_v3 = vld [vmem:[#allocation16_spill] sm:$0xff] }
 0x3f0   : > { %1482 = vmatprep.subr.bf16.mxu1 %v4004_v5  ;;  %1523 = vmatprep.subr.bf16.mxu0 %v4061_v6  ;;  %v5468_v5 = vld [vmem:[#allocation17_spill] sm:$0xff] }
 0x3f3   : > { %1483 = vmatpush1.bf16.msra.mxu1 %v4006_v7  ;;  %1524 = vmatpush1.bf16.msra.mxu0 %v4064_v8  ;;  %v5469_v7 = vld [vmem:[#allocation18_spill] sm:$0xff] }
 0x3f4   : > { %1484 = vmatprep.subr.bf16.mxu1 %v4010_v9  ;;  %1525 = vmatprep.subr.bf16.mxu0 %v4067_v10  ;;  %v5470_v9 = vld [vmem:[#allocation19_spill] sm:$0xff] }
 0x3f7   : > { %1485 = vmatpush1.bf16.msra.mxu1 %v4012_v11  ;;  %1526 = vmatpush1.bf16.msra.mxu0 %v4070_v12  ;;  %v5471_v11 = vld [vmem:[#allocation20_spill] sm:$0xff] }
 0x3f8   : > { %1486 = vmatprep.subr.bf16.mxu1 %v4016_v13  ;;  %1527 = vmatprep.subr.bf16.mxu0 %v4073_v14  ;;  %v5472_v13 = vld [vmem:[#allocation21_spill] sm:$0xff] }
 0x3fb   : > { %1487 = vmatpush1.bf16.msra.mxu1 %v4018_v15  ;;  %1528 = vmatpush1.bf16.msra.mxu0 %v4076_v16  ;;  %v5473_v15 = vld [vmem:[#allocation22_spill] sm:$0xff] }
 0x3fc   : > { %1488 = vmatprep.subr.bf16.mxu1 %v4022_v17  ;;  %1529 = vmatprep.subr.bf16.mxu0 %v4079_v18 }
 0x3ff   : > { %1489 = vmatpush1.bf16.msra.mxu1 %v4024_v19  ;;  %1530 = vmatpush1.bf16.msra.mxu0 %v4082_v21 }
 0x400   : > { %1612 = vmatprep.subr.bf16.mxu1 %v4091_v26  ;;  %1653 = vmatprep.subr.bf16.mxu0 %v4093_v27 }
 0x402   : > { %1507 = vmatmul.mubr.bf16.vlgmr.msra.gmra.mxu1 %v1025_v40  ;;  %1548 = vmatmul.mubr.bf16.vlgmr.msra.gmra.mxu0 %v1025_v40  ;;  %v5488_v40 = vld [vmem:[#allocation37_spill] sm:$0xff] }
 0x403   : > { %1613 = vmatpush1.bf16.msra.mxu1 %v4095_v28  ;;  %1654 = vmatpush1.bf16.msra.mxu0 %v4097_v29 }
 0x404   : > { %1614 = vmatprep.subr.bf16.mxu1 %v4103_v30  ;;  %1655 = vmatprep.subr.bf16.mxu0 %v4105_v31 }
 0x407   : > { %1615 = vmatpush1.bf16.msra.mxu1 %v4107_v32  ;;  %1656 = vmatpush1.bf16.msra.mxu0 %v4109_v33 }
 0x408   : > { %1616 = vmatprep.subr.bf16.mxu1 %v4115_v34  ;;  %1657 = vmatprep.subr.bf16.mxu0 %v4117_v35 }
 0x40b   : > { %1617 = vmatpush1.bf16.msra.mxu1 %v4119_v36  ;;  %1658 = vmatpush1.bf16.msra.mxu0 %v4121_v37 }
 0x40c   : > { %1618 = vmatprep.subr.bf16.mxu1 %v4127_v38  ;;  %1659 = vmatprep.subr.bf16.mxu0 %v4129_v39 }
 0x40f   : > { %1619 = vmatpush1.bf16.msra.mxu1 %v5461_v58  ;;  %1660 = vmatpush1.bf16.msra.mxu0 %v5462_v60 }
 0x410   : > { %1620 = vmatprep.subr.bf16.mxu1 %v5463_v61  ;;  %1661 = vmatprep.subr.bf16.mxu0 %v5464_v62 }
 0x413   : > { %1621 = vmatpush1.bf16.msra.mxu1 %v5465_v63  ;;  %1662 = vmatpush1.bf16.msra.mxu0 %v5466_v1 }
 0x414   : > { %1622 = vmatprep.subr.bf16.mxu1 %v5467_v3  ;;  %1663 = vmatprep.subr.bf16.mxu0 %v5468_v5 }
 0x417   : > { %1623 = vmatpush1.bf16.msra.mxu1 %v5469_v7  ;;  %1664 = vmatpush1.bf16.msra.mxu0 %v5470_v9 }
 0x418   : > { %1624 = vmatprep.subr.bf16.mxu1 %v5471_v11  ;;  %1665 = vmatprep.subr.bf16.mxu0 %v5472_v13  ;;  %v5517_v13 = vsub.s32 3, %v4285_v0 }
 0x41b   : > { %1625 = vmatpush1.bf16.msra.mxu1 %v5473_v15  ;;  %1666 = vmatpush1.bf16.msra.mxu0 %v5474_v48 }
 0x41c   : > { %1626 = vmatprep.subr.bf16.mxu1 %v5475_v52  ;;  %1667 = vmatprep.subr.bf16.mxu0 %v5476_v44 }
 0x41f   : > { %1627 = vmatpush1.bf16.msra.mxu1 %v5477_v45  ;;  %1668 = vmatpush1.bf16.msra.mxu0 %v5478_v49  ;;  %v5489_v49 = vld [vmem:[#allocation38_spill] sm:$0xff] }
 0x420   : > { %1628 = vmatprep.subr.bf16.mxu1 %v5479_v25  ;;  %1669 = vmatprep.subr.bf16.mxu0 %v5480_v53  ;;  %v5490_v25 = vld [vmem:[#allocation39_spill] sm:$0xff]  ;;  %v5491_v53 = vld [vmem:[#allocation40_spill] sm:$0xff] }
 0x423   : > { %1629 = vmatpush2.bf16.msra.mxu1 %v5481_v20  ;;  %1670 = vmatpush2.bf16.msra.mxu0 %v5482_v47  ;;  %v5492_v20 = vld [vmem:[#allocation41_spill] sm:$0xff]  ;;  %v5493_v47 = vld [vmem:[#allocation42_spill] sm:$0xff] }
 0x424   : > { %1630 = vmatprep.subr.bf16.mxu1 %v5483_v51  ;;  %1671 = vmatprep.subr.bf16.mxu0 %v5484_v24  ;;  %v5494_v51 = vld [vmem:[#allocation43_spill] sm:$0xff]  ;;  %v5495_v24 = vld [vmem:[#allocation44_spill] sm:$0xff] }
 0x427   : > { %1631 = vmatpush2.bf16.msra.mxu1 %v5485_v50  ;;  %1672 = vmatpush2.bf16.msra.mxu0 %v5486_v23  ;;  %v5496_v50 = vld [vmem:[#allocation45_spill] sm:$0xff]  ;;  %v5497_v23 = vld [vmem:[#allocation46_spill] sm:$0xff] }
 0x428   : > { %1632 = vmatprep.subr.bf16.mxu1 %v5487_v43  ;;  %1673 = vmatprep.subr.bf16.mxu0 %v5488_v40  ;;  %v5498_v43 = vld [vmem:[#allocation47_spill] sm:$0xff]  ;;  %v5499_v40 = vld [vmem:[#allocation48_spill] sm:$0xff] }
 0x42b   : > { %1633 = vmatpush2.bf16.msra.mxu1 %v5489_v49  ;;  %1674 = vmatpush2.bf16.msra.mxu0 %v5490_v25  ;;  %v5500_v49 = vld [vmem:[#allocation49_spill] sm:$0xff]  ;;  %v5501_v25 = vld [vmem:[#allocation50_spill] sm:$0xff] }
 0x42c   : > { %1634 = vmatprep.subr.bf16.mxu1 %v5491_v53  ;;  %1675 = vmatprep.subr.bf16.mxu0 %v5492_v20  ;;  %v5502_v53 = vld [vmem:[#allocation51_spill] sm:$0xff]  ;;  %v5503_v20 = vld [vmem:[#allocation52_spill] sm:$0xff] }
 0x42f   : > { %1635 = vmatpush2.bf16.msra.mxu1 %v5493_v47  ;;  %1676 = vmatpush2.bf16.msra.mxu0 %v5494_v51  ;;  %v5504_v47 = vld [vmem:[#allocation53_spill] sm:$0xff]  ;;  %v5505_v51 = vld [vmem:[#allocation54_spill] sm:$0xff] }
 0x430   : > { %1636 = vmatprep.subr.bf16.mxu1 %v5495_v24  ;;  %1677 = vmatprep.subr.bf16.mxu0 %v5496_v50  ;;  %v5506_v24 = vld [vmem:[#allocation55_spill] sm:$0xff]  ;;  %v5507_v50 = vld [vmem:[#allocation56_spill] sm:$0xff] }
 0x433   : > { %1637 = vmatpush2.bf16.msra.mxu1 %v5497_v23  ;;  %1678 = vmatpush2.bf16.msra.mxu0 %v5498_v43  ;;  %v5508_v23 = vld [vmem:[#allocation57_spill] sm:$0xff]  ;;  %v5509_v43 = vld [vmem:[#allocation58_spill] sm:$0xff] }
 0x434   : > { %1638 = vmatprep.subr.bf16.mxu1 %v5499_v40  ;;  %1679 = vmatprep.subr.bf16.mxu0 %v5500_v49  ;;  %v5510_v40 = vld [vmem:[#allocation59_spill] sm:$0xff]  ;;  %v5511_v49 = vld [vmem:[#allocation8_spill] sm:$0xff] }
 0x437   : > { %1639 = vmatpush2.bf16.msra.mxu1 %v5501_v25  ;;  %1680 = vmatpush2.bf16.msra.mxu0 %v5502_v53  ;;  %v5512_v25 = vld [vmem:[#allocation9_spill] sm:$0xff] }
 0x438   : > { %1640 = vmatprep.subr.bf16.mxu1 %v5503_v20  ;;  %1681 = vmatprep.subr.bf16.mxu0 %v5504_v47  ;;  %v2942_v47 = vld [vmem:[%s5157_s2 + $0x3] ss:$8 sm:$0xf] }
 0x43b   : > { %1641 = vmatpush2.bf16.msra.mxu1 %v5505_v51  ;;  %1682 = vmatpush2.bf16.msra.mxu0 %v5506_v24  ;;  %v5513_v51 = vsub.s32 0, %v4285_v0 }
 0x43c   : > { %1642 = vmatprep.subr.bf16.mxu1 %v5507_v50  ;;  %1683 = vmatprep.subr.bf16.mxu0 %v5508_v23  ;;  %v5515_v50 = vsub.s32 1, %v4285_v0 }
 0x43d   : > { %v4422_v20 = vrot.slane %v2942_v47, %v5513_v51 }
 0x43e   : > { %v4426_v24 = vrot.slane %v2942_v47, %v5515_v50  ;;  %v4432_v50 = vrot.slane %v2942_v47, %v5517_v13 }
 0x43f   : > { %1643 = vmatpush2.bf16.msra.mxu1 %v5509_v43  ;;  %1684 = vmatpush2.bf16.msra.mxu0 %v5510_v40  ;;  %5514 = vst [vmem:[#allocation10_spill] sm:$0xff] %v4422_v20 }
 0x440   : > { %1718 = vmatprep.subr.bf16.mxu1 %v5511_v49  ;;  %1759 = vmatprep.subr.bf16.mxu0 %v5512_v25  ;;  %5516 = vst [vmem:[#allocation11_spill] sm:$0xff] %v4426_v24  ;;  %5518 = vst [vmem:[#allocation12_spill] sm:$0xff] %v4432_v50 }
 0x4a2   : > { %v1402_v23 = vpop.f32.mrf.mxu1  ;;  %v1443_v43 = vpop.f32.mrf.mxu0 }
 0x4a3   : > { %v1403_v40 = vadd.f32 %v1402_v23, %v4422_v20  ;;  %v5519_v23 = vsub.s32 2, %v4285_v0 }
 0x4a4   : > { %v1404_v53 = vpop.f32.mrf.mxu1  ;;  %v1445_v49 = vpop.f32.mrf.mxu0 }
 0x4a5   : > { %v3069_v45 = vmul.f32 -1.442695, %v1403_v40  ;;  %v1405_v25 = vadd.f32 %v1404_v53, %v4426_v24  ;;  %v1446_v11 = vadd.f32 %v1445_v49, %v4432_v50  ;;  %v4437_v20 = vrot.slane %v2942_v47, %v5519_v23  ;;  %v5521_v23 = vld [vmem:[#allocation61_spill] sm:$0xff] }
 0x4a6   : > { %v1406_v44 = vpop.f32.mrf.mxu1  ;;  %v1447_v52 = vpop.f32.mrf.mxu0 }
 0x4a7   : > { %3479 = vpow2.f32 %v3069_v45  ;;  %v3070_v48 = vmul.f32 -1.442695, %v1405_v25  ;;  %5520 = vst [vmem:[#allocation13_spill] sm:$0xff] %v4437_v20  ;;  %v3071_v40 = vmul.f32 -1.442695, %v1446_v11  ;;  %v1444_v44 = vadd.f32 %v1443_v43, %v4437_v20 }
 0x4a8   : > { %v1407_v15 = vpop.f32.mrf.mxu1  ;;  %v1448_v51 = vpop.f32.mrf.mxu0 }
 0x4a9   : > { %3481 = vpow2.f32 %v3070_v48 }
 0x4aa   : > { %3483 = vpow2.f32 %v3071_v40 }
 0x4b4   : > { %v3480_v9 = vpop.eup %3479 }
 0x4b5   : > { %v1453_v52 = vadd.f32 1.0, %v3480_v9 }
 0x4b6   : > { %v3482_v45 = vpop.eup %3481 }
 0x4b7   : > { %3485 = vrcp.f32 %v1453_v52  ;;  %v1459_v15 = vadd.f32 1.0, %v3482_v45  ;;  %v3484_v53 = vpop.eup %3483 }
 0x4b8   : > { %3487 = vtanh.f32 %v1444_v44  ;;  %v1466_v43 = vadd.f32 1.0, %v3484_v53  ;;  %v5522_v44 = vld [vmem:[#allocation60_spill] sm:$0xff] }
 0x4b9   : > { %3489 = vrcp.f32 %v1459_v15 }
 0x4c2   : > { %v1508_v48 = vpop.f32.mrf.mxu1  ;;  %v1549_v13 = vpop.f32.mrf.mxu0 }
 0x4c3   : > { %v1560_v25 = vrot.slane %v1508_v48, 7 }
 0x4c4   : > { %v3486_v49 = vpop.eup %3485  ;;  %v1510_v51 = vpop.f32.mrf.mxu1 }
 0x4c5   : > { %v1551_v0 = vpop.f32.mrf.mxu0  ;;  %v3488_v47 = vpop.eup %3487  ;;  %v1568_v11 = vadd.f32 %v1560_v25, %v5521_v23  ;;  %v1561_v50 = vrot.slane %v1510_v51, 7  ;;  %v1562_v51 = vrot.slane %v1549_v13, 7 }
 0x4c6   : > { %v3490_v24 = vpop.eup %3489  ;;  %v1512_v9 = vpop.f32.mrf.mxu1  ;;  %v1470_v52 = vmul.f32 %v3488_v47, %v3486_v49  ;;  %v1563_v25 = vrot.slane %v1551_v0, 7 }
 0x4c7   : > { %v1553_v20 = vpop.f32.mrf.mxu0  ;;  %v1469_v40 = vmul.f32 0.0, %v3490_v24  ;;  %v3072_v45 = vmul.f32 -1.442695, %v1568_v11  ;;  %v1569_v15 = vadd.f32 %v1561_v50, %v5522_v44  ;;  %v1570_v50 = vadd.f32 %v1562_v51, %v4310_v22 }
 0x4c8   : > { %v1513_v7 = vpop.f32.mrf.mxu1  ;;  %v1571_v53 = vadd.f32 %v1563_v25, %v4312_v41 }
 0x4c9   : > { %v1554_v5 = vpop.f32.mrf.mxu0  ;;  %v4442_v3 = vadd.f32 %v1470_v52, %v1469_v40  ;;  %3491 = vpow2.f32 %v3072_v45  ;;  %v3073_v48 = vmul.f32 -1.442695, %v1569_v15  ;;  %v1592_v15 = vrot.slane %v4316_v42, 7  ;;  %v4455_v42 = vld [vmem:[#allocation2 + $0x224] ss:$16 sps:$4 sm:$0xff]  }
 0x4ca   : > { %3493 = vrcp.f32 %v1466_v43  ;;  %v3074_v20 = vmul.f32 -1.442695, %v1571_v53 }
 0x4cb   : > { %3495 = vtanh.f32 %v4442_v3 }
 0x4cc   : > { %3497 = vpow2.f32 %v3073_v48 }
 0x4cd   : > { %3499 = vpow2.f32 %v3074_v20 }
 0x4d6   : > { %v3492_v24 = vpop.eup %3491 }
 0x4d7   : > { %v3494_v49 = vpop.eup %3493  ;;  %v1575_v47 = vadd.f32 1.0, %v3492_v24 }
 0x4d8   : > { %v3496_v7 = vpop.eup %3495 }
 0x4d9   : > { %v3498_v5 = vpop.eup %3497  ;;  %v1473_v11 = vmul.f32 %v3496_v7, %v3494_v49  ;;  %3501 = vrcp.f32 %v1575_v47 }
 0x4da   : > { %v1581_v9 = vadd.f32 1.0, %v3498_v5  ;;  %3503 = vtanh.f32 %v1570_v50  ;;  %v3500_v13 = vpop.eup %3499  ;;  %v4451_v5 = vld [vmem:[#allocation2 + $0x240] ss:$16 sps:$4 sm:$0xff]  }
 0x4db   : > { %v1600_v43 = vrot.slane %v1473_v11, 7  ;;  %v1588_v25 = vadd.f32 1.0, %v3500_v13  ;;  %v4461_v11 = vld [vmem:[#allocation2 + $0x220] ss:$16 sps:$4 sm:$0xff]  }
 0x4dc   : > { %3505 = vrcp.f32 %v1581_v9  ;;  %v4465_v9 = vld [vmem:[#allocation2 + $0x204] ss:$16 sps:$4 sm:$0xff]   ;;  %v5554_v13 = vld [vmem:[#allocation47_spill] sm:$0xff] }
 0x4dd   : > { %v1603_v40 = vpack.c.bf16 %v1600_v43, %v1600_v43  ;;  %3507 = vrcp.f32 %v1588_v25  ;;  %v4477_v43 = vld [vmem:[#allocation2 + $0x1e0] ss:$16 sps:$4 sm:$0xff]  }
 0x4de   : > { %v5559_v25 = vld [vmem:[#allocation52_spill] sm:$0xff] }
 0x4df   : > { %v1608_v0 = vshrl.u32 %v1603_v40, 16  ;;  %v5552_v40 = vld [vmem:[#allocation45_spill] sm:$0xff] }
 0x4e1   : > { %1644 = vmatprep.mubr.bf16.mxu1 %v1608_v0  ;;  %1685 = vmatprep.mubr.bf16.mxu0 %v1608_v0  ;;  %v5553_v0 = vld [vmem:[#allocation46_spill] sm:$0xff] }
 0x4e6   : > { %v3502_v52 = vpop.eup %3501 }
 0x4e7   : > { %v3504_v45 = vpop.eup %3503 }
 0x4e8   : > { %v1595_v53 = vmul.f32 %v3504_v45, %v3502_v52  ;;  %v5555_v52 = vld [vmem:[#allocation48_spill] sm:$0xff]  ;;  %v5556_v45 = vld [vmem:[#allocation49_spill] sm:$0xff] }
 0x4e9   : > { %v3506_v48 = vpop.eup %3505 }
 0x4ea   : > { %v1594_v51 = vmul.f32 %v3506_v48, %v1592_v15  ;;  %v3508_v24 = vpop.eup %3507  ;;  %v5557_v15 = vld [vmem:[#allocation50_spill] sm:$0xff]  ;;  %v5558_v48 = vld [vmem:[#allocation51_spill] sm:$0xff] }
 0x4ec   : > { %v4448_v20 = vadd.f32 %v1595_v53, %v1594_v51  ;;  %v5560_v53 = vld [vmem:[#allocation53_spill] sm:$0xff]  ;;  %v5561_v51 = vld [vmem:[#allocation54_spill] sm:$0xff] }
 0x4ee   : > { %3509 = vtanh.f32 %v4448_v20 }
 0x4fb   : > { %v3510_v49 = vpop.eup %3509 }
 0x4fc   : > { %v1598_v47 = vmul.f32 %v3510_v49, %v3508_v24  ;;  %v5562_v24 = vld [vmem:[#allocation55_spill] sm:$0xff]  ;;  %v5563_v49 = vld [vmem:[#allocation56_spill] sm:$0xff] }
 0x4fe   : > { %v1602_v50 = vpack.c.bf16 %v1598_v47, %v1598_v47  ;;  %v5564_v47 = vld [vmem:[#allocation57_spill] sm:$0xff] }
 0x500   : > { %v1605_v7 = vshrl.u32 %v1602_v50, 16  ;;  %v5565_v50 = vld [vmem:[#allocation58_spill] sm:$0xff] }
 0x502   : > { %1645 = vmatmul.mubr.bf16.vlgmr.msra.gmra.mxu1 %v1605_v7  ;;  %1686 = vmatmul.mubr.bf16.vlgmr.msra.gmra.mxu0 %v1605_v7 }
 0x503   : > { %1719 = vmatpush1.bf16.msra.mxu1 %v4451_v5  ;;  %1760 = vmatpush1.bf16.msra.mxu0 %v4038_v54  ;;  %v4469_v54 = vld [vmem:[#allocation2 + $0x200] ss:$16 sps:$4 sm:$0xff]  }
 0x504   : > { %1720 = vmatprep.subr.bf16.mxu1 %v4455_v42  ;;  %1761 = vmatprep.subr.bf16.mxu0 %v4041_v55  ;;  %v4473_v55 = vld [vmem:[#allocation2 + $0x1e4] ss:$16 sps:$4 sm:$0xff]  }
 0x505   : > { %1750 = vmatprep.mubr.bf16.mxu1 %v5460_v46  ;;  %1791 = vmatprep.mubr.bf16.mxu0 %v5460_v46 }
 0x507   : > { %1721 = vmatpush1.bf16.msra.mxu1 %v4461_v11  ;;  %1762 = vmatpush1.bf16.msra.mxu0 %v4045_v56  ;;  %v4481_v56 = vld [vmem:[#allocation2 + $0x1c4] ss:$16 sps:$4 sm:$0xff]  }
 0x508   : > { %1722 = vmatprep.subr.bf16.mxu1 %v4465_v9  ;;  %1763 = vmatprep.subr.bf16.mxu0 %v4049_v57  ;;  %v4485_v57 = vld [vmem:[#allocation2 + $0x1c0] ss:$16 sps:$4 sm:$0xff]  }
 0x50b   : > { %1723 = vmatpush1.bf16.msra.mxu1 %v4469_v54  ;;  %1764 = vmatpush1.bf16.msra.mxu0 %v4052_v59  ;;  %v4489_v59 = vld [vmem:[#allocation2 + $0x1a4] ss:$16 sps:$4 sm:$0xff]  }
 0x50c   : > { %1724 = vmatprep.subr.bf16.mxu1 %v4473_v55  ;;  %1765 = vmatprep.subr.bf16.mxu0 %v4055_v2  ;;  %v4493_v2 = vld [vmem:[#allocation2 + $0x1a0] ss:$16 sps:$4 sm:$0xff]  }
 0x50f   : > { %1725 = vmatpush1.bf16.msra.mxu1 %v4477_v43  ;;  %1766 = vmatpush1.bf16.msra.mxu0 %v4058_v4  ;;  %v4497_v4 = vld [vmem:[#allocation2 + $0x184] ss:$16 sps:$4 sm:$0xff]  }
 0x510   : > { %1726 = vmatprep.subr.bf16.mxu1 %v4481_v56  ;;  %1767 = vmatprep.subr.bf16.mxu0 %v4061_v6  ;;  %v4501_v6 = vld [vmem:[#allocation2 + $0x180] ss:$16 sps:$4 sm:$0xff]  }
 0x513   : > { %1727 = vmatpush1.bf16.msra.mxu1 %v4485_v57  ;;  %1768 = vmatpush1.bf16.msra.mxu0 %v4064_v8  ;;  %v5525_v8 = vld [vmem:[#allocation18_spill] sm:$0xff] }
 0x514   : > { %1728 = vmatprep.subr.bf16.mxu1 %v4489_v59  ;;  %1769 = vmatprep.subr.bf16.mxu0 %v4067_v10  ;;  %v5526_v10 = vld [vmem:[#allocation19_spill] sm:$0xff] }
 0x517   : > { %1729 = vmatpush1.bf16.msra.mxu1 %v4493_v2  ;;  %1770 = vmatpush1.bf16.msra.mxu0 %v4070_v12  ;;  %v5527_v12 = vld [vmem:[#allocation20_spill] sm:$0xff] }
 0x518   : > { %1730 = vmatprep.subr.bf16.mxu1 %v4497_v4  ;;  %1771 = vmatprep.subr.bf16.mxu0 %v4073_v14  ;;  %v5528_v14 = vld [vmem:[#allocation21_spill] sm:$0xff] }
 0x51b   : > { %1731 = vmatpush1.bf16.msra.mxu1 %v4501_v6  ;;  %1772 = vmatpush1.bf16.msra.mxu0 %v4076_v16  ;;  %v5529_v16 = vld [vmem:[#allocation22_spill] sm:$0xff] }
 0x51c   : > { %1732 = vmatprep.subr.bf16.mxu1 %v4022_v17  ;;  %1773 = vmatprep.subr.bf16.mxu0 %v4079_v18  ;;  %v5523_v17 = vld [vmem:[#allocation16_spill] sm:$0xff]  ;;  %v5530_v18 = vld [vmem:[#allocation23_spill] sm:$0xff] }
 0x51f   : > { %1733 = vmatpush1.bf16.msra.mxu1 %v4024_v19  ;;  %1774 = vmatpush1.bf16.msra.mxu0 %v4082_v21  ;;  %v5524_v19 = vld [vmem:[#allocation17_spill] sm:$0xff]  ;;  %v5531_v21 = vld [vmem:[#allocation24_spill] sm:$0xff] }
 0x520   : > { %1854 = vmatprep.subr.bf16.mxu1 %v4091_v26  ;;  %1895 = vmatprep.subr.bf16.mxu0 %v4093_v27  ;;  %v5532_v26 = vld [vmem:[#allocation25_spill] sm:$0xff]  ;;  %v5533_v27 = vld [vmem:[#allocation26_spill] sm:$0xff] }
 0x522   : > { %1751 = vmatmul.mubr.bf16.vlgmr.msra.gmra.mxu1 %v1605_v7  ;;  %1792 = vmatmul.mubr.bf16.vlgmr.msra.gmra.mxu0 %v1605_v7  ;;  %v5566_v7 = vld [vmem:[#allocation59_spill] sm:$0xff] }
 0x523   : > { %1855 = vmatpush1.bf16.msra.mxu1 %v4095_v28  ;;  %1896 = vmatpush1.bf16.msra.mxu0 %v4097_v29  ;;  %v5534_v28 = vld [vmem:[#allocation27_spill] sm:$0xff]  ;;  %v5535_v29 = vld [vmem:[#allocation28_spill] sm:$0xff] }
 0x524   : > { %1856 = vmatprep.subr.bf16.mxu1 %v4103_v30  ;;  %1897 = vmatprep.subr.bf16.mxu0 %v4105_v31  ;;  %v5536_v30 = vld [vmem:[#allocation29_spill] sm:$0xff]  ;;  %v5537_v31 = vld [vmem:[#allocation30_spill] sm:$0xff] }
 0x527   : > { %1857 = vmatpush1.bf16.msra.mxu1 %v4107_v32  ;;  %1898 = vmatpush1.bf16.msra.mxu0 %v4109_v33  ;;  %v5538_v32 = vld [vmem:[#allocation31_spill] sm:$0xff]  ;;  %v5539_v33 = vld [vmem:[#allocation32_spill] sm:$0xff] }
 0x528   : > { %1858 = vmatprep.subr.bf16.mxu1 %v4115_v34  ;;  %1899 = vmatprep.subr.bf16.mxu0 %v4117_v35  ;;  %v5540_v34 = vld [vmem:[#allocation33_spill] sm:$0xff]  ;;  %v5541_v35 = vld [vmem:[#allocation34_spill] sm:$0xff] }
 0x52b   : > { %1859 = vmatpush1.bf16.msra.mxu1 %v4119_v36  ;;  %1900 = vmatpush1.bf16.msra.mxu0 %v4121_v37  ;;  %v5542_v36 = vld [vmem:[#allocation35_spill] sm:$0xff]  ;;  %v5543_v37 = vld [vmem:[#allocation36_spill] sm:$0xff] }
 0x52c   : > { %1860 = vmatprep.subr.bf16.mxu1 %v4127_v38  ;;  %1901 = vmatprep.subr.bf16.mxu0 %v4129_v39  ;;  %v5544_v38 = vld [vmem:[#allocation37_spill] sm:$0xff]  ;;  %v5545_v39 = vld [vmem:[#allocation38_spill] sm:$0xff] }
 0x52f   : > { %1861 = vmatpush1.bf16.msra.mxu1 %v5461_v58  ;;  %1902 = vmatpush1.bf16.msra.mxu0 %v5462_v60  ;;  %v5546_v58 = vld [vmem:[#allocation39_spill] sm:$0xff]  ;;  %v5547_v60 = vld [vmem:[#allocation40_spill] sm:$0xff] }
 0x530   : > { %1862 = vmatprep.subr.bf16.mxu1 %v5463_v61  ;;  %1903 = vmatprep.subr.bf16.mxu0 %v5464_v62  ;;  %v5548_v61 = vld [vmem:[#allocation41_spill] sm:$0xff]  ;;  %v5549_v62 = vld [vmem:[#allocation42_spill] sm:$0xff] }
 0x533   : > { %1863 = vmatpush1.bf16.msra.mxu1 %v5465_v63  ;;  %1904 = vmatpush1.bf16.msra.mxu0 %v5466_v1  ;;  %v5550_v63 = vld [vmem:[#allocation43_spill] sm:$0xff]  ;;  %v5551_v1 = vld [vmem:[#allocation44_spill] sm:$0xff] }
 0x534   : > { %1864 = vmatprep.subr.bf16.mxu1 %v5523_v17  ;;  %1905 = vmatprep.subr.bf16.mxu0 %v5524_v19  ;;  %v4573_v17 = vld [vmem:[#allocation2 + $0x244] ss:$16 sps:$4 sm:$0xff]   ;;  %v4576_v19 = vld [vmem:[#allocation2 + $0x24c] ss:$16 sps:$4 sm:$0xff]  }
 0x535   : > { %5567 = vst [vmem:[#allocation14_spill] sm:$0xff] %v4573_v17  ;;  %5568 = vst [vmem:[#allocation15_spill] sm:$0xff] %v4576_v19 }
 0x537   : > { %1865 = vmatpush1.bf16.msra.mxu1 %v5525_v8  ;;  %1906 = vmatpush1.bf16.msra.mxu0 %v5526_v10 }
 0x538   : > { %1866 = vmatprep.subr.bf16.mxu1 %v5527_v12  ;;  %1907 = vmatprep.subr.bf16.mxu0 %v5528_v14  ;;  %v5569_v12 = vld [vmem:[#allocation10_spill] sm:$0xff] }
 0x53b   : > { %1867 = vmatpush1.bf16.msra.mxu1 %v5529_v16  ;;  %1908 = vmatpush1.bf16.msra.mxu0 %v5530_v18 }
 0x53c   : > { %1868 = vmatprep.subr.bf16.mxu1 %v5531_v21  ;;  %1909 = vmatprep.subr.bf16.mxu0 %v5532_v26  ;;  %v5570_v26 = vld [vmem:[#allocation11_spill] sm:$0xff] }
 0x53f   : > { %1869 = vmatpush1.bf16.msra.mxu1 %v5533_v27  ;;  %1910 = vmatpush1.bf16.msra.mxu0 %v5534_v28 }
 0x540   : > { %1870 = vmatprep.subr.bf16.mxu1 %v5535_v29  ;;  %1911 = vmatprep.subr.bf16.mxu0 %v5536_v30 }
 0x543   : > { %1871 = vmatpush2.bf16.msra.mxu1 %v5537_v31  ;;  %1912 = vmatpush2.bf16.msra.mxu0 %v5538_v32 }
 0x544   : > { %1872 = vmatprep.subr.bf16.mxu1 %v5539_v33  ;;  %1913 = vmatprep.subr.bf16.mxu0 %v5540_v34  ;;  %v5571_v33 = vld [vmem:[#allocation12_spill] sm:$0xff] }
 0x547   : > { %1873 = vmatpush2.bf16.msra.mxu1 %v5541_v35  ;;  %1914 = vmatpush2.bf16.msra.mxu0 %v5542_v36  ;;  %v5572_v35 = vld [vmem:[#allocation13_spill] sm:$0xff] }
 0x548   : > { %1874 = vmatprep.subr.bf16.mxu1 %v5543_v37  ;;  %1915 = vmatprep.subr.bf16.mxu0 %v5544_v38 }
 0x54b   : > { %1875 = vmatpush2.bf16.msra.mxu1 %v5545_v39  ;;  %1916 = vmatpush2.bf16.msra.mxu0 %v5546_v58 }
 0x54c   : > { %1876 = vmatprep.subr.bf16.mxu1 %v5547_v60  ;;  %1917 = vmatprep.subr.bf16.mxu0 %v5548_v61 }
 0x54f   : > { %1877 = vmatpush2.bf16.msra.mxu1 %v5549_v62  ;;  %1918 = vmatpush2.bf16.msra.mxu0 %v5550_v63 }
 0x550   : > { %1878 = vmatprep.subr.bf16.mxu1 %v5551_v1  ;;  %1919 = vmatprep.subr.bf16.mxu0 %v5552_v40 }
 0x553   : > { %1879 = vmatpush2.bf16.msra.mxu1 %v5553_v0  ;;  %1920 = vmatpush2.bf16.msra.mxu0 %v5554_v13 }
 0x554   : > { %1880 = vmatprep.subr.bf16.mxu1 %v5555_v52  ;;  %1921 = vmatprep.subr.bf16.mxu0 %v5556_v45 }
 0x557   : > { %1881 = vmatpush2.bf16.msra.mxu1 %v5557_v15  ;;  %1922 = vmatpush2.bf16.msra.mxu0 %v5558_v48 }
 0x558   : > { %1882 = vmatprep.subr.bf16.mxu1 %v5559_v25  ;;  %1923 = vmatprep.subr.bf16.mxu0 %v5560_v53 }
 0x55b   : > { %1883 = vmatpush2.bf16.msra.mxu1 %v5561_v51  ;;  %1924 = vmatpush2.bf16.msra.mxu0 %v5562_v24 }
 0x55c   : > { %1884 = vmatprep.subr.bf16.mxu1 %v5563_v49  ;;  %1925 = vmatprep.subr.bf16.mxu0 %v5564_v47 }
 0x55f   : > { %1885 = vmatpush2.bf16.msra.mxu1 %v5565_v50  ;;  %1926 = vmatpush2.bf16.msra.mxu0 %v5566_v7 }
 0x560   : > { %1960 = vmatprep.subr.bf16.mxu1 %v4573_v17  ;;  %2001 = vmatprep.subr.bf16.mxu0 %v4576_v19 }
 0x5c2   : > { %v1646_v8 = vpop.f32.mrf.mxu1  ;;  %v1687_v10 = vpop.f32.mrf.mxu0 }
 0x5c3   : > { %v1647_v14 = vadd.f32 %v1646_v8, %v5569_v12  ;;  %v1688_v36 = vadd.f32 %v1687_v10, %v5572_v35 }
 0x5c4   : > { %v1648_v16 = vpop.f32.mrf.mxu1  ;;  %v1689_v18 = vpop.f32.mrf.mxu0 }
 0x5c5   : > { %v3075_v21 = vmul.f32 -1.442695, %v1647_v14  ;;  %v1649_v27 = vadd.f32 %v1648_v16, %v5570_v26  ;;  %v1690_v34 = vadd.f32 %v1689_v18, %v5571_v33 }
 0x5c6   : > { %v1650_v28 = vpop.f32.mrf.mxu1  ;;  %v1691_v29 = vpop.f32.mrf.mxu0 }
 0x5c7   : > { %3511 = vpow2.f32 %v3075_v21  ;;  %v3076_v30 = vmul.f32 -1.442695, %v1649_v27  ;;  %v3077_v38 = vmul.f32 -1.442695, %v1690_v34 }
 0x5c8   : > { %v1651_v31 = vpop.f32.mrf.mxu1  ;;  %v1692_v32 = vpop.f32.mrf.mxu0 }
 0x5c9   : > { %3513 = vpow2.f32 %v3076_v30 }
 0x5ca   : > { %3515 = vtanh.f32 %v1688_v36 }
 0x5d4   : > { %v3512_v37 = vpop.eup %3511 }
 0x5d5   : > { %v1697_v39 = vadd.f32 1.0, %v3512_v37 }
 0x5d6   : > { %v3514_v58 = vpop.eup %3513 }
 0x5d7   : > { %3517 = vrcp.f32 %v1697_v39  ;;  %v1703_v60 = vadd.f32 1.0, %v3514_v58  ;;  %v3516_v63 = vpop.eup %3515 }
 0x5d8   : > { %3519 = vpow2.f32 %v3077_v38 }
 0x5d9   : > { %3521 = vrcp.f32 %v1703_v60 }
 0x5e2   : > { %v1752_v61 = vpop.f32.mrf.mxu1  ;;  %v1793_v62 = vpop.f32.mrf.mxu0 }
 0x5e3   : > { %v1804_v1 = vrot.slane %v1752_v61, 6  ;;  %v1806_v21 = vrot.slane %v1793_v62, 6  ;;  %v1836_v62 = vrot.slane %v4448_v20, 7  ;;  %v4600_v20 = vld [vmem:[#allocation2 + $0x22c] ss:$16 sps:$4 sm:$0xff]  }
 0x5e4   : > { %v3518_v40 = vpop.eup %3517  ;;  %v1754_v0 = vpop.f32.mrf.mxu1 }
 0x5e5   : > { %v1795_v13 = vpop.f32.mrf.mxu0  ;;  %v3520_v52 = vpop.eup %3519  ;;  %v1812_v45 = vadd.f32 %v1804_v1, %v5521_v23  ;;  %v1805_v15 = vrot.slane %v1754_v0, 6  ;;  %v1714_v51 = vmul.f32 %v3518_v40, %v3516_v63  ;;  %v1814_v28 = vadd.f32 %v1806_v21, %v4310_v22  ;;  %v4646_v21 = vld [vmem:[#allocation2 + $0x188] ss:$16 sps:$4 sm:$0xff]  }
 0x5e6   : > { %v3522_v48 = vpop.eup %3521  ;;  %v1756_v25 = vpop.f32.mrf.mxu1  ;;  %v1710_v50 = vadd.f32 1.0, %v3520_v52  ;;  %v1807_v16 = vrot.slane %v1795_v13, 6 }
 0x5e7   : > { %v1797_v53 = vpop.f32.mrf.mxu0  ;;  %v1713_v24 = vmul.f32 %v3522_v48, %v4442_v3  ;;  %v3078_v49 = vmul.f32 -1.442695, %v1812_v45  ;;  %v1813_v47 = vadd.f32 %v1805_v15, %v5522_v44 }
 0x5e8   : > { %v1757_v7 = vpop.f32.mrf.mxu1  ;;  %v1815_v18 = vadd.f32 %v1807_v16, %v4312_v41  ;;  %v4596_v53 = vld [vmem:[#allocation2 + $0x248] ss:$16 sps:$4 sm:$0xff]  }
 0x5e9   : > { %v1798_v8 = vpop.f32.mrf.mxu0  ;;  %3523 = vpow2.f32 %v3078_v49  ;;  %v3079_v10 = vmul.f32 -1.442695, %v1813_v47  ;;  %v4586_v14 = vadd.f32 %v1714_v51, %v1713_v24  ;;  %v4606_v51 = vld [vmem:[#allocation2 + $0x228] ss:$16 sps:$4 sm:$0xff]   ;;  %v4610_v24 = vld [vmem:[#allocation2 + $0x20c] ss:$16 sps:$4 sm:$0xff]  }
 0x5ea   : > { %v3080_v27 = vmul.f32 -1.442695, %v1815_v18  ;;  %v4614_v49 = vld [vmem:[#allocation2 + $0x208] ss:$16 sps:$4 sm:$0xff]   ;;  %v4618_v47 = vld [vmem:[#allocation2 + $0x1ec] ss:$16 sps:$4 sm:$0xff]  }
 0x5eb   : > { %3525 = vpow2.f32 %v3079_v10  ;;  %v4626_v7 = vld [vmem:[#allocation2 + $0x1cc] ss:$16 sps:$4 sm:$0xff]   ;;  %v4630_v8 = vld [vmem:[#allocation2 + $0x1c8] ss:$16 sps:$4 sm:$0xff]  }
 0x5ec   : > { %3527 = vrcp.f32 %v1710_v50  ;;  %v4622_v50 = vld [vmem:[#allocation2 + $0x1e8] ss:$16 sps:$4 sm:$0xff]   ;;  %v4634_v10 = vld [vmem:[#allocation2 + $0x1ac] ss:$16 sps:$4 sm:$0xff]  }
 0x5ed   : > { %3529 = vtanh.f32 %v4586_v14  ;;  %v4638_v16 = vld [vmem:[#allocation2 + $0x1a8] ss:$16 sps:$4 sm:$0xff]   ;;  %v4642_v18 = vld [vmem:[#allocation2 + $0x18c] ss:$16 sps:$4 sm:$0xff]  }
 0x5ee   : > { %3531 = vpow2.f32 %v3080_v27  ;;  %v4649_v27 = vld [vmem:[#allocation2 + $0x164] ss:$16 sps:$4 sm:$0xff]  }
 0x5f6   : > { %v3524_v3 = vpop.eup %3523 }
 0x5f7   : > { %v1819_v29 = vadd.f32 1.0, %v3524_v3  ;;  %v4652_v3 = vld [vmem:[#allocation2 + $0x16c] ss:$16 sps:$4 sm:$0xff]  }
 0x5f8   : > { %v3526_v30 = vpop.eup %3525 }
 0x5f9   : > { %v3528_v31 = vpop.eup %3527  ;;  %3533 = vrcp.f32 %v1819_v29  ;;  %v1825_v32 = vadd.f32 1.0, %v3526_v30  ;;  %v4658_v29 = vld [vmem:[#allocation2 + $0x168] ss:$16 sps:$4 sm:$0xff]   ;;  %v4661_v30 = vld [vmem:[#allocation2 + $0x344] ss:$16 sps:$4 sm:$0xff]  }
 0x5fa   : > { %v3530_v34 = vpop.eup %3529  ;;  %3535 = vtanh.f32 %v1814_v28  ;;  %v4655_v28 = vld [vmem:[#allocation2 + $0x160] ss:$16 sps:$4 sm:$0xff]  }
 0x5fb   : > { %3537 = vrcp.f32 %v1825_v32  ;;  %v1717_v36 = vmul.f32 %v3530_v34, %v3528_v31  ;;  %v3532_v58 = vpop.eup %3531  ;;  %v4664_v31 = vld [vmem:[#allocation2 + $0x34c] ss:$16 sps:$4 sm:$0xff]   ;;  %v4667_v32 = vld [vmem:[#allocation2 + $0x340] ss:$16 sps:$4 sm:$0xff]   ;;  %v4670_v34 = vld [vmem:[#allocation2 + $0x348] ss:$16 sps:$4 sm:$0xff]  }
 0x5fc   : > { %v1832_v1 = vadd.f32 1.0, %v3532_v58  ;;  %v4685_v58 = vld [vmem:[#allocation2 + $0x304] ss:$16 sps:$4 sm:$0xff]  }
 0x5fd   : > { %v1844_v37 = vrot.slane %v1717_v36, 6  ;;  %v4673_v36 = vld [vmem:[#allocation2 + $0x324] ss:$16 sps:$4 sm:$0xff]   ;;  %5575 = vst [vmem:[#allocation61_spill] sm:$0xff] %v4685_v58 }
 0x5fe   : > { %3539 = vrcp.f32 %v1832_v1  ;;  %v4700_v1 = vld [vmem:[#allocation2 + $0x2ec] ss:$16 sps:$4 sm:$0xff]  }
 0x5ff   : > { %v1847_v38 = vpack.c.bf16 %v1844_v37, %v1844_v37  ;;  %v4676_v37 = vld [vmem:[#allocation2 + $0x32c] ss:$16 sps:$4 sm:$0xff]   ;;  %5580 = vst [vmem:[#allocation19_spill] sm:$0xff] %v4700_v1 }
 0x601   : > { %v1851_v39 = vrot.slane %v1847_v38, 1  ;;  %v4679_v38 = vld [vmem:[#allocation2 + $0x320] ss:$16 sps:$4 sm:$0xff]  }
 0x602   : > { %5573 = vst [vmem:[#allocation8_spill] sm:$0xff] %v4679_v38 }
 0x603   : > { %1886 = vmatprep.mubr.bf16.mxu1 %v1851_v39  ;;  %1927 = vmatprep.mubr.bf16.mxu0 %v1851_v39  ;;  %v4682_v39 = vld [vmem:[#allocation2 + $0x328] ss:$16 sps:$4 sm:$0xff]  }
 0x604   : > { %5574 = vst [vmem:[#allocation9_spill] sm:$0xff] %v4682_v39 }
 0x606   : > { %v3534_v60 = vpop.eup %3533 }
 0x607   : > { %v3536_v61 = vpop.eup %3535 }
 0x608   : > { %v3538_v63 = vpop.eup %3537  ;;  %v1839_v40 = vmul.f32 %v3536_v61, %v3534_v60  ;;  %v4688_v60 = vld [vmem:[#allocation2 + $0x30c] ss:$16 sps:$4 sm:$0xff]   ;;  %v4691_v61 = vld [vmem:[#allocation2 + $0x300] ss:$16 sps:$4 sm:$0xff]  }
 0x609   : > { %v1838_v0 = vmul.f32 %v3538_v63, %v1836_v62  ;;  %5576 = vst [vmem:[#allocation60_spill] sm:$0xff] %v4688_v60  ;;  %5577 = vst [vmem:[#allocation16_spill] sm:$0xff] %v4691_v61  ;;  %v4694_v62 = vld [vmem:[#allocation2 + $0x308] ss:$16 sps:$4 sm:$0xff]   ;;  %v4697_v63 = vld [vmem:[#allocation2 + $0x2e4] ss:$16 sps:$4 sm:$0xff]  }
 0x60a   : > { %5578 = vst [vmem:[#allocation17_spill] sm:$0xff] %v4694_v62  ;;  %5579 = vst [vmem:[#allocation18_spill] sm:$0xff] %v4697_v63 }
 0x60b   : > { %v4592_v13 = vadd.f32 %v1839_v40, %v1838_v0  ;;  %v3540_v52 = vpop.eup %3539  ;;  %v4703_v40 = vld [vmem:[#allocation2 + $0x2e0] ss:$16 sps:$4 sm:$0xff]   ;;  %v4706_v0 = vld [vmem:[#allocation2 + $0x2e8] ss:$16 sps:$4 sm:$0xff]  }
 0x60c   : > { %5581 = vst [vmem:[#allocation20_spill] sm:$0xff] %v4703_v40  ;;  %5582 = vst [vmem:[#allocation21_spill] sm:$0xff] %v4706_v0 }
 0x60d   : > { %3541 = vtanh.f32 %v4592_v13 }
 0x61a   : > { %v3542_v45 = vpop.eup %3541 }
 0x61b   : > { %v1842_v15 = vmul.f32 %v3542_v45, %v3540_v52  ;;  %v4709_v52 = vld [vmem:[#allocation2 + $0x2c4] ss:$16 sps:$4 sm:$0xff]   ;;  %v4712_v45 = vld [vmem:[#allocation2 + $0x2cc] ss:$16 sps:$4 sm:$0xff]  }
 0x61c   : > { %5583 = vst [vmem:[#allocation22_spill] sm:$0xff] %v4709_v52  ;;  %5584 = vst [vmem:[#allocation23_spill] sm:$0xff] %v4712_v45 }
 0x61d   : > { %v1846_v48 = vpack.c.bf16 %v1842_v15, %v1842_v15  ;;  %v4715_v15 = vld [vmem:[#allocation2 + $0x2c0] ss:$16 sps:$4 sm:$0xff]  }
 0x61e   : > { %5585 = vst [vmem:[#allocation24_spill] sm:$0xff] %v4715_v15 }
 0x61f   : > { %v1850_v25 = vrot.slane %v1846_v48, 1  ;;  %v4718_v48 = vld [vmem:[#allocation2 + $0x2c8] ss:$16 sps:$4 sm:$0xff]  }
 0x620   : > { %5586 = vst [vmem:[#allocation25_spill] sm:$0xff] %v4718_v48 }
 0x621   : > { %1887 = vmatmul.mubr.bf16.vlgmr.msra.gmra.mxu1 %v1850_v25  ;;  %1928 = vmatmul.mubr.bf16.vlgmr.msra.gmra.mxu0 %v1850_v25 }
 0x622   : > { %1961 = vmatpush1.bf16.msra.mxu1 %v4451_v5  ;;  %2002 = vmatpush1.bf16.msra.mxu0 %v4596_v53 }
 0x623   : > { %1962 = vmatprep.subr.bf16.mxu1 %v4455_v42  ;;  %2003 = vmatprep.subr.bf16.mxu0 %v4600_v20 }
 0x624   : > { %1992 = vmatprep.mubr.bf16.mxu1 %v5460_v46  ;;  %2033 = vmatprep.mubr.bf16.mxu0 %v5460_v46 }
 0x626   : > { %1963 = vmatpush1.bf16.msra.mxu1 %v4461_v11  ;;  %2004 = vmatpush1.bf16.msra.mxu0 %v4606_v51 }
 0x627   : > { %1964 = vmatprep.subr.bf16.mxu1 %v4465_v9  ;;  %2005 = vmatprep.subr.bf16.mxu0 %v4610_v24 }
 0x62a   : > { %1965 = vmatpush1.bf16.msra.mxu1 %v4469_v54  ;;  %2006 = vmatpush1.bf16.msra.mxu0 %v4614_v49 }
 0x62b   : > { %1966 = vmatprep.subr.bf16.mxu1 %v4473_v55  ;;  %2007 = vmatprep.subr.bf16.mxu0 %v4618_v47 }
 0x62e   : > { %1967 = vmatpush1.bf16.msra.mxu1 %v4477_v43  ;;  %2008 = vmatpush1.bf16.msra.mxu0 %v4622_v50 }
 0x62f   : > { %1968 = vmatprep.subr.bf16.mxu1 %v4481_v56  ;;  %2009 = vmatprep.subr.bf16.mxu0 %v4626_v7 }
 0x632   : > { %1969 = vmatpush1.bf16.msra.mxu1 %v4485_v57  ;;  %2010 = vmatpush1.bf16.msra.mxu0 %v4630_v8 }
 0x633   : > { %1970 = vmatprep.subr.bf16.mxu1 %v4489_v59  ;;  %2011 = vmatprep.subr.bf16.mxu0 %v4634_v10 }
 0x636   : > { %1971 = vmatpush1.bf16.msra.mxu1 %v4493_v2  ;;  %2012 = vmatpush1.bf16.msra.mxu0 %v4638_v16 }
 0x637   : > { %1972 = vmatprep.subr.bf16.mxu1 %v4497_v4  ;;  %2013 = vmatprep.subr.bf16.mxu0 %v4642_v18 }
 0x63a   : > { %1973 = vmatpush1.bf16.msra.mxu1 %v4501_v6  ;;  %2014 = vmatpush1.bf16.msra.mxu0 %v4646_v21 }
 0x63b   : > { %1974 = vmatprep.subr.bf16.mxu1 %v4649_v27  ;;  %2015 = vmatprep.subr.bf16.mxu0 %v4652_v3 }
 0x63e   : > { %1975 = vmatpush1.bf16.msra.mxu1 %v4655_v28  ;;  %2016 = vmatpush1.bf16.msra.mxu0 %v4658_v29 }
 0x63f   : > { %2100 = vmatprep.subr.bf16.mxu1 %v4661_v30  ;;  %2141 = vmatprep.subr.bf16.mxu0 %v4664_v31 }
 0x641   : > { %1993 = vmatmul.mubr.bf16.vlgmr.msra.gmra.mxu1 %v1850_v25  ;;  %2034 = vmatmul.mubr.bf16.vlgmr.msra.gmra.mxu0 %v1850_v25  ;;  %v4721_v25 = vld [vmem:[#allocation2 + $0x2a4] ss:$16 sps:$4 sm:$0xff]  }
 0x642   : > { %2101 = vmatpush1.bf16.msra.mxu1 %v4667_v32  ;;  %2142 = vmatpush1.bf16.msra.mxu0 %v4670_v34  ;;  %5587 = vst [vmem:[#allocation26_spill] sm:$0xff] %v4721_v25 }
 0x643   : > { %2102 = vmatprep.subr.bf16.mxu1 %v4673_v36  ;;  %2143 = vmatprep.subr.bf16.mxu0 %v4676_v37 }
 0x646   : > { %2103 = vmatpush1.bf16.msra.mxu1 %v4679_v38  ;;  %2144 = vmatpush1.bf16.msra.mxu0 %v4682_v39 }
 0x647   : > { %2104 = vmatprep.subr.bf16.mxu1 %v4685_v58  ;;  %2145 = vmatprep.subr.bf16.mxu0 %v4688_v60 }
 0x64a   : > { %2105 = vmatpush1.bf16.msra.mxu1 %v4691_v61  ;;  %2146 = vmatpush1.bf16.msra.mxu0 %v4694_v62 }
 0x64b   : > { %2106 = vmatprep.subr.bf16.mxu1 %v4697_v63  ;;  %2147 = vmatprep.subr.bf16.mxu0 %v4700_v1 }
 0x64e   : > { %2107 = vmatpush1.bf16.msra.mxu1 %v4703_v40  ;;  %2148 = vmatpush1.bf16.msra.mxu0 %v4706_v0  ;;  %v4724_v0 = vld [vmem:[#allocation2 + $0x2ac] ss:$16 sps:$4 sm:$0xff]  }
 0x64f   : > { %2108 = vmatprep.subr.bf16.mxu1 %v4709_v52  ;;  %2149 = vmatprep.subr.bf16.mxu0 %v4712_v45  ;;  %5588 = vst [vmem:[#allocation27_spill] sm:$0xff] %v4724_v0  ;;  %v4727_v52 = vld [vmem:[#allocation2 + $0x2a0] ss:$16 sps:$4 sm:$0xff]   ;;  %v4730_v45 = vld [vmem:[#allocation2 + $0x2a8] ss:$16 sps:$4 sm:$0xff]  }
 0x650   : > { %5589 = vst [vmem:[#allocation28_spill] sm:$0xff] %v4727_v52  ;;  %5590 = vst [vmem:[#allocation29_spill] sm:$0xff] %v4730_v45 }
 0x652   : > { %2109 = vmatpush1.bf16.msra.mxu1 %v4715_v15  ;;  %2150 = vmatpush1.bf16.msra.mxu0 %v4718_v48  ;;  %v4733_v15 = vld [vmem:[#allocation2 + $0x284] ss:$16 sps:$4 sm:$0xff]   ;;  %v4736_v48 = vld [vmem:[#allocation2 + $0x28c] ss:$16 sps:$4 sm:$0xff]  }
 0x653   : > { %2110 = vmatprep.subr.bf16.mxu1 %v4721_v25  ;;  %2151 = vmatprep.subr.bf16.mxu0 %v4724_v0  ;;  %5591 = vst [vmem:[#allocation30_spill] sm:$0xff] %v4733_v15  ;;  %5592 = vst [vmem:[#allocation31_spill] sm:$0xff] %v4736_v48  ;;  %v4739_v25 = vld [vmem:[#allocation2 + $0x280] ss:$16 sps:$4 sm:$0xff]   ;;  %v4742_v0 = vld [vmem:[#allocation2 + $0x288] ss:$16 sps:$4 sm:$0xff]  }
 0x654   : > { %5593 = vst [vmem:[#allocation32_spill] sm:$0xff] %v4739_v25  ;;  %5594 = vst [vmem:[#allocation33_spill] sm:$0xff] %v4742_v0 }
 0x656   : > { %2111 = vmatpush1.bf16.msra.mxu1 %v4727_v52  ;;  %2152 = vmatpush1.bf16.msra.mxu0 %v4730_v45  ;;  %v4745_v52 = vld [vmem:[#allocation2 + $0x264] ss:$16 sps:$4 sm:$0xff]   ;;  %v4748_v45 = vld [vmem:[#allocation2 + $0x26c] ss:$16 sps:$4 sm:$0xff]  }
 0x657   : > { %2112 = vmatprep.subr.bf16.mxu1 %v4733_v15  ;;  %2153 = vmatprep.subr.bf16.mxu0 %v4736_v48  ;;  %5595 = vst [vmem:[#allocation34_spill] sm:$0xff] %v4745_v52  ;;  %5596 = vst [vmem:[#allocation35_spill] sm:$0xff] %v4748_v45  ;;  %v4751_v15 = vld [vmem:[#allocation2 + $0x260] ss:$16 sps:$4 sm:$0xff]   ;;  %v4754_v48 = vld [vmem:[#allocation2 + $0x268] ss:$16 sps:$4 sm:$0xff]  }
 0x658   : > { %5597 = vst [vmem:[#allocation36_spill] sm:$0xff] %v4751_v15  ;;  %5598 = vst [vmem:[#allocation37_spill] sm:$0xff] %v4754_v48 }
 0x65a   : > { %2113 = vmatpush1.bf16.msra.mxu1 %v4739_v25  ;;  %2154 = vmatpush1.bf16.msra.mxu0 %v4742_v0  ;;  %v4757_v25 = vld [vmem:[#allocation2 + $0x444] ss:$16 sps:$4 sm:$0xff]   ;;  %v4760_v0 = vld [vmem:[#allocation2 + $0x44c] ss:$16 sps:$4 sm:$0xff]  }
 0x65b   : > { %2114 = vmatprep.subr.bf16.mxu1 %v4745_v52  ;;  %2155 = vmatprep.subr.bf16.mxu0 %v4748_v45  ;;  %5599 = vst [vmem:[#allocation38_spill] sm:$0xff] %v4757_v25  ;;  %5600 = vst [vmem:[#allocation39_spill] sm:$0xff] %v4760_v0  ;;  %v4763_v52 = vld [vmem:[#allocation2 + $0x440] ss:$16 sps:$4 sm:$0xff]   ;;  %v4766_v45 = vld [vmem:[#allocation2 + $0x448] ss:$16 sps:$4 sm:$0xff]  }
 0x65c   : > { %5601 = vst [vmem:[#allocation40_spill] sm:$0xff] %v4763_v52  ;;  %5602 = vst [vmem:[#allocation41_spill] sm:$0xff] %v4766_v45 }
 0x65e   : > { %2115 = vmatpush1.bf16.msra.mxu1 %v4751_v15  ;;  %2156 = vmatpush1.bf16.msra.mxu0 %v4754_v48  ;;  %v4769_v15 = vld [vmem:[#allocation2 + $0x424] ss:$16 sps:$4 sm:$0xff]   ;;  %v4772_v48 = vld [vmem:[#allocation2 + $0x42c] ss:$16 sps:$4 sm:$0xff]  }
 0x65f   : > { %2116 = vmatprep.subr.bf16.mxu1 %v4757_v25  ;;  %2157 = vmatprep.subr.bf16.mxu0 %v4760_v0  ;;  %5603 = vst [vmem:[#allocation42_spill] sm:$0xff] %v4769_v15  ;;  %5604 = vst [vmem:[#allocation43_spill] sm:$0xff] %v4772_v48  ;;  %v4775_v25 = vld [vmem:[#allocation2 + $0x420] ss:$16 sps:$4 sm:$0xff]   ;;  %v4778_v0 = vld [vmem:[#allocation2 + $0x428] ss:$16 sps:$4 sm:$0xff]  }
 0x660   : > { %5605 = vst [vmem:[#allocation44_spill] sm:$0xff] %v4775_v25  ;;  %5606 = vst [vmem:[#allocation45_spill] sm:$0xff] %v4778_v0 }
 0x662   : > { %2117 = vmatpush2.bf16.msra.mxu1 %v4763_v52  ;;  %2158 = vmatpush2.bf16.msra.mxu0 %v4766_v45  ;;  %v4781_v52 = vld [vmem:[#allocation2 + $0x404] ss:$16 sps:$4 sm:$0xff]   ;;  %v4784_v45 = vld [vmem:[#allocation2 + $0x40c] ss:$16 sps:$4 sm:$0xff]  }
 0x663   : > { %2118 = vmatprep.subr.bf16.mxu1 %v4769_v15  ;;  %2159 = vmatprep.subr.bf16.mxu0 %v4772_v48  ;;  %5607 = vst [vmem:[#allocation46_spill] sm:$0xff] %v4781_v52  ;;  %5608 = vst [vmem:[#allocation47_spill] sm:$0xff] %v4784_v45  ;;  %v4787_v15 = vld [vmem:[#allocation2 + $0x400] ss:$16 sps:$4 sm:$0xff]   ;;  %v4790_v48 = vld [vmem:[#allocation2 + $0x408] ss:$16 sps:$4 sm:$0xff]  }
 0x664   : > { %5609 = vst [vmem:[#allocation48_spill] sm:$0xff] %v4787_v15  ;;  %5610 = vst [vmem:[#allocation49_spill] sm:$0xff] %v4790_v48 }
 0x666   : > { %2119 = vmatpush2.bf16.msra.mxu1 %v4775_v25  ;;  %2160 = vmatpush2.bf16.msra.mxu0 %v4778_v0  ;;  %v4793_v25 = vld [vmem:[#allocation2 + $0x3e4] ss:$16 sps:$4 sm:$0xff]   ;;  %v4796_v0 = vld [vmem:[#allocation2 + $0x3ec] ss:$16 sps:$4 sm:$0xff]  }
 0x667   : > { %2120 = vmatprep.subr.bf16.mxu1 %v4781_v52  ;;  %2161 = vmatprep.subr.bf16.mxu0 %v4784_v45  ;;  %5611 = vst [vmem:[#allocation50_spill] sm:$0xff] %v4793_v25  ;;  %5612 = vst [vmem:[#allocation51_spill] sm:$0xff] %v4796_v0  ;;  %v4799_v52 = vld [vmem:[#allocation2 + $0x3e0] ss:$16 sps:$4 sm:$0xff]   ;;  %v4802_v45 = vld [vmem:[#allocation2 + $0x3e8] ss:$16 sps:$4 sm:$0xff]  }
 0x668   : > { %5613 = vst [vmem:[#allocation52_spill] sm:$0xff] %v4799_v52  ;;  %5614 = vst [vmem:[#allocation53_spill] sm:$0xff] %v4802_v45 }
 0x66a   : > { %2121 = vmatpush2.bf16.msra.mxu1 %v4787_v15  ;;  %2162 = vmatpush2.bf16.msra.mxu0 %v4790_v48  ;;  %v4805_v15 = vld [vmem:[#allocation2 + $0x3c4] ss:$16 sps:$4 sm:$0xff]   ;;  %v4808_v48 = vld [vmem:[#allocation2 + $0x3cc] ss:$16 sps:$4 sm:$0xff]  }
 0x66b   : > { %2122 = vmatprep.subr.bf16.mxu1 %v4793_v25  ;;  %2163 = vmatprep.subr.bf16.mxu0 %v4796_v0  ;;  %5615 = vst [vmem:[#allocation54_spill] sm:$0xff] %v4805_v15  ;;  %5616 = vst [vmem:[#allocation55_spill] sm:$0xff] %v4808_v48  ;;  %v4811_v25 = vld [vmem:[#allocation2 + $0x3c0] ss:$16 sps:$4 sm:$0xff]   ;;  %v4814_v0 = vld [vmem:[#allocation2 + $0x3c8] ss:$16 sps:$4 sm:$0xff]  }
 0x66c   : > { %5617 = vst [vmem:[#allocation56_spill] sm:$0xff] %v4811_v25  ;;  %5618 = vst [vmem:[#allocation57_spill] sm:$0xff] %v4814_v0 }
 0x66e   : > { %2123 = vmatpush2.bf16.msra.mxu1 %v4799_v52  ;;  %2164 = vmatpush2.bf16.msra.mxu0 %v4802_v45  ;;  %v4817_v52 = vld [vmem:[#allocation2 + $0x3a4] ss:$16 sps:$4 sm:$0xff]   ;;  %v4820_v45 = vld [vmem:[#allocation2 + $0x3ac] ss:$16 sps:$4 sm:$0xff]  }
 0x66f   : > { %2124 = vmatprep.subr.bf16.mxu1 %v4805_v15  ;;  %2165 = vmatprep.subr.bf16.mxu0 %v4808_v48  ;;  %5619 = vst [vmem:[#allocation58_spill] sm:$0xff] %v4817_v52  ;;  %5620 = vst [vmem:[#allocation59_spill] sm:$0xff] %v4820_v45  ;;  %v4823_v15 = vld [vmem:[#allocation2 + $0x3a0] ss:$16 sps:$4 sm:$0xff]   ;;  %v4826_v48 = vld [vmem:[#allocation2 + $0x3a8] ss:$16 sps:$4 sm:$0xff]  }
 0x670   : > { %5621 = vst [vmem:[#allocation62_spill] sm:$0xff] %v4823_v15  ;;  %5622 = vst [vmem:[#allocation63_spill] sm:$0xff] %v4826_v48 }
 0x672   : > { %2125 = vmatpush2.bf16.msra.mxu1 %v4811_v25  ;;  %2166 = vmatpush2.bf16.msra.mxu0 %v4814_v0  ;;  %v4829_v25 = vld [vmem:[#allocation2 + $0x384] ss:$16 sps:$4 sm:$0xff]   ;;  %v4832_v0 = vld [vmem:[#allocation2 + $0x38c] ss:$16 sps:$4 sm:$0xff]  }
 0x673   : > { %2126 = vmatprep.subr.bf16.mxu1 %v4817_v52  ;;  %2167 = vmatprep.subr.bf16.mxu0 %v4820_v45  ;;  %5623 = vst [vmem:[#allocation64_spill] sm:$0xff] %v4829_v25  ;;  %5624 = vst [vmem:[#allocation65_spill] sm:$0xff] %v4832_v0  ;;  %v4835_v52 = vld [vmem:[#allocation2 + $0x380] ss:$16 sps:$4 sm:$0xff]   ;;  %v4838_v45 = vld [vmem:[#allocation2 + $0x388] ss:$16 sps:$4 sm:$0xff]  }
 0x674   : > { %5625 = vst [vmem:[#allocation66_spill] sm:$0xff] %v4835_v52  ;;  %5626 = vst [vmem:[#allocation67_spill] sm:$0xff] %v4838_v45 }
 0x676   : > { %2127 = vmatpush2.bf16.msra.mxu1 %v4823_v15  ;;  %2168 = vmatpush2.bf16.msra.mxu0 %v4826_v48  ;;  %v4841_v15 = vld [vmem:[#allocation2 + $0x364] ss:$16 sps:$4 sm:$0xff]   ;;  %v4844_v48 = vld [vmem:[#allocation2 + $0x36c] ss:$16 sps:$4 sm:$0xff]  }
 0x677   : > { %2128 = vmatprep.subr.bf16.mxu1 %v4829_v25  ;;  %2169 = vmatprep.subr.bf16.mxu0 %v4832_v0  ;;  %5627 = vst [vmem:[#allocation68_spill] sm:$0xff] %v4841_v15  ;;  %5628 = vst [vmem:[#allocation69_spill] sm:$0xff] %v4844_v48  ;;  %v4847_v25 = vld [vmem:[#allocation2 + $0x360] ss:$16 sps:$4 sm:$0xff]   ;;  %v4850_v0 = vld [vmem:[#allocation2 + $0x368] ss:$16 sps:$4 sm:$0xff]  }
 0x678   : > { %5629 = vst [vmem:[#allocation70_spill] sm:$0xff] %v4847_v25  ;;  %5630 = vst [vmem:[#allocation71_spill] sm:$0xff] %v4850_v0 }
 0x67a   : > { %2129 = vmatpush2.bf16.msra.mxu1 %v4835_v52  ;;  %2170 = vmatpush2.bf16.msra.mxu0 %v4838_v45 }
 0x67b   : > { %2130 = vmatprep.subr.bf16.mxu1 %v4841_v15  ;;  %2171 = vmatprep.subr.bf16.mxu0 %v4844_v48 }
 0x67e   : > { %2131 = vmatpush2.bf16.msra.mxu1 %v4847_v25  ;;  %2172 = vmatpush2.bf16.msra.mxu0 %v4850_v0 }
 0x67f   : > { %2206 = vmatprep.subr.bf16.mxu1 %v4573_v17  ;;  %2247 = vmatprep.subr.bf16.mxu0 %v4576_v19 }
 0x6e1   : > { %v1888_v45 = vpop.f32.mrf.mxu1  ;;  %v1929_v52 = vpop.f32.mrf.mxu0 }
 0x6e2   : > { %v1889_v15 = vadd.f32 %v1888_v45, %v5569_v12  ;;  %v1930_v19 = vadd.f32 %v1929_v52, %v5572_v35 }
 0x6e3   : > { %v1890_v40 = vpop.f32.mrf.mxu1  ;;  %v1931_v1 = vpop.f32.mrf.mxu0 }
 0x6e4   : > { %v3081_v63 = vmul.f32 -1.442695, %v1889_v15  ;;  %v1891_v48 = vadd.f32 %v1890_v40, %v5570_v26  ;;  %v1932_v17 = vadd.f32 %v1931_v1, %v5571_v33 }
 0x6e5   : > { %v1892_v62 = vpop.f32.mrf.mxu1  ;;  %v1933_v61 = vpop.f32.mrf.mxu0 }
 0x6e6   : > { %3543 = vpow2.f32 %v3081_v63  ;;  %v3082_v25 = vmul.f32 -1.442695, %v1891_v48  ;;  %v3083_v39 = vmul.f32 -1.442695, %v1932_v17 }
 0x6e7   : > { %v1893_v60 = vpop.f32.mrf.mxu1  ;;  %v1934_v58 = vpop.f32.mrf.mxu0 }
 0x6e8   : > { %3545 = vpow2.f32 %v3082_v25 }
 0x6e9   : > { %3547 = vtanh.f32 %v1930_v19 }
 0x6f3   : > { %v3544_v0 = vpop.eup %3543 }
 0x6f4   : > { %v1939_v38 = vadd.f32 1.0, %v3544_v0 }
 0x6f5   : > { %v3546_v45 = vpop.eup %3545 }
 0x6f6   : > { %3549 = vrcp.f32 %v1939_v38  ;;  %v1945_v15 = vadd.f32 1.0, %v3546_v45  ;;  %v3548_v63 = vpop.eup %3547 }
 0x6f7   : > { %3551 = vpow2.f32 %v3083_v39 }
 0x6f8   : > { %3553 = vrcp.f32 %v1945_v15 }
 0x701   : > { %v1994_v62 = vpop.f32.mrf.mxu1  ;;  %v2035_v61 = vpop.f32.mrf.mxu0 }
 0x702   : > { %v2046_v40 = vrot.slane %v1994_v62, 5 }
 0x703   : > { %v3550_v60 = vpop.eup %3549  ;;  %v1996_v58 = vpop.f32.mrf.mxu1 }
 0x704   : > { %v2037_v48 = vpop.f32.mrf.mxu0  ;;  %v3552_v25 = vpop.eup %3551  ;;  %v2054_v1 = vadd.f32 %v2046_v40, %v5521_v23  ;;  %v2047_v52 = vrot.slane %v1996_v58, 5  ;;  %v1956_v33 = vmul.f32 %v3550_v60, %v3548_v63  ;;  %v2048_v63 = vrot.slane %v2035_v61, 5 }
 0x705   : > { %v3554_v35 = vpop.eup %3553  ;;  %v1998_v17 = vpop.f32.mrf.mxu1  ;;  %v1952_v45 = vadd.f32 1.0, %v3552_v25  ;;  %v2049_v40 = vrot.slane %v2037_v48, 5 }
 0x706   : > { %v2039_v0 = vpop.f32.mrf.mxu0  ;;  %v1955_v19 = vmul.f32 %v3554_v35, %v4586_v14  ;;  %v3084_v38 = vmul.f32 -1.442695, %v2054_v1  ;;  %v2055_v39 = vadd.f32 %v2047_v52, %v5522_v44  ;;  %v2056_v14 = vadd.f32 %v2048_v63, %v4310_v22 }
 0x707   : > { %v1999_v15 = vpop.f32.mrf.mxu1  ;;  %v2057_v58 = vadd.f32 %v2049_v40, %v4312_v41 }
 0x708   : > { %v2040_v26 = vpop.f32.mrf.mxu0  ;;  %v4862_v62 = vadd.f32 %v1956_v33, %v1955_v19  ;;  %3555 = vpow2.f32 %v3084_v38  ;;  %v3085_v12 = vmul.f32 -1.442695, %v2055_v39 }
 0x709   : > { %v3086_v60 = vmul.f32 -1.442695, %v2057_v58 }
 0x70a   : > { %3557 = vpow2.f32 %v3085_v12 }
 0x70b   : > { %3559 = vrcp.f32 %v1952_v45  ;;  %v2078_v45 = vrot.slane %v4592_v13, 7  ;;  %v5644_v13 = vld [vmem:[#allocation25_spill] sm:$0xff] }
 0x70c   : > { %3561 = vtanh.f32 %v4862_v62 }
 0x70d   : > { %3563 = vpow2.f32 %v3086_v60 }
 0x715   : > { %v3556_v35 = vpop.eup %3555 }
 0x716   : > { %v2061_v1 = vadd.f32 1.0, %v3556_v35 }
 0x717   : > { %v3558_v25 = vpop.eup %3557 }
 0x718   : > { %v3560_v26 = vpop.eup %3559  ;;  %3565 = vrcp.f32 %v2061_v1  ;;  %v2067_v33 = vadd.f32 1.0, %v3558_v25 }
 0x719   : > { %v3562_v52 = vpop.eup %3561  ;;  %3567 = vtanh.f32 %v2056_v14 }
 0x71a   : > { %3569 = vrcp.f32 %v2067_v33  ;;  %v1959_v12 = vmul.f32 %v3562_v52, %v3560_v26  ;;  %v3564_v38 = vpop.eup %3563  ;;  %v5645_v52 = vld [vmem:[#allocation26_spill] sm:$0xff] }
 0x71b   : > { %v2074_v40 = vadd.f32 1.0, %v3564_v38  ;;  %v5651_v38 = vld [vmem:[#allocation32_spill] sm:$0xff] }
 0x71c   : > { %v2086_v48 = vrot.slane %v1959_v12, 5  ;;  %v5646_v12 = vld [vmem:[#allocation27_spill] sm:$0xff] }
 0x71d   : > { %3571 = vrcp.f32 %v2074_v40  ;;  %v5656_v40 = vld [vmem:[#allocation37_spill] sm:$0xff] }
 0x71e   : > { %v2089_v17 = vpack.c.bf16 %v2086_v48, %v2086_v48  ;;  %v5647_v48 = vld [vmem:[#allocation28_spill] sm:$0xff] }
 0x720   : > { %v2095_v0 = vshrl.u32 %v2089_v17, 16  ;;  %v5648_v17 = vld [vmem:[#allocation29_spill] sm:$0xff] }
 0x722   : > { %v2097_v19 = vrot.slane %v2095_v0, 1  ;;  %v5649_v0 = vld [vmem:[#allocation30_spill] sm:$0xff] }
 0x724   : > { %2132 = vmatprep.mubr.bf16.mxu1 %v2097_v19  ;;  %2173 = vmatprep.mubr.bf16.mxu0 %v2097_v19  ;;  %v5650_v19 = vld [vmem:[#allocation31_spill] sm:$0xff] }
 0x725   : > { %v3566_v61 = vpop.eup %3565 }
 0x726   : > { %v3568_v39 = vpop.eup %3567 }
 0x727   : > { %v3570_v15 = vpop.eup %3569  ;;  %v2081_v58 = vmul.f32 %v3568_v39, %v3566_v61  ;;  %v5652_v61 = vld [vmem:[#allocation33_spill] sm:$0xff]  ;;  %v5653_v39 = vld [vmem:[#allocation34_spill] sm:$0xff] }
 0x728   : > { %v2080_v63 = vmul.f32 %v3570_v15, %v2078_v45  ;;  %v5654_v45 = vld [vmem:[#allocation35_spill] sm:$0xff]  ;;  %v5655_v15 = vld [vmem:[#allocation36_spill] sm:$0xff] }
 0x72a   : > { %v4868_v60 = vadd.f32 %v2081_v58, %v2080_v63  ;;  %v3572_v35 = vpop.eup %3571  ;;  %v5657_v58 = vld [vmem:[#allocation38_spill] sm:$0xff]  ;;  %v5658_v63 = vld [vmem:[#allocation39_spill] sm:$0xff] }
 0x72c   : > { %3573 = vtanh.f32 %v4868_v60 }
 0x739   : > { %v3574_v14 = vpop.eup %3573 }
 0x73a   : > { %v2084_v1 = vmul.f32 %v3574_v14, %v3572_v35  ;;  %v5659_v35 = vld [vmem:[#allocation40_spill] sm:$0xff]  ;;  %v5660_v14 = vld [vmem:[#allocation41_spill] sm:$0xff] }
 0x73c   : > { %v2088_v25 = vpack.c.bf16 %v2084_v1, %v2084_v1  ;;  %v5661_v1 = vld [vmem:[#allocation42_spill] sm:$0xff] }
 0x73e   : > { %v2091_v26 = vshrl.u32 %v2088_v25, 16  ;;  %v5662_v25 = vld [vmem:[#allocation43_spill] sm:$0xff] }
 0x740   : > { %v2093_v33 = vrot.slane %v2091_v26, 1  ;;  %v5663_v26 = vld [vmem:[#allocation44_spill] sm:$0xff] }
 0x742   : > { %2133 = vmatmul.mubr.bf16.vlgmr.msra.gmra.mxu1 %v2093_v33  ;;  %2174 = vmatmul.mubr.bf16.vlgmr.msra.gmra.mxu0 %v2093_v33 }
 0x743   : > { %2207 = vmatpush1.bf16.msra.mxu1 %v4451_v5  ;;  %2248 = vmatpush1.bf16.msra.mxu0 %v4596_v53  ;;  %v5631_v5 = vld [vmem:[#allocation8_spill] sm:$0xff] }
 0x744   : > { %2208 = vmatprep.subr.bf16.mxu1 %v4455_v42  ;;  %2249 = vmatprep.subr.bf16.mxu0 %v4600_v20  ;;  %v5632_v42 = vld [vmem:[#allocation9_spill] sm:$0xff] }
 0x745   : > { %2238 = vmatprep.mubr.bf16.mxu1 %v5460_v46  ;;  %2279 = vmatprep.mubr.bf16.mxu0 %v5460_v46 }
 0x747   : > { %2209 = vmatpush1.bf16.msra.mxu1 %v4461_v11  ;;  %2250 = vmatpush1.bf16.msra.mxu0 %v4606_v51  ;;  %v5633_v11 = vld [vmem:[#allocation61_spill] sm:$0xff] }
 0x748   : > { %2210 = vmatprep.subr.bf16.mxu1 %v4465_v9  ;;  %2251 = vmatprep.subr.bf16.mxu0 %v4610_v24  ;;  %v5634_v9 = vld [vmem:[#allocation60_spill] sm:$0xff] }
 0x74b   : > { %2211 = vmatpush1.bf16.msra.mxu1 %v4469_v54  ;;  %2252 = vmatpush1.bf16.msra.mxu0 %v4614_v49  ;;  %v5635_v54 = vld [vmem:[#allocation16_spill] sm:$0xff] }
 0x74c   : > { %2212 = vmatprep.subr.bf16.mxu1 %v4473_v55  ;;  %2253 = vmatprep.subr.bf16.mxu0 %v4618_v47  ;;  %v5636_v55 = vld [vmem:[#allocation17_spill] sm:$0xff] }
 0x74f   : > { %2213 = vmatpush1.bf16.msra.mxu1 %v4477_v43  ;;  %2254 = vmatpush1.bf16.msra.mxu0 %v4622_v50  ;;  %v5637_v43 = vld [vmem:[#allocation18_spill] sm:$0xff] }
 0x750   : > { %2214 = vmatprep.subr.bf16.mxu1 %v4481_v56  ;;  %2255 = vmatprep.subr.bf16.mxu0 %v4626_v7  ;;  %v5638_v56 = vld [vmem:[#allocation19_spill] sm:$0xff] }
 0x753   : > { %2215 = vmatpush1.bf16.msra.mxu1 %v4485_v57  ;;  %2256 = vmatpush1.bf16.msra.mxu0 %v4630_v8  ;;  %v5639_v57 = vld [vmem:[#allocation20_spill] sm:$0xff] }
 0x754   : > { %2216 = vmatprep.subr.bf16.mxu1 %v4489_v59  ;;  %2257 = vmatprep.subr.bf16.mxu0 %v4634_v10  ;;  %v5640_v59 = vld [vmem:[#allocation21_spill] sm:$0xff] }
 0x757   : > { %2217 = vmatpush1.bf16.msra.mxu1 %v4493_v2  ;;  %2258 = vmatpush1.bf16.msra.mxu0 %v4638_v16  ;;  %v5641_v2 = vld [vmem:[#allocation22_spill] sm:$0xff] }
 0x758   : > { %2218 = vmatprep.subr.bf16.mxu1 %v4497_v4  ;;  %2259 = vmatprep.subr.bf16.mxu0 %v4642_v18  ;;  %v5642_v4 = vld [vmem:[#allocation23_spill] sm:$0xff] }
 0x75b   : > { %2219 = vmatpush1.bf16.msra.mxu1 %v4501_v6  ;;  %2260 = vmatpush1.bf16.msra.mxu0 %v4646_v21  ;;  %v5643_v6 = vld [vmem:[#allocation24_spill] sm:$0xff] }
 0x75c   : > { %2220 = vmatprep.subr.bf16.mxu1 %v4649_v27  ;;  %2261 = vmatprep.subr.bf16.mxu0 %v4652_v3 }
 0x75f   : > { %2221 = vmatpush1.bf16.msra.mxu1 %v4655_v28  ;;  %2262 = vmatpush1.bf16.msra.mxu0 %v4658_v29 }
 0x760   : > { %2342 = vmatprep.subr.bf16.mxu1 %v4661_v30  ;;  %2383 = vmatprep.subr.bf16.mxu0 %v4664_v31 }
 0x762   : > { %2239 = vmatmul.mubr.bf16.vlgmr.msra.gmra.mxu1 %v2093_v33  ;;  %2280 = vmatmul.mubr.bf16.vlgmr.msra.gmra.mxu0 %v2093_v33  ;;  %v5664_v33 = vld [vmem:[#allocation45_spill] sm:$0xff] }
 0x763   : > { %2343 = vmatpush1.bf16.msra.mxu1 %v4667_v32  ;;  %2384 = vmatpush1.bf16.msra.mxu0 %v4670_v34 }
 0x764   : > { %2344 = vmatprep.subr.bf16.mxu1 %v4673_v36  ;;  %2385 = vmatprep.subr.bf16.mxu0 %v4676_v37 }
 0x767   : > { %2345 = vmatpush1.bf16.msra.mxu1 %v5631_v5  ;;  %2386 = vmatpush1.bf16.msra.mxu0 %v5632_v42 }
 0x768   : > { %2346 = vmatprep.subr.bf16.mxu1 %v5633_v11  ;;  %2387 = vmatprep.subr.bf16.mxu0 %v5634_v9 }
 0x76b   : > { %2347 = vmatpush1.bf16.msra.mxu1 %v5635_v54  ;;  %2388 = vmatpush1.bf16.msra.mxu0 %v5636_v55 }
 0x76c   : > { %2348 = vmatprep.subr.bf16.mxu1 %v5637_v43  ;;  %2389 = vmatprep.subr.bf16.mxu0 %v5638_v56 }
 0x76f   : > { %2349 = vmatpush1.bf16.msra.mxu1 %v5639_v57  ;;  %2390 = vmatpush1.bf16.msra.mxu0 %v5640_v59 }
 0x770   : > { %2350 = vmatprep.subr.bf16.mxu1 %v5641_v2  ;;  %2391 = vmatprep.subr.bf16.mxu0 %v5642_v4 }
 0x773   : > { %2351 = vmatpush1.bf16.msra.mxu1 %v5643_v6  ;;  %2392 = vmatpush1.bf16.msra.mxu0 %v5644_v13 }
 0x774   : > { %2352 = vmatprep.subr.bf16.mxu1 %v5645_v52  ;;  %2393 = vmatprep.subr.bf16.mxu0 %v5646_v12 }
 0x777   : > { %2353 = vmatpush1.bf16.msra.mxu1 %v5647_v48  ;;  %2394 = vmatpush1.bf16.msra.mxu0 %v5648_v17  ;;  %v5694_v48 = vld [vmem:[#allocation13_spill] sm:$0xff] }
 0x778   : > { %2354 = vmatprep.subr.bf16.mxu1 %v5649_v0  ;;  %2395 = vmatprep.subr.bf16.mxu0 %v5650_v19 }
 0x77b   : > { %2355 = vmatpush1.bf16.msra.mxu1 %v5651_v38  ;;  %2396 = vmatpush1.bf16.msra.mxu0 %v5652_v61 }
 0x77c   : > { %2356 = vmatprep.subr.bf16.mxu1 %v5653_v39  ;;  %2397 = vmatprep.subr.bf16.mxu0 %v5654_v45  ;;  %v5665_v45 = vld [vmem:[#allocation46_spill] sm:$0xff] }
 0x77d   : > { %v5691_v39 = vld [vmem:[#allocation10_spill] sm:$0xff] }
 0x77f   : > { %2357 = vmatpush1.bf16.msra.mxu1 %v5655_v15  ;;  %2398 = vmatpush1.bf16.msra.mxu0 %v5656_v40  ;;  %v5666_v15 = vld [vmem:[#allocation47_spill] sm:$0xff]  ;;  %v5667_v40 = vld [vmem:[#allocation48_spill] sm:$0xff] }
 0x780   : > { %2358 = vmatprep.subr.bf16.mxu1 %v5657_v58  ;;  %2399 = vmatprep.subr.bf16.mxu0 %v5658_v63  ;;  %v5668_v58 = vld [vmem:[#allocation49_spill] sm:$0xff]  ;;  %v5669_v63 = vld [vmem:[#allocation50_spill] sm:$0xff] }
 0x783   : > { %2359 = vmatpush2.bf16.msra.mxu1 %v5659_v35  ;;  %2400 = vmatpush2.bf16.msra.mxu0 %v5660_v14  ;;  %v5670_v35 = vld [vmem:[#allocation51_spill] sm:$0xff]  ;;  %v5671_v14 = vld [vmem:[#allocation52_spill] sm:$0xff] }
 0x784   : > { %2360 = vmatprep.subr.bf16.mxu1 %v5661_v1  ;;  %2401 = vmatprep.subr.bf16.mxu0 %v5662_v25  ;;  %v5672_v1 = vld [vmem:[#allocation53_spill] sm:$0xff]  ;;  %v5673_v25 = vld [vmem:[#allocation54_spill] sm:$0xff] }
 0x787   : > { %2361 = vmatpush2.bf16.msra.mxu1 %v5663_v26  ;;  %2402 = vmatpush2.bf16.msra.mxu0 %v5664_v33  ;;  %v5674_v26 = vld [vmem:[#allocation55_spill] sm:$0xff]  ;;  %v5675_v33 = vld [vmem:[#allocation56_spill] sm:$0xff] }
 0x788   : > { %2362 = vmatprep.subr.bf16.mxu1 %v5665_v45  ;;  %2403 = vmatprep.subr.bf16.mxu0 %v5666_v15  ;;  %v5676_v45 = vld [vmem:[#allocation57_spill] sm:$0xff]  ;;  %v5677_v15 = vld [vmem:[#allocation58_spill] sm:$0xff] }
 0x78b   : > { %2363 = vmatpush2.bf16.msra.mxu1 %v5667_v40  ;;  %2404 = vmatpush2.bf16.msra.mxu0 %v5668_v58  ;;  %v5678_v40 = vld [vmem:[#allocation59_spill] sm:$0xff]  ;;  %v5679_v58 = vld [vmem:[#allocation62_spill] sm:$0xff] }
 0x78c   : > { %2364 = vmatprep.subr.bf16.mxu1 %v5669_v63  ;;  %2405 = vmatprep.subr.bf16.mxu0 %v5670_v35  ;;  %v5680_v63 = vld [vmem:[#allocation63_spill] sm:$0xff]  ;;  %v5681_v35 = vld [vmem:[#allocation64_spill] sm:$0xff] }
 0x78f   : > { %2365 = vmatpush2.bf16.msra.mxu1 %v5671_v14  ;;  %2406 = vmatpush2.bf16.msra.mxu0 %v5672_v1  ;;  %v5682_v14 = vld [vmem:[#allocation65_spill] sm:$0xff]  ;;  %v5683_v1 = vld [vmem:[#allocation66_spill] sm:$0xff] }
 0x790   : > { %2366 = vmatprep.subr.bf16.mxu1 %v5673_v25  ;;  %2407 = vmatprep.subr.bf16.mxu0 %v5674_v26  ;;  %v5684_v25 = vld [vmem:[#allocation67_spill] sm:$0xff]  ;;  %v5685_v26 = vld [vmem:[#allocation68_spill] sm:$0xff] }
 0x793   : > { %2367 = vmatpush2.bf16.msra.mxu1 %v5675_v33  ;;  %2408 = vmatpush2.bf16.msra.mxu0 %v5676_v45  ;;  %v5686_v33 = vld [vmem:[#allocation69_spill] sm:$0xff]  ;;  %v5687_v45 = vld [vmem:[#allocation70_spill] sm:$0xff] }
 0x794   : > { %2368 = vmatprep.subr.bf16.mxu1 %v5677_v15  ;;  %2409 = vmatprep.subr.bf16.mxu0 %v5678_v40  ;;  %v5688_v15 = vld [vmem:[#allocation71_spill] sm:$0xff]  ;;  %v5689_v40 = vld [vmem:[#allocation14_spill] sm:$0xff] }
 0x797   : > { %2369 = vmatpush2.bf16.msra.mxu1 %v5679_v58  ;;  %2410 = vmatpush2.bf16.msra.mxu0 %v5680_v63  ;;  %v5690_v58 = vld [vmem:[#allocation15_spill] sm:$0xff] }
 0x798   : > { %2370 = vmatprep.subr.bf16.mxu1 %v5681_v35  ;;  %2411 = vmatprep.subr.bf16.mxu0 %v5682_v14 }
 0x79b   : > { %2371 = vmatpush2.bf16.msra.mxu1 %v5683_v1  ;;  %2412 = vmatpush2.bf16.msra.mxu0 %v5684_v25  ;;  %v5692_v25 = vld [vmem:[#allocation11_spill] sm:$0xff] }
 0x79c   : > { %2372 = vmatprep.subr.bf16.mxu1 %v5685_v26  ;;  %2413 = vmatprep.subr.bf16.mxu0 %v5686_v33 }
 0x79f   : > { %2373 = vmatpush2.bf16.msra.mxu1 %v5687_v45  ;;  %2414 = vmatpush2.bf16.msra.mxu0 %v5688_v15  ;;  %v5693_v15 = vld [vmem:[#allocation12_spill] sm:$0xff] }
 0x7a0   : > { %2448 = vmatprep.subr.bf16.mxu1 %v5689_v40  ;;  %2489 = vmatprep.subr.bf16.mxu0 %v5690_v58 }
 0x802   : > { %v2134_v63 = vpop.f32.mrf.mxu1  ;;  %v2175_v35 = vpop.f32.mrf.mxu0 }
 0x803   : > { %v2135_v14 = vadd.f32 %v2134_v63, %v5691_v39  ;;  %v2176_v58 = vadd.f32 %v2175_v35, %v5694_v48 }
 0x804   : > { %v2136_v61 = vpop.f32.mrf.mxu1  ;;  %v2177_v1 = vpop.f32.mrf.mxu0 }
 0x805   : > { %v3087_v38 = vmul.f32 -1.442695, %v2135_v14  ;;  %v2137_v19 = vadd.f32 %v2136_v61, %v5692_v25  ;;  %v2178_v40 = vadd.f32 %v2177_v1, %v5693_v15 }
 0x806   : > { %v2138_v26 = vpop.f32.mrf.mxu1  ;;  %v2179_v0 = vpop.f32.mrf.mxu0 }
 0x807   : > { %3575 = vpow2.f32 %v3087_v38  ;;  %v3088_v33 = vmul.f32 -1.442695, %v2137_v19  ;;  %v3089_v52 = vmul.f32 -1.442695, %v2178_v40 }
 0x808   : > { %v2139_v45 = vpop.f32.mrf.mxu1  ;;  %v2180_v17 = vpop.f32.mrf.mxu0 }
 0x809   : > { %3577 = vpow2.f32 %v3088_v33 }
 0x80a   : > { %3579 = vtanh.f32 %v2176_v58 }
 0x814   : > { %v3576_v12 = vpop.eup %3575 }
 0x815   : > { %v2185_v13 = vadd.f32 1.0, %v3576_v12 }
 0x816   : > { %v3578_v63 = vpop.eup %3577 }
 0x817   : > { %3581 = vrcp.f32 %v2185_v13  ;;  %v2191_v14 = vadd.f32 1.0, %v3578_v63  ;;  %v3580_v38 = vpop.eup %3579 }
 0x818   : > { %3583 = vpow2.f32 %v3089_v52 }
 0x819   : > { %3585 = vrcp.f32 %v2191_v14 }
 0x822   : > { %v2240_v61 = vpop.f32.mrf.mxu1  ;;  %v2281_v0 = vpop.f32.mrf.mxu0 }
 0x823   : > { %v2292_v19 = vrot.slane %v2240_v61, 4 }
 0x824   : > { %v3582_v45 = vpop.eup %3581  ;;  %v2242_v17 = vpop.f32.mrf.mxu1 }
 0x825   : > { %v2283_v26 = vpop.f32.mrf.mxu0  ;;  %v3584_v33 = vpop.eup %3583  ;;  %v2300_v1 = vadd.f32 %v2292_v19, %v5521_v23  ;;  %v2293_v35 = vrot.slane %v2242_v17, 4  ;;  %v2202_v15 = vmul.f32 %v3582_v45, %v3580_v38  ;;  %v2294_v38 = vrot.slane %v2281_v0, 4 }
 0x826   : > { %v3586_v48 = vpop.eup %3585  ;;  %v2244_v40 = vpop.f32.mrf.mxu1  ;;  %v2198_v63 = vadd.f32 1.0, %v3584_v33  ;;  %v2295_v19 = vrot.slane %v2283_v26, 4 }
 0x827   : > { %v2285_v12 = vpop.f32.mrf.mxu0  ;;  %v2201_v13 = vmul.f32 %v3586_v48, %v4862_v62  ;;  %v3090_v58 = vmul.f32 -1.442695, %v2300_v1  ;;  %v2301_v52 = vadd.f32 %v2293_v35, %v5522_v44  ;;  %v2302_v48 = vadd.f32 %v2294_v38, %v4310_v22 }
 0x828   : > { %v2245_v14 = vpop.f32.mrf.mxu1  ;;  %v2303_v17 = vadd.f32 %v2295_v19, %v4312_v41 }
 0x829   : > { %v2286_v25 = vpop.f32.mrf.mxu0  ;;  %3587 = vpow2.f32 %v3090_v58  ;;  %v3091_v61 = vmul.f32 -1.442695, %v2301_v52  ;;  %v4976_v39 = vadd.f32 %v2202_v15, %v2201_v13 }
 0x82a   : > { %v3092_v45 = vmul.f32 -1.442695, %v2303_v17 }
 0x82b   : > { %3589 = vpow2.f32 %v3091_v61 }
 0x82c   : > { %3591 = vrcp.f32 %v2198_v63  ;;  %v2324_v63 = vrot.slane %v4868_v60, 7  ;;  %v3752_v60 = vld [vmem:[#allocation2 + $0x224] ss:$16 sps:$4 sm:$0xff]  }
 0x82d   : > { %3593 = vtanh.f32 %v4976_v39 }
 0x82e   : > { %3595 = vpow2.f32 %v3092_v45 }
 0x836   : > { %v3588_v62 = vpop.eup %3587 }
 0x837   : > { %v2307_v1 = vadd.f32 1.0, %v3588_v62 }
 0x838   : > { %v3590_v33 = vpop.eup %3589 }
 0x839   : > { %v3592_v25 = vpop.eup %3591  ;;  %3597 = vrcp.f32 %v2307_v1  ;;  %v2313_v35 = vadd.f32 1.0, %v3590_v33 }
 0x83a   : > { %v3594_v15 = vpop.eup %3593  ;;  %3599 = vtanh.f32 %v2302_v48 }
 0x83b   : > { %3601 = vrcp.f32 %v2313_v35  ;;  %v2205_v40 = vmul.f32 %v3594_v15, %v3592_v25  ;;  %v3596_v0 = vpop.eup %3595  ;;  %v3751_v25 = vld [vmem:[#allocation2 + $0x240] ss:$16 sps:$4 sm:$0xff]   ;;  %v3754_v15 = vld [vmem:[#allocation2 + $0x204] ss:$16 sps:$4 sm:$0xff]  }
 0x83c   : > { %v2320_v61 = vadd.f32 1.0, %v3596_v0  ;;  %v3753_v35 = vld [vmem:[#allocation2 + $0x220] ss:$16 sps:$4 sm:$0xff]  }
 0x83d   : > { %v2332_v26 = vrot.slane %v2205_v40, 4  ;;  %v3755_v40 = vld [vmem:[#allocation2 + $0x200] ss:$16 sps:$4 sm:$0xff]  }
 0x83e   : > { %3603 = vrcp.f32 %v2320_v61  ;;  %v5727_v0 = vld [vmem:[#allocation57_spill] sm:$0xff]  ;;  %v5732_v61 = vld [vmem:[#allocation64_spill] sm:$0xff] }
 0x83f   : > { %v2335_v12 = vpack.c.bf16 %v2332_v26, %v2332_v26  ;;  %v5724_v26 = vld [vmem:[#allocation54_spill] sm:$0xff] }
 0x841   : > { %v2339_v13 = vrot.slane %v2335_v12, 2  ;;  %v5725_v12 = vld [vmem:[#allocation55_spill] sm:$0xff] }
 0x843   : > { %2374 = vmatprep.mubr.bf16.mxu1 %v2339_v13  ;;  %2415 = vmatprep.mubr.bf16.mxu0 %v2339_v13  ;;  %v5726_v13 = vld [vmem:[#allocation56_spill] sm:$0xff] }
 0x846   : > { %v3598_v58 = vpop.eup %3597 }
 0x847   : > { %v3600_v52 = vpop.eup %3599 }
 0x848   : > { %v3602_v14 = vpop.eup %3601  ;;  %v2327_v19 = vmul.f32 %v3600_v52, %v3598_v58  ;;  %v5728_v58 = vld [vmem:[#allocation58_spill] sm:$0xff]  ;;  %v5729_v52 = vld [vmem:[#allocation59_spill] sm:$0xff] }
 0x849   : > { %v2326_v17 = vmul.f32 %v3602_v14, %v2324_v63  ;;  %v5730_v63 = vld [vmem:[#allocation62_spill] sm:$0xff]  ;;  %v5731_v14 = vld [vmem:[#allocation63_spill] sm:$0xff] }
 0x84b   : > { %v4982_v38 = vadd.f32 %v2327_v19, %v2326_v17  ;;  %v3604_v45 = vpop.eup %3603  ;;  %v5733_v19 = vld [vmem:[#allocation65_spill] sm:$0xff]  ;;  %v5734_v17 = vld [vmem:[#allocation66_spill] sm:$0xff] }
 0x84d   : > { %3605 = vtanh.f32 %v4982_v38 }
 0x85a   : > { %v3606_v62 = vpop.eup %3605 }
 0x85b   : > { %v2330_v48 = vmul.f32 %v3606_v62, %v3604_v45  ;;  %v5735_v45 = vld [vmem:[#allocation67_spill] sm:$0xff]  ;;  %v5736_v62 = vld [vmem:[#allocation68_spill] sm:$0xff] }
 0x85d   : > { %v2334_v1 = vpack.c.bf16 %v2330_v48, %v2330_v48  ;;  %v5737_v48 = vld [vmem:[#allocation69_spill] sm:$0xff] }
 0x85f   : > { %v2338_v33 = vrot.slane %v2334_v1, 2  ;;  %v5738_v1 = vld [vmem:[#allocation70_spill] sm:$0xff] }
 0x861   : > { %2375 = vmatmul.mubr.bf16.vlgmr.msra.gmra.mxu1 %v2338_v33  ;;  %2416 = vmatmul.mubr.bf16.vlgmr.msra.gmra.mxu0 %v2338_v33 }
 0x862   : > { %2449 = vmatpush1.bf16.msra.mxu1 %v3751_v25  ;;  %2490 = vmatpush1.bf16.msra.mxu0 %v4596_v53  ;;  %v3756_v53 = vld [vmem:[#allocation2 + $0x1e4] ss:$16 sps:$4 sm:$0xff]   ;;  %v5740_v25 = vmov 0.0  }
 0x863   : > { %2450 = vmatprep.subr.bf16.mxu1 %v3752_v60  ;;  %2491 = vmatprep.subr.bf16.mxu0 %v4600_v20  ;;  %v3757_v20 = vld [vmem:[#allocation2 + $0x1e0] ss:$16 sps:$4 sm:$0xff]  }
 0x864   : > { %2480 = vmatprep.mubr.bf16.mxu1 %v5460_v46  ;;  %2521 = vmatprep.mubr.bf16.mxu0 %v5460_v46  ;;  %v3758_v46 = vld [vmem:[#allocation2 + $0x1c4] ss:$16 sps:$4 sm:$0xff]  }
 0x866   : > { %2451 = vmatpush1.bf16.msra.mxu1 %v3753_v35  ;;  %2492 = vmatpush1.bf16.msra.mxu0 %v4606_v51  ;;  %v3759_v51 = vld [vmem:[#allocation2 + $0x1c0] ss:$16 sps:$4 sm:$0xff]  }
 0x867   : > { %2452 = vmatprep.subr.bf16.mxu1 %v3754_v15  ;;  %2493 = vmatprep.subr.bf16.mxu0 %v4610_v24  ;;  %v3760_v24 = vld [vmem:[#allocation2 + $0x1a4] ss:$16 sps:$4 sm:$0xff]  }
 0x868   : > { %v5741_v15 = vld [vmem:[#allocation10_spill] sm:$0xff] }
 0x86a   : > { %2453 = vmatpush1.bf16.msra.mxu1 %v3755_v40  ;;  %2494 = vmatpush1.bf16.msra.mxu0 %v4614_v49  ;;  %v3761_v49 = vld [vmem:[#allocation2 + $0x1a0] ss:$16 sps:$4 sm:$0xff]  }
 0x86b   : > { %2454 = vmatprep.subr.bf16.mxu1 %v3756_v53  ;;  %2495 = vmatprep.subr.bf16.mxu0 %v4618_v47  ;;  %v3762_v47 = vld [vmem:[#allocation2 + $0x184] ss:$16 sps:$4 sm:$0xff]  }
 0x86e   : > { %2455 = vmatpush1.bf16.msra.mxu1 %v3757_v20  ;;  %2496 = vmatpush1.bf16.msra.mxu0 %v4622_v50  ;;  %v3763_v50 = vld [vmem:[#allocation2 + $0x180] ss:$16 sps:$4 sm:$0xff]  }
 0x86f   : > { %2456 = vmatprep.subr.bf16.mxu1 %v3758_v46  ;;  %2497 = vmatprep.subr.bf16.mxu0 %v4626_v7  ;;  %v5695_v7 = vld [vmem:[#allocation25_spill] sm:$0xff] }
 0x872   : > { %2457 = vmatpush1.bf16.msra.mxu1 %v3759_v51  ;;  %2498 = vmatpush1.bf16.msra.mxu0 %v4630_v8  ;;  %v5696_v8 = vld [vmem:[#allocation26_spill] sm:$0xff]  ;;  %v5742_v51 = vld [vmem:[#allocation11_spill] sm:$0xff] }
 0x873   : > { %2458 = vmatprep.subr.bf16.mxu1 %v3760_v24  ;;  %2499 = vmatprep.subr.bf16.mxu0 %v4634_v10  ;;  %v5697_v10 = vld [vmem:[#allocation27_spill] sm:$0xff] }
 0x876   : > { %2459 = vmatpush1.bf16.msra.mxu1 %v3761_v49  ;;  %2500 = vmatpush1.bf16.msra.mxu0 %v4638_v16  ;;  %v5698_v16 = vld [vmem:[#allocation28_spill] sm:$0xff] }
 0x877   : > { %2460 = vmatprep.subr.bf16.mxu1 %v3762_v47  ;;  %2501 = vmatprep.subr.bf16.mxu0 %v4642_v18  ;;  %v5699_v18 = vld [vmem:[#allocation29_spill] sm:$0xff] }
 0x87a   : > { %2461 = vmatpush1.bf16.msra.mxu1 %v3763_v50  ;;  %2502 = vmatpush1.bf16.msra.mxu0 %v4646_v21  ;;  %v5700_v21 = vld [vmem:[#allocation30_spill] sm:$0xff] }
 0x87b   : > { %2462 = vmatprep.subr.bf16.mxu1 %v4649_v27  ;;  %2503 = vmatprep.subr.bf16.mxu0 %v4652_v3  ;;  %v5701_v27 = vld [vmem:[#allocation31_spill] sm:$0xff]  ;;  %v5702_v3 = vld [vmem:[#allocation32_spill] sm:$0xff] }
 0x87e   : > { %2463 = vmatpush1.bf16.msra.mxu1 %v4655_v28  ;;  %2504 = vmatpush1.bf16.msra.mxu0 %v4658_v29  ;;  %v5703_v28 = vld [vmem:[#allocation33_spill] sm:$0xff]  ;;  %v5704_v29 = vld [vmem:[#allocation34_spill] sm:$0xff] }
 0x87f   : > { %2588 = vmatprep.subr.bf16.mxu1 %v4661_v30  ;;  %2629 = vmatprep.subr.bf16.mxu0 %v4664_v31  ;;  %v5705_v30 = vld [vmem:[#allocation35_spill] sm:$0xff]  ;;  %v5706_v31 = vld [vmem:[#allocation36_spill] sm:$0xff] }
 0x881   : > { %2481 = vmatmul.mubr.bf16.vlgmr.msra.gmra.mxu1 %v2338_v33  ;;  %2522 = vmatmul.mubr.bf16.vlgmr.msra.gmra.mxu0 %v2338_v33  ;;  %v5739_v33 = vld [vmem:[#allocation71_spill] sm:$0xff] }
 0x882   : > { %2589 = vmatpush1.bf16.msra.mxu1 %v4667_v32  ;;  %2630 = vmatpush1.bf16.msra.mxu0 %v4670_v34  ;;  %v5707_v32 = vld [vmem:[#allocation37_spill] sm:$0xff]  ;;  %v5708_v34 = vld [vmem:[#allocation38_spill] sm:$0xff] }
 0x883   : > { %2590 = vmatprep.subr.bf16.mxu1 %v4673_v36  ;;  %2631 = vmatprep.subr.bf16.mxu0 %v4676_v37  ;;  %v5709_v36 = vld [vmem:[#allocation39_spill] sm:$0xff]  ;;  %v5710_v37 = vld [vmem:[#allocation40_spill] sm:$0xff] }
 0x886   : > { %2591 = vmatpush1.bf16.msra.mxu1 %v5631_v5  ;;  %2632 = vmatpush1.bf16.msra.mxu0 %v5632_v42  ;;  %v5711_v5 = vld [vmem:[#allocation41_spill] sm:$0xff]  ;;  %v5712_v42 = vld [vmem:[#allocation42_spill] sm:$0xff] }
 0x887   : > { %2592 = vmatprep.subr.bf16.mxu1 %v5633_v11  ;;  %2633 = vmatprep.subr.bf16.mxu0 %v5634_v9  ;;  %v5713_v11 = vld [vmem:[#allocation43_spill] sm:$0xff]  ;;  %v5714_v9 = vld [vmem:[#allocation44_spill] sm:$0xff] }
 0x88a   : > { %2593 = vmatpush1.bf16.msra.mxu1 %v5635_v54  ;;  %2634 = vmatpush1.bf16.msra.mxu0 %v5636_v55  ;;  %v5715_v54 = vld [vmem:[#allocation45_spill] sm:$0xff]  ;;  %v5716_v55 = vld [vmem:[#allocation46_spill] sm:$0xff] }
 0x88b   : > { %2594 = vmatprep.subr.bf16.mxu1 %v5637_v43  ;;  %2635 = vmatprep.subr.bf16.mxu0 %v5638_v56  ;;  %v5717_v43 = vld [vmem:[#allocation47_spill] sm:$0xff]  ;;  %v5718_v56 = vld [vmem:[#allocation48_spill] sm:$0xff] }
 0x88e   : > { %2595 = vmatpush1.bf16.msra.mxu1 %v5639_v57  ;;  %2636 = vmatpush1.bf16.msra.mxu0 %v5640_v59  ;;  %v5719_v57 = vld [vmem:[#allocation49_spill] sm:$0xff]  ;;  %v5720_v59 = vld [vmem:[#allocation50_spill] sm:$0xff] }
 0x88f   : > { %2596 = vmatprep.subr.bf16.mxu1 %v5641_v2  ;;  %2637 = vmatprep.subr.bf16.mxu0 %v5642_v4  ;;  %v5721_v2 = vld [vmem:[#allocation51_spill] sm:$0xff]  ;;  %v5722_v4 = vld [vmem:[#allocation52_spill] sm:$0xff] }
 0x892   : > { %2597 = vmatpush1.bf16.msra.mxu1 %v5643_v6  ;;  %2638 = vmatpush1.bf16.msra.mxu0 %v5695_v7  ;;  %v5723_v6 = vld [vmem:[#allocation53_spill] sm:$0xff] }
 0x893   : > { %2598 = vmatprep.subr.bf16.mxu1 %v5696_v8  ;;  %2639 = vmatprep.subr.bf16.mxu0 %v5697_v10  ;;  %v5743_v10 = vld [vmem:[#allocation12_spill] sm:$0xff] }
 0x896   : > { %2599 = vmatpush1.bf16.msra.mxu1 %v5698_v16  ;;  %2640 = vmatpush1.bf16.msra.mxu0 %v5699_v18  ;;  %v5744_v18 = vld [vmem:[#allocation13_spill] sm:$0xff] }
 0x897   : > { %2600 = vmatprep.subr.bf16.mxu1 %v5700_v21  ;;  %2641 = vmatprep.subr.bf16.mxu0 %v5701_v27 }
 0x89a   : > { %2601 = vmatpush1.bf16.msra.mxu1 %v5702_v3  ;;  %2642 = vmatpush1.bf16.msra.mxu0 %v5703_v28 }
 0x89b   : > { %2602 = vmatprep.subr.bf16.mxu1 %v5704_v29  ;;  %2643 = vmatprep.subr.bf16.mxu0 %v5705_v30 }
 0x89e   : > { %2603 = vmatpush1.bf16.msra.mxu1 %v5706_v31  ;;  %2644 = vmatpush1.bf16.msra.mxu0 %v5707_v32 }
 0x89f   : > { %2604 = vmatprep.subr.bf16.mxu1 %v5708_v34  ;;  %2645 = vmatprep.subr.bf16.mxu0 %v5709_v36 }
 0x8a2   : > { %2605 = vmatpush2.bf16.msra.mxu1 %v5710_v37  ;;  %2646 = vmatpush2.bf16.msra.mxu0 %v5711_v5 }
 0x8a3   : > { %2606 = vmatprep.subr.bf16.mxu1 %v5712_v42  ;;  %2647 = vmatprep.subr.bf16.mxu0 %v5713_v11 }
 0x8a6   : > { %2607 = vmatpush2.bf16.msra.mxu1 %v5714_v9  ;;  %2648 = vmatpush2.bf16.msra.mxu0 %v5715_v54 }
 0x8a7   : > { %2608 = vmatprep.subr.bf16.mxu1 %v5716_v55  ;;  %2649 = vmatprep.subr.bf16.mxu0 %v5717_v43 }
 0x8aa   : > { %2609 = vmatpush2.bf16.msra.mxu1 %v5718_v56  ;;  %2650 = vmatpush2.bf16.msra.mxu0 %v5719_v57 }
 0x8ab   : > { %2610 = vmatprep.subr.bf16.mxu1 %v5720_v59  ;;  %2651 = vmatprep.subr.bf16.mxu0 %v5721_v2 }
 0x8ae   : > { %2611 = vmatpush2.bf16.msra.mxu1 %v5722_v4  ;;  %2652 = vmatpush2.bf16.msra.mxu0 %v5723_v6 }
 0x8af   : > { %2612 = vmatprep.subr.bf16.mxu1 %v5724_v26  ;;  %2653 = vmatprep.subr.bf16.mxu0 %v5725_v12 }
 0x8b2   : > { %2613 = vmatpush2.bf16.msra.mxu1 %v5726_v13  ;;  %2654 = vmatpush2.bf16.msra.mxu0 %v5727_v0 }
 0x8b3   : > { %2614 = vmatprep.subr.bf16.mxu1 %v5728_v58  ;;  %2655 = vmatprep.subr.bf16.mxu0 %v5729_v52 }
 0x8b6   : > { %2615 = vmatpush2.bf16.msra.mxu1 %v5730_v63  ;;  %2656 = vmatpush2.bf16.msra.mxu0 %v5731_v14 }
 0x8b7   : > { %2616 = vmatprep.subr.bf16.mxu1 %v5732_v61  ;;  %2657 = vmatprep.subr.bf16.mxu0 %v5733_v19 }
 0x8ba   : > { %2617 = vmatpush2.bf16.msra.mxu1 %v5734_v17  ;;  %2658 = vmatpush2.bf16.msra.mxu0 %v5735_v45 }
 0x8bb   : > { %2618 = vmatprep.subr.bf16.mxu1 %v5736_v62  ;;  %2659 = vmatprep.subr.bf16.mxu0 %v5737_v48 }
 0x8be   : > { %2619 = vmatpush2.bf16.msra.mxu1 %v5738_v1  ;;  %2660 = vmatpush2.bf16.msra.mxu0 %v5739_v33 }
 0x8bf   : > { %3164 = vmatprep.subr.bf16.mxu1 %v5740_v25  ;;  %3184 = vmatprep.subr.bf16.mxu0 %v5740_v25 }
 0x921   : > { %v2376_v60 = vpop.f32.mrf.mxu1  ;;  %v2417_v35 = vpop.f32.mrf.mxu0 }
 0x922   : > { %v2377_v40 = vadd.f32 %v2376_v60, %v5741_v15  ;;  %v2418_v21 = vadd.f32 %v2417_v35, %v5744_v18 }
 0x923   : > { %v2378_v53 = vpop.f32.mrf.mxu1  ;;  %v2419_v20 = vpop.f32.mrf.mxu0 }
 0x924   : > { %v3093_v46 = vmul.f32 -1.442695, %v2377_v40  ;;  %v2379_v24 = vadd.f32 %v2378_v53, %v5742_v51  ;;  %v2420_v16 = vadd.f32 %v2419_v20, %v5743_v10 }
 0x925   : > { %v2380_v49 = vpop.f32.mrf.mxu1  ;;  %v2421_v47 = vpop.f32.mrf.mxu0 }
 0x926   : > { %3607 = vpow2.f32 %v3093_v46  ;;  %v3094_v50 = vmul.f32 -1.442695, %v2379_v24  ;;  %v3095_v3 = vmul.f32 -1.442695, %v2420_v16 }
 0x927   : > { %v2381_v7 = vpop.f32.mrf.mxu1  ;;  %v2422_v8 = vpop.f32.mrf.mxu0 }
 0x928   : > { %3609 = vpow2.f32 %v3094_v50 }
 0x929   : > { %3611 = vtanh.f32 %v2418_v21 }
 0x933   : > { %v3608_v27 = vpop.eup %3607 }
 0x934   : > { %v2427_v28 = vadd.f32 1.0, %v3608_v27  ;;  %v3452_v27 = vld [vmem:[#allocation2 + $0x520] ss:$16 sps:$4 sm:$0xff]  }
 0x935   : > { %v3610_v29 = vpop.eup %3609 }
 0x936   : > { %3613 = vrcp.f32 %v2427_v28  ;;  %v2433_v30 = vadd.f32 1.0, %v3610_v29  ;;  %v3612_v34 = vpop.eup %3611  ;;  %v3454_v28 = vld [vmem:[#allocation2 + $0x4e0] ss:$16 sps:$4 sm:$0xff]  }
 0x937   : > { %3615 = vpow2.f32 %v3095_v3  ;;  %v3453_v3 = vld [vmem:[#allocation2 + $0x500] ss:$16 sps:$4 sm:$0xff]  }
 0x938   : > { %3617 = vrcp.f32 %v2433_v30  ;;  %v3455_v29 = vld [vmem:[#allocation2 + $0x4c0] ss:$16 sps:$4 sm:$0xff]  }
 0x939   : > { %v3456_v30 = vld [vmem:[#allocation2 + $0x4a0] ss:$16 sps:$4 sm:$0xff]  }
 0x941   : > { %v2482_v31 = vpop.f32.mrf.mxu1  ;;  %v2523_v32 = vpop.f32.mrf.mxu0 }
 0x942   : > { %v2534_v36 = vrot.slane %v2482_v31, 3  ;;  %v2536_v52 = vrot.slane %v2523_v32, 3  ;;  %v3457_v31 = vld [vmem:[#allocation2 + $0x480] ss:$16 sps:$4 sm:$0xff]  }
 0x943   : > { %v3614_v37 = vpop.eup %3613  ;;  %v2484_v5 = vpop.f32.mrf.mxu1  ;;  %v3458_v32 = vld [vmem:[#allocation2 + $0x460] ss:$16 sps:$4 sm:$0xff]  }
 0x944   : > { %v2525_v42 = vpop.f32.mrf.mxu0  ;;  %v3616_v11 = vpop.eup %3615  ;;  %v2542_v9 = vadd.f32 %v2534_v36, %v5521_v23  ;;  %v2535_v54 = vrot.slane %v2484_v5, 3  ;;  %v2444_v57 = vmul.f32 %v3614_v37, %v3612_v34  ;;  %v2544_v14 = vadd.f32 %v2536_v52, %v4310_v22  ;;  %v3459_v34 = vld [vmem:[#allocation2 + $0x5c0] ss:$16 sps:$4 sm:$0xff]  }
 0x945   : > { %v3618_v55 = vpop.eup %3617  ;;  %v2486_v43 = vpop.f32.mrf.mxu1  ;;  %v2440_v6 = vadd.f32 1.0, %v3616_v11  ;;  %v2537_v23 = vrot.slane %v2525_v42, 3  ;;  %v2566_v22 = vrot.slane %v4982_v38, 7  ;;  %v3451_v38 = vld [vmem:[#allocation2 + $0x540] ss:$16 sps:$4 sm:$0xff]  }
 0x946   : > { %v2527_v56 = vpop.f32.mrf.mxu0  ;;  %v2443_v59 = vmul.f32 %v3618_v55, %v4976_v39  ;;  %v3096_v2 = vmul.f32 -1.442695, %v2542_v9  ;;  %v2543_v4 = vadd.f32 %v2535_v54, %v5522_v44  ;;  %v3460_v36 = vld [vmem:[#allocation2 + $0x5a0] ss:$16 sps:$4 sm:$0xff]  }
 0x947   : > { %v2487_v26 = vpop.f32.mrf.mxu1  ;;  %v2545_v58 = vadd.f32 %v2537_v23, %v4312_v41 }
 0x948   : > { %v2528_v12 = vpop.f32.mrf.mxu0  ;;  %v5077_v13 = vadd.f32 %v2444_v57, %v2443_v59  ;;  %3619 = vpow2.f32 %v3096_v2  ;;  %v3097_v0 = vmul.f32 -1.442695, %v2543_v4 }
 0x949   : > { %v3098_v63 = vmul.f32 -1.442695, %v2545_v58 }
 0x94a   : > { %3621 = vpow2.f32 %v3097_v0 }
 0x94b   : > { %3623 = vrcp.f32 %v2440_v6 }
 0x94c   : > { %3625 = vtanh.f32 %v5077_v13 }
 0x94d   : > { %3627 = vpow2.f32 %v3098_v63 }
 0x955   : > { %v3620_v39 = vpop.eup %3619 }
 0x956   : > { %v2549_v44 = vadd.f32 1.0, %v3620_v39 }
 0x957   : > { %v3622_v61 = vpop.eup %3621 }
 0x958   : > { %v3624_v19 = vpop.eup %3623  ;;  %3629 = vrcp.f32 %v2549_v44  ;;  %v2555_v17 = vadd.f32 1.0, %v3622_v61 }
 0x959   : > { %v3626_v45 = vpop.eup %3625  ;;  %3631 = vtanh.f32 %v2544_v14 }
 0x95a   : > { %3633 = vrcp.f32 %v2555_v17  ;;  %v2447_v62 = vmul.f32 %v3626_v45, %v3624_v19  ;;  %v3628_v41 = vpop.eup %3627  ;;  %v3461_v45 = vld [vmem:[#allocation2 + $0x580] ss:$16 sps:$4 sm:$0xff]  }
 0x95b   : > { %v2562_v20 = vadd.f32 1.0, %v3628_v41 }
 0x95c   : > { %v2574_v48 = vrot.slane %v2447_v62, 3  ;;  %v3462_v62 = vld [vmem:[#allocation2 + $0x560] ss:$16 sps:$4 sm:$0xff]  }
 0x95d   : > { %3635 = vrcp.f32 %v2562_v20 }
 0x95e   : > { %v2577_v1 = vpack.c.bf16 %v2574_v48, %v2574_v48 }
 0x960   : > { %v2583_v33 = vshrl.u32 %v2577_v1, 16 }
 0x962   : > { %v2585_v60 = vrot.slane %v2583_v33, 2 }
 0x964   : > { %2620 = vmatprep.mubr.bf16.mxu1 %v2585_v60  ;;  %2661 = vmatprep.mubr.bf16.mxu0 %v2585_v60 }
 0x965   : > { %v3630_v35 = vpop.eup %3629 }
 0x966   : > { %v3632_v40 = vpop.eup %3631 }
 0x967   : > { %v3634_v53 = vpop.eup %3633  ;;  %v2569_v46 = vmul.f32 %v3632_v40, %v3630_v35 }
 0x968   : > { %v2568_v24 = vmul.f32 %v3634_v53, %v2566_v22 }
 0x96a   : > { %v2570_v49 = vadd.f32 %v2569_v46, %v2568_v24  ;;  %v3636_v47 = vpop.eup %3635 }
 0x96c   : > { %3637 = vtanh.f32 %v2570_v49 }
 0x979   : > { %v3638_v50 = vpop.eup %3637 }
 0x97a   : > { %v2572_v7 = vmul.f32 %v3638_v50, %v3636_v47 }
 0x97c   : > { %v2576_v8 = vpack.c.bf16 %v2572_v7, %v2572_v7 }
 0x97e   : > { %v2579_v16 = vshrl.u32 %v2576_v8, 16 }
 0x980   : > { %v2581_v21 = vrot.slane %v2579_v16, 2 }
 0x982   : > { %2621 = vmatmul.mubr.bf16.vlgmr.msra.gmra.mxu1 %v2581_v21  ;;  %2662 = vmatmul.mubr.bf16.vlgmr.msra.gmra.mxu0 %v2581_v21 }
 0x983   : > { %3180 = vmatprep.mubr.msk.bf16.mxu1 %vm3860_vm2, %v5740_v25  ;;  %3192 = vmatprep.mubr.msk.bf16.mxu0 %vm3860_vm2, %v5740_v25 }
 0x984   : > { %3165 = vmatpush3.bf16.msra.mxu1 %v3451_v38  ;;  %3185 = vmatpush3.bf16.msra.mxu0 %v3459_v34 }
 0x985   : > { %3166 = vmatprep.subr.bf16.mxu1 %v5740_v25  ;;  %3186 = vmatprep.subr.bf16.mxu0 %v5740_v25 }
 0x988   : > { %3167 = vmatpush3.bf16.msra.mxu1 %v3452_v27  ;;  %3187 = vmatpush3.bf16.msra.mxu0 %v3460_v36 }
 0x989   : > { %3168 = vmatprep.subr.bf16.mxu1 %v5740_v25  ;;  %3188 = vmatprep.subr.bf16.mxu0 %v5740_v25 }
 0x98c   : > { %3169 = vmatpush3.bf16.msra.mxu1 %v3453_v3  ;;  %3189 = vmatpush3.bf16.msra.mxu0 %v3461_v45 }
 0x98d   : > { %3170 = vmatprep.subr.bf16.mxu1 %v5740_v25  ;;  %3190 = vmatprep.subr.bf16.mxu0 %v5740_v25 }
 0x990   : > { %3171 = vmatpush3.bf16.msra.mxu1 %v3454_v28  ;;  %3191 = vmatpush3.bf16.msra.mxu0 %v3462_v62 }
 0x991   : > { %3172 = vmatprep.subr.bf16.mxu1 %v5740_v25 }
 0x994   : > { %3173 = vmatpush3.bf16.msra.mxu1 %v3455_v29 }
 0x995   : > { %3174 = vmatprep.subr.bf16.mxu1 %v5740_v25 }
 0x998   : > { %3175 = vmatpush3.bf16.msra.mxu1 %v3456_v30 }
 0x999   : > { %3176 = vmatprep.subr.bf16.mxu1 %v5740_v25 }
 0x99c   : > { %3177 = vmatpush3.bf16.msra.mxu1 %v3457_v31 }
 0x99d   : > { %3178 = vmatprep.subr.bf16.mxu1 %v5740_v25  ;;  %v341_v25 = vld [vmem:[%s5157_s2 + $0x5] ss:$0 sm:$0xff] }
 0x9a0   : > { %3179 = vmatpush3.bf16.msra.mxu1 %v3458_v32 }
 0xa42   : > { %v2622_v37 = vpop.f32.mrf.mxu1  ;;  %v2663_v5 = vpop.f32.mrf.mxu0 }
 0xa43   : > { %v2623_v42 = vadd.f32 %v2622_v37, %v5741_v15  ;;  %v2664_v12 = vadd.f32 %v2663_v5, %v5744_v18 }
 0xa44   : > { %v2624_v11 = vpop.f32.mrf.mxu1  ;;  %v2665_v9 = vpop.f32.mrf.mxu0 }
 0xa45   : > { %v3099_v54 = vmul.f32 -1.442695, %v2623_v42  ;;  %v2625_v55 = vadd.f32 %v2624_v11, %v5742_v51  ;;  %v2666_v4 = vadd.f32 %v2665_v9, %v5743_v10 }
 0xa46   : > { %v2626_v43 = vpop.f32.mrf.mxu1  ;;  %v2667_v56 = vpop.f32.mrf.mxu0 }
 0xa47   : > { %3639 = vpow2.f32 %v3099_v54  ;;  %v3100_v57 = vmul.f32 -1.442695, %v2625_v55  ;;  %v3101_v6 = vmul.f32 -1.442695, %v2666_v4 }
 0xa48   : > { %v2627_v59 = vpop.f32.mrf.mxu1  ;;  %v2668_v2 = vpop.f32.mrf.mxu0 }
 0xa49   : > { %3641 = vpow2.f32 %v3100_v57 }
 0xa4a   : > { %3643 = vpow2.f32 %v3101_v6 }
 0xa54   : > { %v3640_v26 = vpop.eup %3639 }
 0xa55   : > { %v2673_v0 = vadd.f32 1.0, %v3640_v26 }
 0xa56   : > { %v3642_v15 = vpop.eup %3641 }
 0xa57   : > { %3645 = vrcp.f32 %v2673_v0  ;;  %v2679_v23 = vadd.f32 1.0, %v3642_v15  ;;  %v3644_v51 = vpop.eup %3643 }
 0xa58   : > { %3647 = vtanh.f32 %v2664_v12  ;;  %v2686_v39 = vadd.f32 1.0, %v3644_v51 }
 0xa59   : > { %3649 = vrcp.f32 %v2679_v23 }
 0xa5a   : > { %3651 = vrcp.f32 %v2686_v39 }
 0xa64   : > { %v3646_v58 = vpop.eup %3645 }
 0xa65   : > { %v3648_v52 = vpop.eup %3647 }
 0xa66   : > { %v3650_v63 = vpop.eup %3649  ;;  %v2690_v14 = vmul.f32 %v3648_v52, %v3646_v58 }
 0xa67   : > { %v2689_v44 = vmul.f32 %v3650_v63, %v5077_v13  ;;  %v3652_v61 = vpop.eup %3651  ;;  %v340_v13 = vld [vmem:[%s5157_s2 + $0x4] ss:$0 sm:$0xff] }
 0xa69   : > { %v2691_v10 = vadd.f32 %v2690_v14, %v2689_v44 }
 0xa6b   : > { %3653 = vtanh.f32 %v2691_v10 }
 0xa78   : > { %v3654_v18 = vpop.eup %3653 }
 0xa79   : > { %v2693_v19 = vmul.f32 %v3654_v18, %v3652_v61 }
 0xa7b   : > { %v2694_v17 = vpack.c.bf16 %v2693_v19, %v2693_v19 }
 0xa7d   : > { %3181 = vmatmul.mubr.bf16.vlgmr.msra.gmra.mxu1 %v2694_v17 }
 0xb3d   : > { %v2777_v48 = vpop.f32.mrf.mxu1 }
 0xb3e   : > { %v2778_v1 = vadd.f32 %v2777_v48, %v340_v13 }
 0xb3f   : > { %v3182_v33 = vpop.f32.mrf.mxu1 }
 0xb40   : > { %v2783_v60 = vmax.f32 %v2778_v1, 0.0 }
 0xb41   : > { %v2780_v41 = vpop.f32.mrf.mxu1 }
 0xb42   : > { %v2784_v35 = vpack.c.bf16 %v2783_v60, %v2783_v60 }
 0xb43   : > { %v3183_v40 = vpop.f32.mrf.mxu1 }
 0xb44   : > { %3193 = vmatmul.mubr.msk.bf16.vlgmr.msra.gmra.mxu0 %vm451_vm7, %v2784_v35 }
 0xc04   : > { %v2846_v22 = vpop.f32.mrf.mxu0 }
 0xc05   : > { %v2847_v53 = vadd.f32 %v2846_v22, %v341_v25 }
 0xc06   : > { %v3194_v20 = vpop.f32.mrf.mxu0 }
 0xc07   : > { %2852 = vst [vmem:[%s177_s10] sm:$0x1] %v2847_v53 }
 0xc08   : > { %v2849_v46 = vpop.f32.mrf.mxu0 }
 0xc09   : > { %3803 = shalt.err (!%p3800_p0)
}
 0xc0a   : > { %s3804_s28 = scalar_lea.hbm %s5114_s20, 16  ;;  %s3808_s4 = scalar_lea.hbm %s5158_s3, 32 }
 0xc0b   : > { %p3805_p1 = scmp.ne.s32.totalorder %s5114_s20, %s3804_s28  ;;  %p3809_p4 = scmp.lt.s32.totalorder %s5114_s20, %s5158_s3 }
 0xc0c   : > { %p3810_p7 = scmp.lt.s32.totalorder %s3808_s4, %s3804_s28 }
 0xc0d   : > { %p3806_p2 = pnand %p3805_p1, %p3926_p5 }
 0xc0e   : > { %p3811_p8 = por %p3810_p7, %p3809_p4 }
 0xc0f   : > { %p3807_p3 = pneg %p3806_p2 }
 0xc11   : > { %p3812_p6 = pnand %p3811_p8, %p3807_p3 }
 0xc13   : > { %3815 = shalt.err (!%p3812_p6)
}
 0xc14   : > { %3200 = dma.vmem_to_hbm [thread:$0]  (%p3926_p5), %s5116_s11, 16, %s5114_s20, %s2854_s24   ;;  %v3195_v24 = vpop.f32.mrf.mxu0 }
 0xc15 PF: > { %p3212_p9 = scmp.ge.s32.totalorder %s3854_s15, 2  ;;  %s2878_s7 = sand.u32 1, %s3842_s12  }
 0xc16   : > { %p5745_p10 = scmp.ne.s32.totalorder %s5404_s23, 0  ;;  %s2879_s8 = scalar_lea.sflag [#allocation4], %s2878_s7 }
 0xc18   : > { %p3207_p11 = pnand %p3212_p9, %p5745_p10 }
 0xc1a   : > { %p3208_p12 = pneg %p3207_p11 }
 0xc1c   : > { %3837 = dma.done.wait (%p3208_p12), %s2879_s8, 16  }
 0xc1d   : > { %3839 = vsyncadd (%p3208_p12), %s2879_s8, 4294967280  ;;  %p14_p13 = scmp.ge.s32.totalorder %s3913_s18, 4   ;;  %s5746_s12 = smov %s3846_s13 }
 0xc1e   : > { %s5747_s13 = smov %s3850_s14  ;;  %s5748_s14 = smov %s3924_s21 }
 0xc1f   : > { %s5749_s15 = smov %s3913_s18  ;;  %16 = sbr.rel (!%p14_p13) target bundleno = 4 (0x4), region = 74 }
 0xc24   :  { %2883 = vsyncpa [#allocation3], 1 }
 0xc25   :  { %2885 = vsyncpa [#allocation3 + $0x1], 1 }
 0xc26   :  { %2886 = vsyncpa [#allocation4], 1 }
 0xc27   :  { %2888 = vsyncpa [#allocation4 + $0x1], 1 }

</bundles_post_ra>
